<compile_context>
chip_gen: v7x
topology: tpu7x:2x2x1
jax: 0.10.0
libtpu: 0.0.40
codegen_flags: <defaults>
</compile_context>

<pallas_src>
import functools

import jax
import jax.numpy as jnp
from jax import lax
from jax.experimental import pallas as pl
from jax.experimental.pallas import tpu as pltpu


def _round_up(n, m):
    return (n + m - 1) // m * m


# Feature-detect single-buffering of constant-index inputs (pl.Buffered).
try:
    pl.BlockSpec((8, 128), lambda i: (0, 0), pipeline_mode=pl.Buffered(1))
    _RESIDENT = {"pipeline_mode": pl.Buffered(1)}
except Exception:                                   # pragma: no cover
    _RESIDENT = {}


def _gru_kernel(x_ref, m_ref, h0_ref, wi_ref, wh_ref, bhn_ref,
                out_ref, ig_scr, h_scr, *, tt, hp, unroll):
    """One grid step == one (batch block, TT-timestep block).

    x_ref  : (TT, BB, Dp)   inputs; column D is a constant-1 bias column
    m_ref  : (TT, BB, 1)    0/1 mask
    h0_ref : (BB, Hp)       initial hidden state for this batch block
    wi_ref : (Dp, 3*Hp)     i2h weights (r|z|n), biases folded into row D   [resident]
    wh_ref : (Hp, 3*Hp)     h2h weights (r|z|n), no bias                    [resident]
    bhn_ref: (1, Hp)        n-gate h2h bias (cannot be folded)              [resident]
    out_ref: (TT, BB, Hp)   carried hidden state per timestep (lane-dense)
    ig_scr : (TT, BB, 3*Hp) f32 scratch: per-block input-gate projections
    h_scr  : (BB, Hp)       f32 scratch: h carried across time blocks
    """
    t_blk = pl.program_id(1)

    @pl.when(t_blk == 0)
    def _():
        h_scr[...] = h0_ref[...].astype(jnp.float32)

    wi = wi_ref[...]
    wh = wh_ref[...]
    bhn = bhn_ref[...].astype(jnp.float32)          # (1, Hp), tiny

    # Input-gate projections for the whole time block: independent of h, so
    # they sit OFF the serial critical path (plain MXU throughput work).
    for i in range(tt):
        ig_scr[i] = jnp.dot(x_ref[i], wi, preferred_element_type=jnp.float32)

    def step(i, h):
        ig = ig_scr[i]                               # (BB, 3Hp) f32
        m = m_ref[i]                                 # (BB, 1)
        # Single fused recurrent matmul per step (f32 accumulation on MXU).
        hg = jnp.dot(h.astype(wh.dtype), wh,
                     preferred_element_type=jnp.float32)
        # Gate slices fall on 128-lane boundaries (Hp % 128 == 0).
        r_t = jax.nn.sigmoid(ig[:, :hp] + hg[:, :hp])
        z_t = jax.nn.sigmoid(ig[:, hp:2 * hp] + hg[:, hp:2 * hp])
        n_t = jnp.tanh(ig[:, 2 * hp:] + r_t * (hg[:, 2 * hp:] + bhn))
        h_t = n_t + z_t * (h - n_t)                  # == (1-z)*n + z*h
        h_new = h + m * (h_t - h)                    # == h_t*m + h*(1-m)
        out_ref[i] = h_new.astype(out_ref.dtype)
        return h_new

    h_scr[...] = lax.fori_loop(0, tt, step, h_scr[...], unroll=unroll)


def gru_forward(x, h0, mask, w_i2h, b_i2h, w_h2h, b_h2h, *,
                tt_block=16, weights_dtype=jnp.bfloat16,
                time_major_output=False):
    """Pallas GRU forward matching ibp.GRU.forward(x, h0, mask).

    x     : (B, T, D) f32, h0: (B, H) f32, mask: (B, T) 0/1
    w_i2h : (3H, D), b_i2h: (3H,)   (gate order r | z | n)
    w_h2h : (3H, H), b_h2h: (3H,)
    Returns (B, T, H) float32 (or (T, B, H) if time_major_output=True).

    Note: with the default weights_dtype=bfloat16 both the weights and the
    streamed x are bf16 on the MXU; accumulation and the h carry stay f32.
    Pass weights_dtype=jnp.float32 for the full-precision path.
    """
    B, T, D = x.shape
    H = h0.shape[-1]
    f32 = jnp.float32
    wdt = jnp.dtype(weights_dtype)
    wbytes = wdt.itemsize

    HP = _round_up(H, 128)                 # lane-dense hidden dim
    DP = _round_up(D + 1, 128)             # +1: constant-1 bias column

    # Batch blocking: >=2 blocks when the padded batch is big enough so both
    # TensorCores of a v7x megacore get work; tiny batches stay one block.
    B8 = _round_up(B, 8)
    if B8 > 256:
        BB = 128
    elif B8 >= 32:
        BB = _round_up((B8 + 1) // 2, 8)
    else:
        BB = B8
    BP = _round_up(B, BB)
    nb = BP // BB

    # ---- VMEM budgeting: pick the largest TT that fits -------------------
    try:
        vmem_cap = int(getattr(pltpu.get_tpu_info(), "vmem_capacity_bytes",
                               64 << 20))
    except Exception:                                  # pragma: no cover
        vmem_cap = 64 << 20                            # v7x-safe fallback
    budget = int(vmem_cap * 0.8)

    def _vmem_bytes(tt):
        resident = (DP * 3 * HP + HP * 3 * HP) * wbytes + 8 * HP * 4  # Wi,Wh,bhn
        h0_bufs = 2 * BB * HP * 4
        scratch = tt * BB * 3 * HP * 4 + BB * HP * 4                  # ig + h
        streamed = 2 * tt * BB * (DP * wbytes + 128 * 4 + HP * 4)     # x,mask,out
        return int((resident + h0_bufs + scratch + streamed) * 1.25) + (2 << 20)

    TT = max(1, min(tt_block, T))
    while TT > 1 and _vmem_bytes(TT) > budget:
        TT = max(1, TT // 2)
    TP = _round_up(T, TT)
    vlim = int(min(max(_vmem_bytes(TT), 32 << 20), int(vmem_cap * 0.9)))

    # Fully unroll only when the (BB, Hp) f32 carry comfortably fits vregs.
    if BB * HP * 4 <= (192 << 10):
        unroll = TT
    elif TT % 4 == 0:
        unroll = 4
    elif TT % 2 == 0:
        unroll = 2
    else:
        unroll = 1

    # ---- parameter re-layout ---------------------------------------------
    wi3 = w_i2h.reshape(3, H, D).astype(f32)           # [r, z, n]
    bi3 = b_i2h.reshape(3, H).astype(f32)
    wh3 = w_h2h.reshape(3, H, H).astype(f32)
    bh3 = b_h2h.reshape(3, H).astype(f32)

    # i2h weights transposed to (Dp, 3Hp); row D carries bi (+ bh for r, z).
    wi_p = jnp.zeros((DP, 3, HP), f32)
    wi_p = wi_p.at[:D, :, :H].set(jnp.transpose(wi3, (2, 0, 1)))
    wi_p = wi_p.at[D, :, :H].set(bi3.at[:2].add(bh3[:2]))
    wi_p = wi_p.reshape(DP, 3 * HP).astype(wdt)

    # h2h weights transposed to (Hp, 3Hp).
    wh_p = jnp.zeros((HP, 3, HP), f32)
    wh_p = wh_p.at[:H, :, :H].set(jnp.transpose(wh3, (2, 0, 1)))
    wh_p = wh_p.reshape(HP, 3 * HP).astype(wdt)

    # n-gate h2h bias is the only bias that must stay on the h side:
    # n = tanh(i_n + r * (h @ Wh_n + bh_n)).
    bhn_p = jnp.zeros((1, HP), f32).at[0, :H].set(bh3[2])

    # ---- padded, time-major activations -----------------------------------
    x_aug = jnp.zeros((TP, BP, DP), wdt)
    x_aug = x_aug.at[:T, :B, :D].set(jnp.transpose(x, (1, 0, 2)).astype(wdt))
    x_aug = x_aug.at[:, :, D].set(jnp.asarray(1.0, wdt))   # bias column

    mask_p = jnp.zeros((TP, BP, 1), f32).at[:T, :B, 0].set(
        jnp.transpose(mask.astype(f32), (1, 0)))
    h0_p = jnp.zeros((BP, HP), f32).at[:B, :H].set(h0.astype(f32))

    kernel = functools.partial(_gru_kernel, tt=TT, hp=HP, unroll=unroll)
    # Grid: (batch blocks = "parallel", time blocks = "arbitrary").  The time
    # axis MUST stay innermost: h_scr carries the recurrence across it.
    grid = (nb, TP // TT)

    out_tm = pl.pallas_call(
        kernel,
        out_shape=jax.ShapeDtypeStruct((TP, BP, HP), f32),
        grid_spec=pltpu.PrefetchScalarGridSpec(
            num_scalar_prefetch=0,
            grid=grid,
            in_specs=[
                pl.BlockSpec((TT, BB, DP), lambda b, t: (t, b, 0)),      # x
                pl.BlockSpec((TT, BB, 1), lambda b, t: (t, b, 0)),       # mask
                pl.BlockSpec((BB, HP), lambda b, t: (b, 0)),             # h0
                pl.BlockSpec((DP, 3 * HP), lambda b, t: (0, 0), **_RESIDENT),  # Wi
                pl.BlockSpec((HP, 3 * HP), lambda b, t: (0, 0), **_RESIDENT),  # Wh
                pl.BlockSpec((1, HP), lambda b, t: (0, 0), **_RESIDENT),       # bh_n
            ],
            out_specs=pl.BlockSpec((TT, BB, HP), lambda b, t: (t, b, 0)),
            scratch_shapes=[
                pltpu.VMEM((TT, BB, 3 * HP), jnp.float32),   # ig for the block
                pltpu.VMEM((BB, HP), jnp.float32),           # h carry
            ],
        ),
        compiler_params=pltpu.CompilerParams(
            dimension_semantics=("parallel", "arbitrary"),
            vmem_limit_bytes=vlim),
    )(x_aug, mask_p, h0_p, wi_p, wh_p, bhn_p)

    out = out_tm[:T, :B, :H]
    if time_major_output:
        return out                       # (T, B, H): skips one HBM transpose
    return jnp.transpose(out, (1, 0, 2))  # (B, T, H)


def gru_reference(x, h0, mask, w_i2h, b_i2h, w_h2h, b_h2h):
    """Pure-JAX reference mirroring ibp.GRU._process/_step exactly."""
    H = h0.shape[-1]

    def step(h, inp):
        x_t, m_t = inp
        i_out = x_t @ w_i2h.T + b_i2h
        h_out = h @ w_h2h.T + b_h2h
        gates = jax.nn.sigmoid(i_out[:, :2 * H] + h_out[:, :2 * H])
        r_t = gates[:, :H]
        z_t = gates[:, H:]
        n_t = jnp.tanh(i_out[:, 2 * H:] + r_t * h_out[:, 2 * H:])
        h_t = (1.0 - z_t) * n_t + z_t * h
        h_new = h_t * m_t[:, None] + h * (1.0 - m_t[:, None])
        return h_new, h_new

    _, hs = lax.scan(step, h0, (jnp.transpose(x, (1, 0, 2)),
                                jnp.transpose(mask, (1, 0))))
    return jnp.transpose(hs, (1, 0, 2))


if __name__ == "__main__":
    # Small, deliberately non-tile-aligned shapes (exercise B/T/D/H padding).
    B, T, D, H = 6, 10, 40, 32

    key = jax.random.PRNGKey(0)
    ks = jax.random.split(key, 6)

    x = jax.random.normal(ks[0], (B, T, D), dtype=jnp.float32)
    h0 = jax.random.normal(ks[1], (B, H), dtype=jnp.float32)
    lengths = jnp.array([10, 9, 7, 10, 4, 1], dtype=jnp.int32)
    mask = (jnp.arange(T)[None, :] < lengths[:, None]).astype(jnp.float32)

    bound_i = 1.0 / jnp.sqrt(D)
    bound_h = 1.0 / jnp.sqrt(H)
    w_i2h = jax.random.uniform(ks[2], (3 * H, D), minval=-bound_i, maxval=bound_i)
    b_i2h = jax.random.uniform(ks[3], (3 * H,), minval=-bound_i, maxval=bound_i)
    w_h2h = jax.random.uniform(ks[4], (3 * H, H), minval=-bound_h, maxval=bound_h)
    b_h2h = jax.random.uniform(ks[5], (3 * H,), minval=-bound_h, maxval=bound_h)

    with jax.default_matmul_precision("float32"):
        ref = gru_reference(x, h0, mask, w_i2h, b_i2h, w_h2h, b_h2h)
    ref = jax.block_until_ready(ref)

    # float32-weight path.
    out_f32 = gru_forward(x, h0, mask, w_i2h, b_i2h, w_h2h, b_h2h,
                          weights_dtype=jnp.float32)
    out_f32 = jax.block_until_ready(out_f32)
    assert out_f32.shape == (B, T, H)
    err32 = float(jnp.max(jnp.abs(out_f32 - ref)))
    assert err32 < 2e-2, f"Pallas GRU (f32) mismatch vs reference: {err32}"

    # Default bf16-weight path (bf16 weights + bf16 x stream, f32 accumulate).
    out_bf16 = gru_forward(x, h0, mask, w_i2h, b_i2h, w_h2h, b_h2h)
    out_bf16 = jax.block_until_ready(out_bf16)
    err_bf16 = float(jnp.max(jnp.abs(out_bf16 - ref)))
    assert err_bf16 < 2e-1, f"Pallas GRU (bf16) mismatch vs reference: {err_bf16}"

    print("KERNEL_OK")
</pallas_src>

<mosaic_0001>
module attributes {stable_mosaic.version = 11 : i64} {
  func.func @_gru_kernel(%arg0: i32, %arg1: i32, %arg2: memref<10x8x128xf32, #tpu.memory_space<vmem>>, %arg3: memref<10x8x1xf32, #tpu.memory_space<vmem>>, %arg4: memref<8x128xf32, #tpu.memory_space<vmem>>, %arg5: memref<128x384xf32, #tpu.memory_space<vmem>>, %arg6: memref<128x384xf32, #tpu.memory_space<vmem>>, %arg7: memref<1x128xf32, #tpu.memory_space<vmem>>, %arg8: memref<10x8x128xf32, #tpu.memory_space<vmem>>, %arg9: memref<10x8x384xf32, #tpu.memory_space<vmem>>, %arg10: memref<8x128xf32, #tpu.memory_space<vmem>>) attributes {dimension_semantics = [#tpu.dimension_semantics<parallel>, #tpu.dimension_semantics<arbitrary>], iteration_bounds = array<i64: 1, 1>, scalar_prefetch = 0 : i64, scratch_operands = 2 : i64, tpu.core_type = #tpu.core_type<tc>, window_params = [{transform_indices = @transform_0, window_bounds = array<i64: 10, 8, 128>}, {transform_indices = @transform_1, window_bounds = array<i64: 10, 8, 1>}, {transform_indices = @transform_2, window_bounds = array<i64: 8, 128>}, {pipeline_mode = #tpu.pipeline_mode<synchronous>, transform_indices = @transform_3, window_bounds = array<i64: 128, 384>}, {pipeline_mode = #tpu.pipeline_mode<synchronous>, transform_indices = @transform_4, window_bounds = array<i64: 128, 384>}, {pipeline_mode = #tpu.pipeline_mode<synchronous>, transform_indices = @transform_5, window_bounds = array<i64: 1, 128>}, {transform_indices = @transform_6, window_bounds = array<i64: 10, 8, 128>}]} {
    %c0_i32 = arith.constant 0 : i32
    %0 = arith.cmpi eq, %arg1, %c0_i32 : i32
    %1 = arith.extui %0 : i1 to i32
    %c0_i32_0 = arith.constant 0 : i32
    %2 = arith.cmpi ne, %1, %c0_i32_0 : i32
    scf.if %2 {
      %c0_161 = arith.constant 0 : index
      %c0_162 = arith.constant 0 : index
      %478 = vector.load %arg4[%c0_161, %c0_162] : memref<8x128xf32, #tpu.memory_space<vmem>>, vector<8x128xf32>
      %c0_163 = arith.constant 0 : index
      %c0_164 = arith.constant 0 : index
      %479 = vector.load %arg10[%c0_163, %c0_164] : memref<8x128xf32, #tpu.memory_space<vmem>>, vector<8x128xf32>
      tpu.vector_store %arg10[%c0_163, %c0_164], %478 {strides = array<i32>} : memref<8x128xf32, #tpu.memory_space<vmem>>, vector<8x128xf32>,
    } else {
    }
    %c0 = arith.constant 0 : index
    %c0_1 = arith.constant 0 : index
    %3 = vector.load %arg5[%c0, %c0_1] : memref<128x384xf32, #tpu.memory_space<vmem>>, vector<128x384xf32>
    %c0_2 = arith.constant 0 : index
    %c0_3 = arith.constant 0 : index
    %4 = vector.load %arg6[%c0_2, %c0_3] : memref<128x384xf32, #tpu.memory_space<vmem>>, vector<128x384xf32>
    %c0_4 = arith.constant 0 : index
    %c0_5 = arith.constant 0 : index
    %5 = vector.load %arg7[%c0_4, %c0_5] : memref<1x128xf32, #tpu.memory_space<vmem>>, vector<1x128xf32>
    %c0_6 = arith.constant 0 : index
    %c0_7 = arith.constant 0 : index
    %c0_8 = arith.constant 0 : index
    %6 = vector.load %arg2[%c0_6, %c0_7, %c0_8] : memref<10x8x128xf32, #tpu.memory_space<vmem>>, vector<1x8x128xf32>
    %7 = vector.shape_cast %6 : vector<1x8x128xf32> to vector<8x128xf32>
    %cst = arith.constant dense<0.000000e+00> : vector<8x384xf32>
    %8 = tpu.matmul %7, %3, %cst {dimension_numbers = #tpu.dot_dimension_numbers<[1], [0], [0], [1], [0, 0, 1, 1], [], []>} : vector<8x128xf32>, vector<128x384xf32>, vector<8x384xf32> -> vector<8x384xf32>
    %c0_9 = arith.constant 0 : index
    %c0_10 = arith.constant 0 : index
    %c0_11 = arith.constant 0 : index
    %9 = vector.load %arg9[%c0_9, %c0_10, %c0_11] : memref<10x8x384xf32, #tpu.memory_space<vmem>>, vector<1x8x384xf32>
    %10 = vector.shape_cast %9 : vector<1x8x384xf32> to vector<8x384xf32>
    %11 = vector.shape_cast %8 : vector<8x384xf32> to vector<1x8x384xf32>
    tpu.vector_store %arg9[%c0_9, %c0_10, %c0_11], %11 {strides = array<i32>} : memref<10x8x384xf32, #tpu.memory_space<vmem>>, vector<1x8x384xf32>,
    %c1 = arith.constant 1 : index
    %c0_12 = arith.constant 0 : index
    %c0_13 = arith.constant 0 : index
    %12 = vector.load %arg2[%c1, %c0_12, %c0_13] : memref<10x8x128xf32, #tpu.memory_space<vmem>>, vector<1x8x128xf32>
    %13 = vector.shape_cast %12 : vector<1x8x128xf32> to vector<8x128xf32>
    %cst_14 = arith.constant dense<0.000000e+00> : vector<8x384xf32>
    %14 = tpu.matmul %13, %3, %cst_14 {dimension_numbers = #tpu.dot_dimension_numbers<[1], [0], [0], [1], [0, 0, 1, 1], [], []>} : vector<8x128xf32>, vector<128x384xf32>, vector<8x384xf32> -> vector<8x384xf32>
    %c1_15 = arith.constant 1 : index
    %c0_16 = arith.constant 0 : index
    %c0_17 = arith.constant 0 : index
    %15 = vector.load %arg9[%c1_15, %c0_16, %c0_17] : memref<10x8x384xf32, #tpu.memory_space<vmem>>, vector<1x8x384xf32>
    %16 = vector.shape_cast %15 : vector<1x8x384xf32> to vector<8x384xf32>
    %17 = vector.shape_cast %14 : vector<8x384xf32> to vector<1x8x384xf32>
    tpu.vector_store %arg9[%c1_15, %c0_16, %c0_17], %17 {strides = array<i32>} : memref<10x8x384xf32, #tpu.memory_space<vmem>>, vector<1x8x384xf32>,
    %c2 = arith.constant 2 : index
    %c0_18 = arith.constant 0 : index
    %c0_19 = arith.constant 0 : index
    %18 = vector.load %arg2[%c2, %c0_18, %c0_19] : memref<10x8x128xf32, #tpu.memory_space<vmem>>, vector<1x8x128xf32>
    %19 = vector.shape_cast %18 : vector<1x8x128xf32> to vector<8x128xf32>
    %cst_20 = arith.constant dense<0.000000e+00> : vector<8x384xf32>
    %20 = tpu.matmul %19, %3, %cst_20 {dimension_numbers = #tpu.dot_dimension_numbers<[1], [0], [0], [1], [0, 0, 1, 1], [], []>} : vector<8x128xf32>, vector<128x384xf32>, vector<8x384xf32> -> vector<8x384xf32>
    %c2_21 = arith.constant 2 : index
    %c0_22 = arith.constant 0 : index
    %c0_23 = arith.constant 0 : index
    %21 = vector.load %arg9[%c2_21, %c0_22, %c0_23] : memref<10x8x384xf32, #tpu.memory_space<vmem>>, vector<1x8x384xf32>
    %22 = vector.shape_cast %21 : vector<1x8x384xf32> to vector<8x384xf32>
    %23 = vector.shape_cast %20 : vector<8x384xf32> to vector<1x8x384xf32>
    tpu.vector_store %arg9[%c2_21, %c0_22, %c0_23], %23 {strides = array<i32>} : memref<10x8x384xf32, #tpu.memory_space<vmem>>, vector<1x8x384xf32>,
    %c3 = arith.constant 3 : index
    %c0_24 = arith.constant 0 : index
    %c0_25 = arith.constant 0 : index
    %24 = vector.load %arg2[%c3, %c0_24, %c0_25] : memref<10x8x128xf32, #tpu.memory_space<vmem>>, vector<1x8x128xf32>
    %25 = vector.shape_cast %24 : vector<1x8x128xf32> to vector<8x128xf32>
    %cst_26 = arith.constant dense<0.000000e+00> : vector<8x384xf32>
    %26 = tpu.matmul %25, %3, %cst_26 {dimension_numbers = #tpu.dot_dimension_numbers<[1], [0], [0], [1], [0, 0, 1, 1], [], []>} : vector<8x128xf32>, vector<128x384xf32>, vector<8x384xf32> -> vector<8x384xf32>
    %c3_27 = arith.constant 3 : index
    %c0_28 = arith.constant 0 : index
    %c0_29 = arith.constant 0 : index
    %27 = vector.load %arg9[%c3_27, %c0_28, %c0_29] : memref<10x8x384xf32, #tpu.memory_space<vmem>>, vector<1x8x384xf32>
    %28 = vector.shape_cast %27 : vector<1x8x384xf32> to vector<8x384xf32>
    %29 = vector.shape_cast %26 : vector<8x384xf32> to vector<1x8x384xf32>
    tpu.vector_store %arg9[%c3_27, %c0_28, %c0_29], %29 {strides = array<i32>} : memref<10x8x384xf32, #tpu.memory_space<vmem>>, vector<1x8x384xf32>,
    %c4 = arith.constant 4 : index
    %c0_30 = arith.constant 0 : index
    %c0_31 = arith.constant 0 : index
    %30 = vector.load %arg2[%c4, %c0_30, %c0_31] : memref<10x8x128xf32, #tpu.memory_space<vmem>>, vector<1x8x128xf32>
    %31 = vector.shape_cast %30 : vector<1x8x128xf32> to vector<8x128xf32>
    %cst_32 = arith.constant dense<0.000000e+00> : vector<8x384xf32>
    %32 = tpu.matmul %31, %3, %cst_32 {dimension_numbers = #tpu.dot_dimension_numbers<[1], [0], [0], [1], [0, 0, 1, 1], [], []>} : vector<8x128xf32>, vector<128x384xf32>, vector<8x384xf32> -> vector<8x384xf32>
    %c4_33 = arith.constant 4 : index
    %c0_34 = arith.constant 0 : index
    %c0_35 = arith.constant 0 : index
    %33 = vector.load %arg9[%c4_33, %c0_34, %c0_35] : memref<10x8x384xf32, #tpu.memory_space<vmem>>, vector<1x8x384xf32>
    %34 = vector.shape_cast %33 : vector<1x8x384xf32> to vector<8x384xf32>
    %35 = vector.shape_cast %32 : vector<8x384xf32> to vector<1x8x384xf32>
    tpu.vector_store %arg9[%c4_33, %c0_34, %c0_35], %35 {strides = array<i32>} : memref<10x8x384xf32, #tpu.memory_space<vmem>>, vector<1x8x384xf32>,
    %c5 = arith.constant 5 : index
    %c0_36 = arith.constant 0 : index
    %c0_37 = arith.constant 0 : index
    %36 = vector.load %arg2[%c5, %c0_36, %c0_37] : memref<10x8x128xf32, #tpu.memory_space<vmem>>, vector<1x8x128xf32>
    %37 = vector.shape_cast %36 : vector<1x8x128xf32> to vector<8x128xf32>
    %cst_38 = arith.constant dense<0.000000e+00> : vector<8x384xf32>
    %38 = tpu.matmul %37, %3, %cst_38 {dimension_numbers = #tpu.dot_dimension_numbers<[1], [0], [0], [1], [0, 0, 1, 1], [], []>} : vector<8x128xf32>, vector<128x384xf32>, vector<8x384xf32> -> vector<8x384xf32>
    %c5_39 = arith.constant 5 : index
    %c0_40 = arith.constant 0 : index
    %c0_41 = arith.constant 0 : index
    %39 = vector.load %arg9[%c5_39, %c0_40, %c0_41] : memref<10x8x384xf32, #tpu.memory_space<vmem>>, vector<1x8x384xf32>
    %40 = vector.shape_cast %39 : vector<1x8x384xf32> to vector<8x384xf32>
    %41 = vector.shape_cast %38 : vector<8x384xf32> to vector<1x8x384xf32>
    tpu.vector_store %arg9[%c5_39, %c0_40, %c0_41], %41 {strides = array<i32>} : memref<10x8x384xf32, #tpu.memory_space<vmem>>, vector<1x8x384xf32>,
    %c6 = arith.constant 6 : index
    %c0_42 = arith.constant 0 : index
    %c0_43 = arith.constant 0 : index
    %42 = vector.load %arg2[%c6, %c0_42, %c0_43] : memref<10x8x128xf32, #tpu.memory_space<vmem>>, vector<1x8x128xf32>
    %43 = vector.shape_cast %42 : vector<1x8x128xf32> to vector<8x128xf32>
    %cst_44 = arith.constant dense<0.000000e+00> : vector<8x384xf32>
    %44 = tpu.matmul %43, %3, %cst_44 {dimension_numbers = #tpu.dot_dimension_numbers<[1], [0], [0], [1], [0, 0, 1, 1], [], []>} : vector<8x128xf32>, vector<128x384xf32>, vector<8x384xf32> -> vector<8x384xf32>
    %c6_45 = arith.constant 6 : index
    %c0_46 = arith.constant 0 : index
    %c0_47 = arith.constant 0 : index
    %45 = vector.load %arg9[%c6_45, %c0_46, %c0_47] : memref<10x8x384xf32, #tpu.memory_space<vmem>>, vector<1x8x384xf32>
    %46 = vector.shape_cast %45 : vector<1x8x384xf32> to vector<8x384xf32>
    %47 = vector.shape_cast %44 : vector<8x384xf32> to vector<1x8x384xf32>
    tpu.vector_store %arg9[%c6_45, %c0_46, %c0_47], %47 {strides = array<i32>} : memref<10x8x384xf32, #tpu.memory_space<vmem>>, vector<1x8x384xf32>,
    %c7 = arith.constant 7 : index
    %c0_48 = arith.constant 0 : index
    %c0_49 = arith.constant 0 : index
    %48 = vector.load %arg2[%c7, %c0_48, %c0_49] : memref<10x8x128xf32, #tpu.memory_space<vmem>>, vector<1x8x128xf32>
    %49 = vector.shape_cast %48 : vector<1x8x128xf32> to vector<8x128xf32>
    %cst_50 = arith.constant dense<0.000000e+00> : vector<8x384xf32>
    %50 = tpu.matmul %49, %3, %cst_50 {dimension_numbers = #tpu.dot_dimension_numbers<[1], [0], [0], [1], [0, 0, 1, 1], [], []>} : vector<8x128xf32>, vector<128x384xf32>, vector<8x384xf32> -> vector<8x384xf32>
    %c7_51 = arith.constant 7 : index
    %c0_52 = arith.constant 0 : index
    %c0_53 = arith.constant 0 : index
    %51 = vector.load %arg9[%c7_51, %c0_52, %c0_53] : memref<10x8x384xf32, #tpu.memory_space<vmem>>, vector<1x8x384xf32>
    %52 = vector.shape_cast %51 : vector<1x8x384xf32> to vector<8x384xf32>
    %53 = vector.shape_cast %50 : vector<8x384xf32> to vector<1x8x384xf32>
    tpu.vector_store %arg9[%c7_51, %c0_52, %c0_53], %53 {strides = array<i32>} : memref<10x8x384xf32, #tpu.memory_space<vmem>>, vector<1x8x384xf32>,
    %c8 = arith.constant 8 : index
    %c0_54 = arith.constant 0 : index
    %c0_55 = arith.constant 0 : index
    %54 = vector.load %arg2[%c8, %c0_54, %c0_55] : memref<10x8x128xf32, #tpu.memory_space<vmem>>, vector<1x8x128xf32>
    %55 = vector.shape_cast %54 : vector<1x8x128xf32> to vector<8x128xf32>
    %cst_56 = arith.constant dense<0.000000e+00> : vector<8x384xf32>
    %56 = tpu.matmul %55, %3, %cst_56 {dimension_numbers = #tpu.dot_dimension_numbers<[1], [0], [0], [1], [0, 0, 1, 1], [], []>} : vector<8x128xf32>, vector<128x384xf32>, vector<8x384xf32> -> vector<8x384xf32>
    %c8_57 = arith.constant 8 : index
    %c0_58 = arith.constant 0 : index
    %c0_59 = arith.constant 0 : index
    %57 = vector.load %arg9[%c8_57, %c0_58, %c0_59] : memref<10x8x384xf32, #tpu.memory_space<vmem>>, vector<1x8x384xf32>
    %58 = vector.shape_cast %57 : vector<1x8x384xf32> to vector<8x384xf32>
    %59 = vector.shape_cast %56 : vector<8x384xf32> to vector<1x8x384xf32>
    tpu.vector_store %arg9[%c8_57, %c0_58, %c0_59], %59 {strides = array<i32>} : memref<10x8x384xf32, #tpu.memory_space<vmem>>, vector<1x8x384xf32>,
    %c9 = arith.constant 9 : index
    %c0_60 = arith.constant 0 : index
    %c0_61 = arith.constant 0 : index
    %60 = vector.load %arg2[%c9, %c0_60, %c0_61] : memref<10x8x128xf32, #tpu.memory_space<vmem>>, vector<1x8x128xf32>
    %61 = vector.shape_cast %60 : vector<1x8x128xf32> to vector<8x128xf32>
    %cst_62 = arith.constant dense<0.000000e+00> : vector<8x384xf32>
    %62 = tpu.matmul %61, %3, %cst_62 {dimension_numbers = #tpu.dot_dimension_numbers<[1], [0], [0], [1], [0, 0, 1, 1], [], []>} : vector<8x128xf32>, vector<128x384xf32>, vector<8x384xf32> -> vector<8x384xf32>
    %c9_63 = arith.constant 9 : index
    %c0_64 = arith.constant 0 : index
    %c0_65 = arith.constant 0 : index
    %63 = vector.load %arg9[%c9_63, %c0_64, %c0_65] : memref<10x8x384xf32, #tpu.memory_space<vmem>>, vector<1x8x384xf32>
    %64 = vector.shape_cast %63 : vector<1x8x384xf32> to vector<8x384xf32>
    %65 = vector.shape_cast %62 : vector<8x384xf32> to vector<1x8x384xf32>
    tpu.vector_store %arg9[%c9_63, %c0_64, %c0_65], %65 {strides = array<i32>} : memref<10x8x384xf32, #tpu.memory_space<vmem>>, vector<1x8x384xf32>,
    %c0_66 = arith.constant 0 : index
    %c0_67 = arith.constant 0 : index
    %66 = vector.load %arg10[%c0_66, %c0_67] : memref<8x128xf32, #tpu.memory_space<vmem>>, vector<8x128xf32>
    %c0_i32_68 = arith.constant 0 : i32
    %67 = arith.index_cast %c0_i32_68 : i32 to index
    %c0_69 = arith.constant 0 : index
    %c0_70 = arith.constant 0 : index
    %68 = vector.load %arg9[%67, %c0_69, %c0_70] : memref<10x8x384xf32, #tpu.memory_space<vmem>>, vector<1x8x384xf32>
    %69 = vector.shape_cast %68 : vector<1x8x384xf32> to vector<8x384xf32>
    %70 = arith.index_cast %c0_i32_68 : i32 to index
    %c0_71 = arith.constant 0 : index
    %c0_72 = arith.constant 0 : index
    %71 = vector.load %arg3[%70, %c0_71, %c0_72] : memref<10x8x1xf32, #tpu.memory_space<vmem>>, vector<1x8x1xf32>
    %72 = vector.shape_cast %71 : vector<1x8x1xf32> to vector<8x1xf32>
    %cst_73 = arith.constant dense<0.000000e+00> : vector<8x384xf32>
    %73 = tpu.matmul %66, %4, %cst_73 {dimension_numbers = #tpu.dot_dimension_numbers<[1], [0], [0], [1], [0, 0, 1, 1], [], []>} : vector<8x128xf32>, vector<128x384xf32>, vector<8x384xf32> -> vector<8x384xf32>
    %74 = vector.extract_strided_slice %69 {offsets = [0, 0], sizes = [8, 128], strides = [1, 1]} : vector<8x384xf32> to vector<8x128xf32>
    %75 = vector.extract_strided_slice %73 {offsets = [0, 0], sizes = [8, 128], strides = [1, 1]} : vector<8x384xf32> to vector<8x128xf32>
    %76 = arith.addf %74, %75 : vector<8x128xf32>
    %77 = arith.negf %76 : vector<8x128xf32>
    %78 = math.exp %77 : vector<8x128xf32>
    %cst_74 = arith.constant 1.000000e+00 : f32
    %79 = vector.broadcast %cst_74 : f32 to vector<8x128xf32>
    %80 = arith.addf %79, %78 : vector<8x128xf32>
    %81 = arith.divf %79, %80 : vector<8x128xf32>
    %82 = vector.extract_strided_slice %69 {offsets = [0, 128], sizes = [8, 128], strides = [1, 1]} : vector<8x384xf32> to vector<8x128xf32>
    %83 = vector.extract_strided_slice %73 {offsets = [0, 128], sizes = [8, 128], strides = [1, 1]} : vector<8x384xf32> to vector<8x128xf32>
    %84 = arith.addf %82, %83 : vector<8x128xf32>
    %85 = arith.negf %84 : vector<8x128xf32>
    %86 = math.exp %85 : vector<8x128xf32>
    %cst_75 = arith.constant 1.000000e+00 : f32
    %87 = vector.broadcast %cst_75 : f32 to vector<8x128xf32>
    %88 = arith.addf %87, %86 : vector<8x128xf32>
    %89 = arith.divf %87, %88 : vector<8x128xf32>
    %90 = vector.extract_strided_slice %69 {offsets = [0, 256], sizes = [8, 128], strides = [1, 1]} : vector<8x384xf32> to vector<8x128xf32>
    %91 = vector.extract_strided_slice %73 {offsets = [0, 256], sizes = [8, 128], strides = [1, 1]} : vector<8x384xf32> to vector<8x128xf32>
    %92 = vector.broadcast %5 : vector<1x128xf32> to vector<8x128xf32>
    %93 = arith.addf %91, %92 : vector<8x128xf32>
    %94 = arith.mulf %81, %93 : vector<8x128xf32>
    %95 = arith.addf %90, %94 : vector<8x128xf32>
    %96 = math.tanh %95 : vector<8x128xf32>
    %97 = arith.subf %66, %96 : vector<8x128xf32>
    %98 = arith.mulf %89, %97 : vector<8x128xf32>
    %99 = arith.addf %96, %98 : vector<8x128xf32>
    %100 = arith.subf %99, %66 : vector<8x128xf32>
    %101 = vector.broadcast %72 : vector<8x1xf32> to vector<8x128xf32>
    %102 = arith.mulf %101, %100 : vector<8x128xf32>
    %103 = arith.addf %66, %102 : vector<8x128xf32>
    %104 = arith.index_cast %c0_i32_68 : i32 to index
    %c0_76 = arith.constant 0 : index
    %c0_77 = arith.constant 0 : index
    %105 = vector.load %arg8[%104, %c0_76, %c0_77] : memref<10x8x128xf32, #tpu.memory_space<vmem>>, vector<1x8x128xf32>
    %106 = vector.shape_cast %105 : vector<1x8x128xf32> to vector<8x128xf32>
    %107 = vector.shape_cast %103 : vector<8x128xf32> to vector<1x8x128xf32>
    tpu.vector_store %arg8[%104, %c0_76, %c0_77], %107 {strides = array<i32>} : memref<10x8x128xf32, #tpu.memory_space<vmem>>, vector<1x8x128xf32>,
    %c1_i32 = arith.constant 1 : i32
    %108 = arith.index_cast %c1_i32 : i32 to index
    %c0_78 = arith.constant 0 : index
    %c0_79 = arith.constant 0 : index
    %109 = vector.load %arg9[%108, %c0_78, %c0_79] : memref<10x8x384xf32, #tpu.memory_space<vmem>>, vector<1x8x384xf32>
    %110 = vector.shape_cast %109 : vector<1x8x384xf32> to vector<8x384xf32>
    %111 = arith.index_cast %c1_i32 : i32 to index
    %c0_80 = arith.constant 0 : index
    %c0_81 = arith.constant 0 : index
    %112 = vector.load %arg3[%111, %c0_80, %c0_81] : memref<10x8x1xf32, #tpu.memory_space<vmem>>, vector<1x8x1xf32>
    %113 = vector.shape_cast %112 : vector<1x8x1xf32> to vector<8x1xf32>
    %cst_82 = arith.constant dense<0.000000e+00> : vector<8x384xf32>
    %114 = tpu.matmul %103, %4, %cst_82 {dimension_numbers = #tpu.dot_dimension_numbers<[1], [0], [0], [1], [0, 0, 1, 1], [], []>} : vector<8x128xf32>, vector<128x384xf32>, vector<8x384xf32> -> vector<8x384xf32>
    %115 = vector.extract_strided_slice %110 {offsets = [0, 0], sizes = [8, 128], strides = [1, 1]} : vector<8x384xf32> to vector<8x128xf32>
    %116 = vector.extract_strided_slice %114 {offsets = [0, 0], sizes = [8, 128], strides = [1, 1]} : vector<8x384xf32> to vector<8x128xf32>
    %117 = arith.addf %115, %116 : vector<8x128xf32>
    %118 = arith.negf %117 : vector<8x128xf32>
    %119 = math.exp %118 : vector<8x128xf32>
    %cst_83 = arith.constant 1.000000e+00 : f32
    %120 = vector.broadcast %cst_83 : f32 to vector<8x128xf32>
    %121 = arith.addf %120, %119 : vector<8x128xf32>
    %122 = arith.divf %120, %121 : vector<8x128xf32>
    %123 = vector.extract_strided_slice %110 {offsets = [0, 128], sizes = [8, 128], strides = [1, 1]} : vector<8x384xf32> to vector<8x128xf32>
    %124 = vector.extract_strided_slice %114 {offsets = [0, 128], sizes = [8, 128], strides = [1, 1]} : vector<8x384xf32> to vector<8x128xf32>
    %125 = arith.addf %123, %124 : vector<8x128xf32>
    %126 = arith.negf %125 : vector<8x128xf32>
    %127 = math.exp %126 : vector<8x128xf32>
    %cst_84 = arith.constant 1.000000e+00 : f32
    %128 = vector.broadcast %cst_84 : f32 to vector<8x128xf32>
    %129 = arith.addf %128, %127 : vector<8x128xf32>
    %130 = arith.divf %128, %129 : vector<8x128xf32>
    %131 = vector.extract_strided_slice %110 {offsets = [0, 256], sizes = [8, 128], strides = [1, 1]} : vector<8x384xf32> to vector<8x128xf32>
    %132 = vector.extract_strided_slice %114 {offsets = [0, 256], sizes = [8, 128], strides = [1, 1]} : vector<8x384xf32> to vector<8x128xf32>
    %133 = vector.broadcast %5 : vector<1x128xf32> to vector<8x128xf32>
    %134 = arith.addf %132, %133 : vector<8x128xf32>
    %135 = arith.mulf %122, %134 : vector<8x128xf32>
    %136 = arith.addf %131, %135 : vector<8x128xf32>
    %137 = math.tanh %136 : vector<8x128xf32>
    %138 = arith.subf %103, %137 : vector<8x128xf32>
    %139 = arith.mulf %130, %138 : vector<8x128xf32>
    %140 = arith.addf %137, %139 : vector<8x128xf32>
    %141 = arith.subf %140, %103 : vector<8x128xf32>
    %142 = vector.broadcast %113 : vector<8x1xf32> to vector<8x128xf32>
    %143 = arith.mulf %142, %141 : vector<8x128xf32>
    %144 = arith.addf %103, %143 : vector<8x128xf32>
    %145 = arith.index_cast %c1_i32 : i32 to index
    %c0_85 = arith.constant 0 : index
    %c0_86 = arith.constant 0 : index
    %146 = vector.load %arg8[%145, %c0_85, %c0_86] : memref<10x8x128xf32, #tpu.memory_space<vmem>>, vector<1x8x128xf32>
    %147 = vector.shape_cast %146 : vector<1x8x128xf32> to vector<8x128xf32>
    %148 = vector.shape_cast %144 : vector<8x128xf32> to vector<1x8x128xf32>
    tpu.vector_store %arg8[%145, %c0_85, %c0_86], %148 {strides = array<i32>} : memref<10x8x128xf32, #tpu.memory_space<vmem>>, vector<1x8x128xf32>,
    %c2_i32 = arith.constant 2 : i32
    %149 = arith.index_cast %c2_i32 : i32 to index
    %c0_87 = arith.constant 0 : index
    %c0_88 = arith.constant 0 : index
    %150 = vector.load %arg9[%149, %c0_87, %c0_88] : memref<10x8x384xf32, #tpu.memory_space<vmem>>, vector<1x8x384xf32>
    %151 = vector.shape_cast %150 : vector<1x8x384xf32> to vector<8x384xf32>
    %152 = arith.index_cast %c2_i32 : i32 to index
    %c0_89 = arith.constant 0 : index
    %c0_90 = arith.constant 0 : index
    %153 = vector.load %arg3[%152, %c0_89, %c0_90] : memref<10x8x1xf32, #tpu.memory_space<vmem>>, vector<1x8x1xf32>
    %154 = vector.shape_cast %153 : vector<1x8x1xf32> to vector<8x1xf32>
    %cst_91 = arith.constant dense<0.000000e+00> : vector<8x384xf32>
    %155 = tpu.matmul %144, %4, %cst_91 {dimension_numbers = #tpu.dot_dimension_numbers<[1], [0], [0], [1], [0, 0, 1, 1], [], []>} : vector<8x128xf32>, vector<128x384xf32>, vector<8x384xf32> -> vector<8x384xf32>
    %156 = vector.extract_strided_slice %151 {offsets = [0, 0], sizes = [8, 128], strides = [1, 1]} : vector<8x384xf32> to vector<8x128xf32>
    %157 = vector.extract_strided_slice %155 {offsets = [0, 0], sizes = [8, 128], strides = [1, 1]} : vector<8x384xf32> to vector<8x128xf32>
    %158 = arith.addf %156, %157 : vector<8x128xf32>
    %159 = arith.negf %158 : vector<8x128xf32>
    %160 = math.exp %159 : vector<8x128xf32>
    %cst_92 = arith.constant 1.000000e+00 : f32
    %161 = vector.broadcast %cst_92 : f32 to vector<8x128xf32>
    %162 = arith.addf %161, %160 : vector<8x128xf32>
    %163 = arith.divf %161, %162 : vector<8x128xf32>
    %164 = vector.extract_strided_slice %151 {offsets = [0, 128], sizes = [8, 128], strides = [1, 1]} : vector<8x384xf32> to vector<8x128xf32>
    %165 = vector.extract_strided_slice %155 {offsets = [0, 128], sizes = [8, 128], strides = [1, 1]} : vector<8x384xf32> to vector<8x128xf32>
    %166 = arith.addf %164, %165 : vector<8x128xf32>
    %167 = arith.negf %166 : vector<8x128xf32>
    %168 = math.exp %167 : vector<8x128xf32>
    %cst_93 = arith.constant 1.000000e+00 : f32
    %169 = vector.broadcast %cst_93 : f32 to vector<8x128xf32>
    %170 = arith.addf %169, %168 : vector<8x128xf32>
    %171 = arith.divf %169, %170 : vector<8x128xf32>
    %172 = vector.extract_strided_slice %151 {offsets = [0, 256], sizes = [8, 128], strides = [1, 1]} : vector<8x384xf32> to vector<8x128xf32>
    %173 = vector.extract_strided_slice %155 {offsets = [0, 256], sizes = [8, 128], strides = [1, 1]} : vector<8x384xf32> to vector<8x128xf32>
    %174 = vector.broadcast %5 : vector<1x128xf32> to vector<8x128xf32>
    %175 = arith.addf %173, %174 : vector<8x128xf32>
    %176 = arith.mulf %163, %175 : vector<8x128xf32>
    %177 = arith.addf %172, %176 : vector<8x128xf32>
    %178 = math.tanh %177 : vector<8x128xf32>
    %179 = arith.subf %144, %178 : vector<8x128xf32>
    %180 = arith.mulf %171, %179 : vector<8x128xf32>
    %181 = arith.addf %178, %180 : vector<8x128xf32>
    %182 = arith.subf %181, %144 : vector<8x128xf32>
    %183 = vector.broadcast %154 : vector<8x1xf32> to vector<8x128xf32>
    %184 = arith.mulf %183, %182 : vector<8x128xf32>
    %185 = arith.addf %144, %184 : vector<8x128xf32>
    %186 = arith.index_cast %c2_i32 : i32 to index
    %c0_94 = arith.constant 0 : index
    %c0_95 = arith.constant 0 : index
    %187 = vector.load %arg8[%186, %c0_94, %c0_95] : memref<10x8x128xf32, #tpu.memory_space<vmem>>, vector<1x8x128xf32>
    %188 = vector.shape_cast %187 : vector<1x8x128xf32> to vector<8x128xf32>
    %189 = vector.shape_cast %185 : vector<8x128xf32> to vector<1x8x128xf32>
    tpu.vector_store %arg8[%186, %c0_94, %c0_95], %189 {strides = array<i32>} : memref<10x8x128xf32, #tpu.memory_space<vmem>>, vector<1x8x128xf32>,
    %c3_i32 = arith.constant 3 : i32
    %190 = arith.index_cast %c3_i32 : i32 to index
    %c0_96 = arith.constant 0 : index
    %c0_97 = arith.constant 0 : index
    %191 = vector.load %arg9[%190, %c0_96, %c0_97] : memref<10x8x384xf32, #tpu.memory_space<vmem>>, vector<1x8x384xf32>
    %192 = vector.shape_cast %191 : vector<1x8x384xf32> to vector<8x384xf32>
    %193 = arith.index_cast %c3_i32 : i32 to index
    %c0_98 = arith.constant 0 : index
    %c0_99 = arith.constant 0 : index
    %194 = vector.load %arg3[%193, %c0_98, %c0_99] : memref<10x8x1xf32, #tpu.memory_space<vmem>>, vector<1x8x1xf32>
    %195 = vector.shape_cast %194 : vector<1x8x1xf32> to vector<8x1xf32>
    %cst_100 = arith.constant dense<0.000000e+00> : vector<8x384xf32>
    %196 = tpu.matmul %185, %4, %cst_100 {dimension_numbers = #tpu.dot_dimension_numbers<[1], [0], [0], [1], [0, 0, 1, 1], [], []>} : vector<8x128xf32>, vector<128x384xf32>, vector<8x384xf32> -> vector<8x384xf32>
    %197 = vector.extract_strided_slice %192 {offsets = [0, 0], sizes = [8, 128], strides = [1, 1]} : vector<8x384xf32> to vector<8x128xf32>
    %198 = vector.extract_strided_slice %196 {offsets = [0, 0], sizes = [8, 128], strides = [1, 1]} : vector<8x384xf32> to vector<8x128xf32>
    %199 = arith.addf %197, %198 : vector<8x128xf32>
    %200 = arith.negf %199 : vector<8x128xf32>
    %201 = math.exp %200 : vector<8x128xf32>
    %cst_101 = arith.constant 1.000000e+00 : f32
    %202 = vector.broadcast %cst_101 : f32 to vector<8x128xf32>
    %203 = arith.addf %202, %201 : vector<8x128xf32>
    %204 = arith.divf %202, %203 : vector<8x128xf32>
    %205 = vector.extract_strided_slice %192 {offsets = [0, 128], sizes = [8, 128], strides = [1, 1]} : vector<8x384xf32> to vector<8x128xf32>
    %206 = vector.extract_strided_slice %196 {offsets = [0, 128], sizes = [8, 128], strides = [1, 1]} : vector<8x384xf32> to vector<8x128xf32>
    %207 = arith.addf %205, %206 : vector<8x128xf32>
    %208 = arith.negf %207 : vector<8x128xf32>
    %209 = math.exp %208 : vector<8x128xf32>
    %cst_102 = arith.constant 1.000000e+00 : f32
    %210 = vector.broadcast %cst_102 : f32 to vector<8x128xf32>
    %211 = arith.addf %210, %209 : vector<8x128xf32>
    %212 = arith.divf %210, %211 : vector<8x128xf32>
    %213 = vector.extract_strided_slice %192 {offsets = [0, 256], sizes = [8, 128], strides = [1, 1]} : vector<8x384xf32> to vector<8x128xf32>
    %214 = vector.extract_strided_slice %196 {offsets = [0, 256], sizes = [8, 128], strides = [1, 1]} : vector<8x384xf32> to vector<8x128xf32>
    %215 = vector.broadcast %5 : vector<1x128xf32> to vector<8x128xf32>
    %216 = arith.addf %214, %215 : vector<8x128xf32>
    %217 = arith.mulf %204, %216 : vector<8x128xf32>
    %218 = arith.addf %213, %217 : vector<8x128xf32>
    %219 = math.tanh %218 : vector<8x128xf32>
    %220 = arith.subf %185, %219 : vector<8x128xf32>
    %221 = arith.mulf %212, %220 : vector<8x128xf32>
    %222 = arith.addf %219, %221 : vector<8x128xf32>
    %223 = arith.subf %222, %185 : vector<8x128xf32>
    %224 = vector.broadcast %195 : vector<8x1xf32> to vector<8x128xf32>
    %225 = arith.mulf %224, %223 : vector<8x128xf32>
    %226 = arith.addf %185, %225 : vector<8x128xf32>
    %227 = arith.index_cast %c3_i32 : i32 to index
    %c0_103 = arith.constant 0 : index
    %c0_104 = arith.constant 0 : index
    %228 = vector.load %arg8[%227, %c0_103, %c0_104] : memref<10x8x128xf32, #tpu.memory_space<vmem>>, vector<1x8x128xf32>
    %229 = vector.shape_cast %228 : vector<1x8x128xf32> to vector<8x128xf32>
    %230 = vector.shape_cast %226 : vector<8x128xf32> to vector<1x8x128xf32>
    tpu.vector_store %arg8[%227, %c0_103, %c0_104], %230 {strides = array<i32>} : memref<10x8x128xf32, #tpu.memory_space<vmem>>, vector<1x8x128xf32>,
    %c4_i32 = arith.constant 4 : i32
    %231 = arith.index_cast %c4_i32 : i32 to index
    %c0_105 = arith.constant 0 : index
    %c0_106 = arith.constant 0 : index
    %232 = vector.load %arg9[%231, %c0_105, %c0_106] : memref<10x8x384xf32, #tpu.memory_space<vmem>>, vector<1x8x384xf32>
    %233 = vector.shape_cast %232 : vector<1x8x384xf32> to vector<8x384xf32>
    %234 = arith.index_cast %c4_i32 : i32 to index
    %c0_107 = arith.constant 0 : index
    %c0_108 = arith.constant 0 : index
    %235 = vector.load %arg3[%234, %c0_107, %c0_108] : memref<10x8x1xf32, #tpu.memory_space<vmem>>, vector<1x8x1xf32>
    %236 = vector.shape_cast %235 : vector<1x8x1xf32> to vector<8x1xf32>
    %cst_109 = arith.constant dense<0.000000e+00> : vector<8x384xf32>
    %237 = tpu.matmul %226, %4, %cst_109 {dimension_numbers = #tpu.dot_dimension_numbers<[1], [0], [0], [1], [0, 0, 1, 1], [], []>} : vector<8x128xf32>, vector<128x384xf32>, vector<8x384xf32> -> vector<8x384xf32>
    %238 = vector.extract_strided_slice %233 {offsets = [0, 0], sizes = [8, 128], strides = [1, 1]} : vector<8x384xf32> to vector<8x128xf32>
    %239 = vector.extract_strided_slice %237 {offsets = [0, 0], sizes = [8, 128], strides = [1, 1]} : vector<8x384xf32> to vector<8x128xf32>
    %240 = arith.addf %238, %239 : vector<8x128xf32>
    %241 = arith.negf %240 : vector<8x128xf32>
    %242 = math.exp %241 : vector<8x128xf32>
    %cst_110 = arith.constant 1.000000e+00 : f32
    %243 = vector.broadcast %cst_110 : f32 to vector<8x128xf32>
    %244 = arith.addf %243, %242 : vector<8x128xf32>
    %245 = arith.divf %243, %244 : vector<8x128xf32>
    %246 = vector.extract_strided_slice %233 {offsets = [0, 128], sizes = [8, 128], strides = [1, 1]} : vector<8x384xf32> to vector<8x128xf32>
    %247 = vector.extract_strided_slice %237 {offsets = [0, 128], sizes = [8, 128], strides = [1, 1]} : vector<8x384xf32> to vector<8x128xf32>
    %248 = arith.addf %246, %247 : vector<8x128xf32>
    %249 = arith.negf %248 : vector<8x128xf32>
    %250 = math.exp %249 : vector<8x128xf32>
    %cst_111 = arith.constant 1.000000e+00 : f32
    %251 = vector.broadcast %cst_111 : f32 to vector<8x128xf32>
    %252 = arith.addf %251, %250 : vector<8x128xf32>
    %253 = arith.divf %251, %252 : vector<8x128xf32>
    %254 = vector.extract_strided_slice %233 {offsets = [0, 256], sizes = [8, 128], strides = [1, 1]} : vector<8x384xf32> to vector<8x128xf32>
    %255 = vector.extract_strided_slice %237 {offsets = [0, 256], sizes = [8, 128], strides = [1, 1]} : vector<8x384xf32> to vector<8x128xf32>
    %256 = vector.broadcast %5 : vector<1x128xf32> to vector<8x128xf32>
    %257 = arith.addf %255, %256 : vector<8x128xf32>
    %258 = arith.mulf %245, %257 : vector<8x128xf32>
    %259 = arith.addf %254, %258 : vector<8x128xf32>
    %260 = math.tanh %259 : vector<8x128xf32>
    %261 = arith.subf %226, %260 : vector<8x128xf32>
    %262 = arith.mulf %253, %261 : vector<8x128xf32>
    %263 = arith.addf %260, %262 : vector<8x128xf32>
    %264 = arith.subf %263, %226 : vector<8x128xf32>
    %265 = vector.broadcast %236 : vector<8x1xf32> to vector<8x128xf32>
    %266 = arith.mulf %265, %264 : vector<8x128xf32>
    %267 = arith.addf %226, %266 : vector<8x128xf32>
    %268 = arith.index_cast %c4_i32 : i32 to index
    %c0_112 = arith.constant 0 : index
    %c0_113 = arith.constant 0 : index
    %269 = vector.load %arg8[%268, %c0_112, %c0_113] : memref<10x8x128xf32, #tpu.memory_space<vmem>>, vector<1x8x128xf32>
    %270 = vector.shape_cast %269 : vector<1x8x128xf32> to vector<8x128xf32>
    %271 = vector.shape_cast %267 : vector<8x128xf32> to vector<1x8x128xf32>
    tpu.vector_store %arg8[%268, %c0_112, %c0_113], %271 {strides = array<i32>} : memref<10x8x128xf32, #tpu.memory_space<vmem>>, vector<1x8x128xf32>,
    %c5_i32 = arith.constant 5 : i32
    %272 = arith.index_cast %c5_i32 : i32 to index
    %c0_114 = arith.constant 0 : index
    %c0_115 = arith.constant 0 : index
    %273 = vector.load %arg9[%272, %c0_114, %c0_115] : memref<10x8x384xf32, #tpu.memory_space<vmem>>, vector<1x8x384xf32>
    %274 = vector.shape_cast %273 : vector<1x8x384xf32> to vector<8x384xf32>
    %275 = arith.index_cast %c5_i32 : i32 to index
    %c0_116 = arith.constant 0 : index
    %c0_117 = arith.constant 0 : index
    %276 = vector.load %arg3[%275, %c0_116, %c0_117] : memref<10x8x1xf32, #tpu.memory_space<vmem>>, vector<1x8x1xf32>
    %277 = vector.shape_cast %276 : vector<1x8x1xf32> to vector<8x1xf32>
    %cst_118 = arith.constant dense<0.000000e+00> : vector<8x384xf32>
    %278 = tpu.matmul %267, %4, %cst_118 {dimension_numbers = #tpu.dot_dimension_numbers<[1], [0], [0], [1], [0, 0, 1, 1], [], []>} : vector<8x128xf32>, vector<128x384xf32>, vector<8x384xf32> -> vector<8x384xf32>
    %279 = vector.extract_strided_slice %274 {offsets = [0, 0], sizes = [8, 128], strides = [1, 1]} : vector<8x384xf32> to vector<8x128xf32>
    %280 = vector.extract_strided_slice %278 {offsets = [0, 0], sizes = [8, 128], strides = [1, 1]} : vector<8x384xf32> to vector<8x128xf32>
    %281 = arith.addf %279, %280 : vector<8x128xf32>
    %282 = arith.negf %281 : vector<8x128xf32>
    %283 = math.exp %282 : vector<8x128xf32>
    %cst_119 = arith.constant 1.000000e+00 : f32
    %284 = vector.broadcast %cst_119 : f32 to vector<8x128xf32>
    %285 = arith.addf %284, %283 : vector<8x128xf32>
    %286 = arith.divf %284, %285 : vector<8x128xf32>
    %287 = vector.extract_strided_slice %274 {offsets = [0, 128], sizes = [8, 128], strides = [1, 1]} : vector<8x384xf32> to vector<8x128xf32>
    %288 = vector.extract_strided_slice %278 {offsets = [0, 128], sizes = [8, 128], strides = [1, 1]} : vector<8x384xf32> to vector<8x128xf32>
    %289 = arith.addf %287, %288 : vector<8x128xf32>
    %290 = arith.negf %289 : vector<8x128xf32>
    %291 = math.exp %290 : vector<8x128xf32>
    %cst_120 = arith.constant 1.000000e+00 : f32
    %292 = vector.broadcast %cst_120 : f32 to vector<8x128xf32>
    %293 = arith.addf %292, %291 : vector<8x128xf32>
    %294 = arith.divf %292, %293 : vector<8x128xf32>
    %295 = vector.extract_strided_slice %274 {offsets = [0, 256], sizes = [8, 128], strides = [1, 1]} : vector<8x384xf32> to vector<8x128xf32>
    %296 = vector.extract_strided_slice %278 {offsets = [0, 256], sizes = [8, 128], strides = [1, 1]} : vector<8x384xf32> to vector<8x128xf32>
    %297 = vector.broadcast %5 : vector<1x128xf32> to vector<8x128xf32>
    %298 = arith.addf %296, %297 : vector<8x128xf32>
    %299 = arith.mulf %286, %298 : vector<8x128xf32>
    %300 = arith.addf %295, %299 : vector<8x128xf32>
    %301 = math.tanh %300 : vector<8x128xf32>
    %302 = arith.subf %267, %301 : vector<8x128xf32>
    %303 = arith.mulf %294, %302 : vector<8x128xf32>
    %304 = arith.addf %301, %303 : vector<8x128xf32>
    %305 = arith.subf %304, %267 : vector<8x128xf32>
    %306 = vector.broadcast %277 : vector<8x1xf32> to vector<8x128xf32>
    %307 = arith.mulf %306, %305 : vector<8x128xf32>
    %308 = arith.addf %267, %307 : vector<8x128xf32>
    %309 = arith.index_cast %c5_i32 : i32 to index
    %c0_121 = arith.constant 0 : index
    %c0_122 = arith.constant 0 : index
    %310 = vector.load %arg8[%309, %c0_121, %c0_122] : memref<10x8x128xf32, #tpu.memory_space<vmem>>, vector<1x8x128xf32>
    %311 = vector.shape_cast %310 : vector<1x8x128xf32> to vector<8x128xf32>
    %312 = vector.shape_cast %308 : vector<8x128xf32> to vector<1x8x128xf32>
    tpu.vector_store %arg8[%309, %c0_121, %c0_122], %312 {strides = array<i32>} : memref<10x8x128xf32, #tpu.memory_space<vmem>>, vector<1x8x128xf32>,
    %c6_i32 = arith.constant 6 : i32
    %313 = arith.index_cast %c6_i32 : i32 to index
    %c0_123 = arith.constant 0 : index
    %c0_124 = arith.constant 0 : index
    %314 = vector.load %arg9[%313, %c0_123, %c0_124] : memref<10x8x384xf32, #tpu.memory_space<vmem>>, vector<1x8x384xf32>
    %315 = vector.shape_cast %314 : vector<1x8x384xf32> to vector<8x384xf32>
    %316 = arith.index_cast %c6_i32 : i32 to index
    %c0_125 = arith.constant 0 : index
    %c0_126 = arith.constant 0 : index
    %317 = vector.load %arg3[%316, %c0_125, %c0_126] : memref<10x8x1xf32, #tpu.memory_space<vmem>>, vector<1x8x1xf32>
    %318 = vector.shape_cast %317 : vector<1x8x1xf32> to vector<8x1xf32>
    %cst_127 = arith.constant dense<0.000000e+00> : vector<8x384xf32>
    %319 = tpu.matmul %308, %4, %cst_127 {dimension_numbers = #tpu.dot_dimension_numbers<[1], [0], [0], [1], [0, 0, 1, 1], [], []>} : vector<8x128xf32>, vector<128x384xf32>, vector<8x384xf32> -> vector<8x384xf32>
    %320 = vector.extract_strided_slice %315 {offsets = [0, 0], sizes = [8, 128], strides = [1, 1]} : vector<8x384xf32> to vector<8x128xf32>
    %321 = vector.extract_strided_slice %319 {offsets = [0, 0], sizes = [8, 128], strides = [1, 1]} : vector<8x384xf32> to vector<8x128xf32>
    %322 = arith.addf %320, %321 : vector<8x128xf32>
    %323 = arith.negf %322 : vector<8x128xf32>
    %324 = math.exp %323 : vector<8x128xf32>
    %cst_128 = arith.constant 1.000000e+00 : f32
    %325 = vector.broadcast %cst_128 : f32 to vector<8x128xf32>
    %326 = arith.addf %325, %324 : vector<8x128xf32>
    %327 = arith.divf %325, %326 : vector<8x128xf32>
    %328 = vector.extract_strided_slice %315 {offsets = [0, 128], sizes = [8, 128], strides = [1, 1]} : vector<8x384xf32> to vector<8x128xf32>
    %329 = vector.extract_strided_slice %319 {offsets = [0, 128], sizes = [8, 128], strides = [1, 1]} : vector<8x384xf32> to vector<8x128xf32>
    %330 = arith.addf %328, %329 : vector<8x128xf32>
    %331 = arith.negf %330 : vector<8x128xf32>
    %332 = math.exp %331 : vector<8x128xf32>
    %cst_129 = arith.constant 1.000000e+00 : f32
    %333 = vector.broadcast %cst_129 : f32 to vector<8x128xf32>
    %334 = arith.addf %333, %332 : vector<8x128xf32>
    %335 = arith.divf %333, %334 : vector<8x128xf32>
    %336 = vector.extract_strided_slice %315 {offsets = [0, 256], sizes = [8, 128], strides = [1, 1]} : vector<8x384xf32> to vector<8x128xf32>
    %337 = vector.extract_strided_slice %319 {offsets = [0, 256], sizes = [8, 128], strides = [1, 1]} : vector<8x384xf32> to vector<8x128xf32>
    %338 = vector.broadcast %5 : vector<1x128xf32> to vector<8x128xf32>
    %339 = arith.addf %337, %338 : vector<8x128xf32>
    %340 = arith.mulf %327, %339 : vector<8x128xf32>
    %341 = arith.addf %336, %340 : vector<8x128xf32>
    %342 = math.tanh %341 : vector<8x128xf32>
    %343 = arith.subf %308, %342 : vector<8x128xf32>
    %344 = arith.mulf %335, %343 : vector<8x128xf32>
    %345 = arith.addf %342, %344 : vector<8x128xf32>
    %346 = arith.subf %345, %308 : vector<8x128xf32>
    %347 = vector.broadcast %318 : vector<8x1xf32> to vector<8x128xf32>
    %348 = arith.mulf %347, %346 : vector<8x128xf32>
    %349 = arith.addf %308, %348 : vector<8x128xf32>
    %350 = arith.index_cast %c6_i32 : i32 to index
    %c0_130 = arith.constant 0 : index
    %c0_131 = arith.constant 0 : index
    %351 = vector.load %arg8[%350, %c0_130, %c0_131] : memref<10x8x128xf32, #tpu.memory_space<vmem>>, vector<1x8x128xf32>
    %352 = vector.shape_cast %351 : vector<1x8x128xf32> to vector<8x128xf32>
    %353 = vector.shape_cast %349 : vector<8x128xf32> to vector<1x8x128xf32>
    tpu.vector_store %arg8[%350, %c0_130, %c0_131], %353 {strides = array<i32>} : memref<10x8x128xf32, #tpu.memory_space<vmem>>, vector<1x8x128xf32>,
    %c7_i32 = arith.constant 7 : i32
    %354 = arith.index_cast %c7_i32 : i32 to index
    %c0_132 = arith.constant 0 : index
    %c0_133 = arith.constant 0 : index
    %355 = vector.load %arg9[%354, %c0_132, %c0_133] : memref<10x8x384xf32, #tpu.memory_space<vmem>>, vector<1x8x384xf32>
    %356 = vector.shape_cast %355 : vector<1x8x384xf32> to vector<8x384xf32>
    %357 = arith.index_cast %c7_i32 : i32 to index
    %c0_134 = arith.constant 0 : index
    %c0_135 = arith.constant 0 : index
    %358 = vector.load %arg3[%357, %c0_134, %c0_135] : memref<10x8x1xf32, #tpu.memory_space<vmem>>, vector<1x8x1xf32>
    %359 = vector.shape_cast %358 : vector<1x8x1xf32> to vector<8x1xf32>
    %cst_136 = arith.constant dense<0.000000e+00> : vector<8x384xf32>
    %360 = tpu.matmul %349, %4, %cst_136 {dimension_numbers = #tpu.dot_dimension_numbers<[1], [0], [0], [1], [0, 0, 1, 1], [], []>} : vector<8x128xf32>, vector<128x384xf32>, vector<8x384xf32> -> vector<8x384xf32>
    %361 = vector.extract_strided_slice %356 {offsets = [0, 0], sizes = [8, 128], strides = [1, 1]} : vector<8x384xf32> to vector<8x128xf32>
    %362 = vector.extract_strided_slice %360 {offsets = [0, 0], sizes = [8, 128], strides = [1, 1]} : vector<8x384xf32> to vector<8x128xf32>
    %363 = arith.addf %361, %362 : vector<8x128xf32>
    %364 = arith.negf %363 : vector<8x128xf32>
    %365 = math.exp %364 : vector<8x128xf32>
    %cst_137 = arith.constant 1.000000e+00 : f32
    %366 = vector.broadcast %cst_137 : f32 to vector<8x128xf32>
    %367 = arith.addf %366, %365 : vector<8x128xf32>
    %368 = arith.divf %366, %367 : vector<8x128xf32>
    %369 = vector.extract_strided_slice %356 {offsets = [0, 128], sizes = [8, 128], strides = [1, 1]} : vector<8x384xf32> to vector<8x128xf32>
    %370 = vector.extract_strided_slice %360 {offsets = [0, 128], sizes = [8, 128], strides = [1, 1]} : vector<8x384xf32> to vector<8x128xf32>
    %371 = arith.addf %369, %370 : vector<8x128xf32>
    %372 = arith.negf %371 : vector<8x128xf32>
    %373 = math.exp %372 : vector<8x128xf32>
    %cst_138 = arith.constant 1.000000e+00 : f32
    %374 = vector.broadcast %cst_138 : f32 to vector<8x128xf32>
    %375 = arith.addf %374, %373 : vector<8x128xf32>
    %376 = arith.divf %374, %375 : vector<8x128xf32>
    %377 = vector.extract_strided_slice %356 {offsets = [0, 256], sizes = [8, 128], strides = [1, 1]} : vector<8x384xf32> to vector<8x128xf32>
    %378 = vector.extract_strided_slice %360 {offsets = [0, 256], sizes = [8, 128], strides = [1, 1]} : vector<8x384xf32> to vector<8x128xf32>
    %379 = vector.broadcast %5 : vector<1x128xf32> to vector<8x128xf32>
    %380 = arith.addf %378, %379 : vector<8x128xf32>
    %381 = arith.mulf %368, %380 : vector<8x128xf32>
    %382 = arith.addf %377, %381 : vector<8x128xf32>
    %383 = math.tanh %382 : vector<8x128xf32>
    %384 = arith.subf %349, %383 : vector<8x128xf32>
    %385 = arith.mulf %376, %384 : vector<8x128xf32>
    %386 = arith.addf %383, %385 : vector<8x128xf32>
    %387 = arith.subf %386, %349 : vector<8x128xf32>
    %388 = vector.broadcast %359 : vector<8x1xf32> to vector<8x128xf32>
    %389 = arith.mulf %388, %387 : vector<8x128xf32>
    %390 = arith.addf %349, %389 : vector<8x128xf32>
    %391 = arith.index_cast %c7_i32 : i32 to index
    %c0_139 = arith.constant 0 : index
    %c0_140 = arith.constant 0 : index
    %392 = vector.load %arg8[%391, %c0_139, %c0_140] : memref<10x8x128xf32, #tpu.memory_space<vmem>>, vector<1x8x128xf32>
    %393 = vector.shape_cast %392 : vector<1x8x128xf32> to vector<8x128xf32>
    %394 = vector.shape_cast %390 : vector<8x128xf32> to vector<1x8x128xf32>
    tpu.vector_store %arg8[%391, %c0_139, %c0_140], %394 {strides = array<i32>} : memref<10x8x128xf32, #tpu.memory_space<vmem>>, vector<1x8x128xf32>,
    %c8_i32 = arith.constant 8 : i32
    %395 = arith.index_cast %c8_i32 : i32 to index
    %c0_141 = arith.constant 0 : index
    %c0_142 = arith.constant 0 : index
    %396 = vector.load %arg9[%395, %c0_141, %c0_142] : memref<10x8x384xf32, #tpu.memory_space<vmem>>, vector<1x8x384xf32>
    %397 = vector.shape_cast %396 : vector<1x8x384xf32> to vector<8x384xf32>
    %398 = arith.index_cast %c8_i32 : i32 to index
    %c0_143 = arith.constant 0 : index
    %c0_144 = arith.constant 0 : index
    %399 = vector.load %arg3[%398, %c0_143, %c0_144] : memref<10x8x1xf32, #tpu.memory_space<vmem>>, vector<1x8x1xf32>
    %400 = vector.shape_cast %399 : vector<1x8x1xf32> to vector<8x1xf32>
    %cst_145 = arith.constant dense<0.000000e+00> : vector<8x384xf32>
    %401 = tpu.matmul %390, %4, %cst_145 {dimension_numbers = #tpu.dot_dimension_numbers<[1], [0], [0], [1], [0, 0, 1, 1], [], []>} : vector<8x128xf32>, vector<128x384xf32>, vector<8x384xf32> -> vector<8x384xf32>
    %402 = vector.extract_strided_slice %397 {offsets = [0, 0], sizes = [8, 128], strides = [1, 1]} : vector<8x384xf32> to vector<8x128xf32>
    %403 = vector.extract_strided_slice %401 {offsets = [0, 0], sizes = [8, 128], strides = [1, 1]} : vector<8x384xf32> to vector<8x128xf32>
    %404 = arith.addf %402, %403 : vector<8x128xf32>
    %405 = arith.negf %404 : vector<8x128xf32>
    %406 = math.exp %405 : vector<8x128xf32>
    %cst_146 = arith.constant 1.000000e+00 : f32
    %407 = vector.broadcast %cst_146 : f32 to vector<8x128xf32>
    %408 = arith.addf %407, %406 : vector<8x128xf32>
    %409 = arith.divf %407, %408 : vector<8x128xf32>
    %410 = vector.extract_strided_slice %397 {offsets = [0, 128], sizes = [8, 128], strides = [1, 1]} : vector<8x384xf32> to vector<8x128xf32>
    %411 = vector.extract_strided_slice %401 {offsets = [0, 128], sizes = [8, 128], strides = [1, 1]} : vector<8x384xf32> to vector<8x128xf32>
    %412 = arith.addf %410, %411 : vector<8x128xf32>
    %413 = arith.negf %412 : vector<8x128xf32>
    %414 = math.exp %413 : vector<8x128xf32>
    %cst_147 = arith.constant 1.000000e+00 : f32
    %415 = vector.broadcast %cst_147 : f32 to vector<8x128xf32>
    %416 = arith.addf %415, %414 : vector<8x128xf32>
    %417 = arith.divf %415, %416 : vector<8x128xf32>
    %418 = vector.extract_strided_slice %397 {offsets = [0, 256], sizes = [8, 128], strides = [1, 1]} : vector<8x384xf32> to vector<8x128xf32>
    %419 = vector.extract_strided_slice %401 {offsets = [0, 256], sizes = [8, 128], strides = [1, 1]} : vector<8x384xf32> to vector<8x128xf32>
    %420 = vector.broadcast %5 : vector<1x128xf32> to vector<8x128xf32>
    %421 = arith.addf %419, %420 : vector<8x128xf32>
    %422 = arith.mulf %409, %421 : vector<8x128xf32>
    %423 = arith.addf %418, %422 : vector<8x128xf32>
    %424 = math.tanh %423 : vector<8x128xf32>
    %425 = arith.subf %390, %424 : vector<8x128xf32>
    %426 = arith.mulf %417, %425 : vector<8x128xf32>
    %427 = arith.addf %424, %426 : vector<8x128xf32>
    %428 = arith.subf %427, %390 : vector<8x128xf32>
    %429 = vector.broadcast %400 : vector<8x1xf32> to vector<8x128xf32>
    %430 = arith.mulf %429, %428 : vector<8x128xf32>
    %431 = arith.addf %390, %430 : vector<8x128xf32>
    %432 = arith.index_cast %c8_i32 : i32 to index
    %c0_148 = arith.constant 0 : index
    %c0_149 = arith.constant 0 : index
    %433 = vector.load %arg8[%432, %c0_148, %c0_149] : memref<10x8x128xf32, #tpu.memory_space<vmem>>, vector<1x8x128xf32>
    %434 = vector.shape_cast %433 : vector<1x8x128xf32> to vector<8x128xf32>
    %435 = vector.shape_cast %431 : vector<8x128xf32> to vector<1x8x128xf32>
    tpu.vector_store %arg8[%432, %c0_148, %c0_149], %435 {strides = array<i32>} : memref<10x8x128xf32, #tpu.memory_space<vmem>>, vector<1x8x128xf32>,
    %c9_i32 = arith.constant 9 : i32
    %436 = arith.index_cast %c9_i32 : i32 to index
    %c0_150 = arith.constant 0 : index
    %c0_151 = arith.constant 0 : index
    %437 = vector.load %arg9[%436, %c0_150, %c0_151] : memref<10x8x384xf32, #tpu.memory_space<vmem>>, vector<1x8x384xf32>
    %438 = vector.shape_cast %437 : vector<1x8x384xf32> to vector<8x384xf32>
    %439 = arith.index_cast %c9_i32 : i32 to index
    %c0_152 = arith.constant 0 : index
    %c0_153 = arith.constant 0 : index
    %440 = vector.load %arg3[%439, %c0_152, %c0_153] : memref<10x8x1xf32, #tpu.memory_space<vmem>>, vector<1x8x1xf32>
    %441 = vector.shape_cast %440 : vector<1x8x1xf32> to vector<8x1xf32>
    %cst_154 = arith.constant dense<0.000000e+00> : vector<8x384xf32>
    %442 = tpu.matmul %431, %4, %cst_154 {dimension_numbers = #tpu.dot_dimension_numbers<[1], [0], [0], [1], [0, 0, 1, 1], [], []>} : vector<8x128xf32>, vector<128x384xf32>, vector<8x384xf32> -> vector<8x384xf32>
    %443 = vector.extract_strided_slice %438 {offsets = [0, 0], sizes = [8, 128], strides = [1, 1]} : vector<8x384xf32> to vector<8x128xf32>
    %444 = vector.extract_strided_slice %442 {offsets = [0, 0], sizes = [8, 128], strides = [1, 1]} : vector<8x384xf32> to vector<8x128xf32>
    %445 = arith.addf %443, %444 : vector<8x128xf32>
    %446 = arith.negf %445 : vector<8x128xf32>
    %447 = math.exp %446 : vector<8x128xf32>
    %cst_155 = arith.constant 1.000000e+00 : f32
    %448 = vector.broadcast %cst_155 : f32 to vector<8x128xf32>
    %449 = arith.addf %448, %447 : vector<8x128xf32>
    %450 = arith.divf %448, %449 : vector<8x128xf32>
    %451 = vector.extract_strided_slice %438 {offsets = [0, 128], sizes = [8, 128], strides = [1, 1]} : vector<8x384xf32> to vector<8x128xf32>
    %452 = vector.extract_strided_slice %442 {offsets = [0, 128], sizes = [8, 128], strides = [1, 1]} : vector<8x384xf32> to vector<8x128xf32>
    %453 = arith.addf %451, %452 : vector<8x128xf32>
    %454 = arith.negf %453 : vector<8x128xf32>
    %455 = math.exp %454 : vector<8x128xf32>
    %cst_156 = arith.constant 1.000000e+00 : f32
    %456 = vector.broadcast %cst_156 : f32 to vector<8x128xf32>
    %457 = arith.addf %456, %455 : vector<8x128xf32>
    %458 = arith.divf %456, %457 : vector<8x128xf32>
    %459 = vector.extract_strided_slice %438 {offsets = [0, 256], sizes = [8, 128], strides = [1, 1]} : vector<8x384xf32> to vector<8x128xf32>
    %460 = vector.extract_strided_slice %442 {offsets = [0, 256], sizes = [8, 128], strides = [1, 1]} : vector<8x384xf32> to vector<8x128xf32>
    %461 = vector.broadcast %5 : vector<1x128xf32> to vector<8x128xf32>
    %462 = arith.addf %460, %461 : vector<8x128xf32>
    %463 = arith.mulf %450, %462 : vector<8x128xf32>
    %464 = arith.addf %459, %463 : vector<8x128xf32>
    %465 = math.tanh %464 : vector<8x128xf32>
    %466 = arith.subf %431, %465 : vector<8x128xf32>
    %467 = arith.mulf %458, %466 : vector<8x128xf32>
    %468 = arith.addf %465, %467 : vector<8x128xf32>
    %469 = arith.subf %468, %431 : vector<8x128xf32>
    %470 = vector.broadcast %441 : vector<8x1xf32> to vector<8x128xf32>
    %471 = arith.mulf %470, %469 : vector<8x128xf32>
    %472 = arith.addf %431, %471 : vector<8x128xf32>
    %473 = arith.index_cast %c9_i32 : i32 to index
    %c0_157 = arith.constant 0 : index
    %c0_158 = arith.constant 0 : index
    %474 = vector.load %arg8[%473, %c0_157, %c0_158] : memref<10x8x128xf32, #tpu.memory_space<vmem>>, vector<1x8x128xf32>
    %475 = vector.shape_cast %474 : vector<1x8x128xf32> to vector<8x128xf32>
    %476 = vector.shape_cast %472 : vector<8x128xf32> to vector<1x8x128xf32>
    tpu.vector_store %arg8[%473, %c0_157, %c0_158], %476 {strides = array<i32>} : memref<10x8x128xf32, #tpu.memory_space<vmem>>, vector<1x8x128xf32>,
    %c10_i32 = arith.constant 10 : i32
    %c0_159 = arith.constant 0 : index
    %c0_160 = arith.constant 0 : index
    %477 = vector.load %arg10[%c0_159, %c0_160] : memref<8x128xf32, #tpu.memory_space<vmem>>, vector<8x128xf32>
    tpu.vector_store %arg10[%c0_159, %c0_160], %472 {strides = array<i32>} : memref<8x128xf32, #tpu.memory_space<vmem>>, vector<8x128xf32>,
    return
  }
  func.func @transform_0(%arg0: i32, %arg1: i32) -> (i32, i32, i32) {
    %c0_i32 = arith.constant 0 : i32
    %c0_i32_0 = arith.constant 0 : i32
    return %arg1, %arg0, %c0_i32 : i32, i32, i32
  }
  func.func @transform_1(%arg0: i32, %arg1: i32) -> (i32, i32, i32) {
    %c0_i32 = arith.constant 0 : i32
    %c0_i32_0 = arith.constant 0 : i32
    return %arg1, %arg0, %c0_i32 : i32, i32, i32
  }
  func.func @transform_2(%arg0: i32, %arg1: i32) -> (i32, i32) {
    %c0_i32 = arith.constant 0 : i32
    %c0_i32_0 = arith.constant 0 : i32
    return %arg0, %c0_i32 : i32, i32
  }
  func.func @transform_3(%arg0: i32, %arg1: i32) -> (i32, i32) {
    %c0_i32 = arith.constant 0 : i32
    %c0_i32_0 = arith.constant 0 : i32
    %c0_i32_1 = arith.constant 0 : i32
    return %c0_i32, %c0_i32_0 : i32, i32
  }
  func.func @transform_4(%arg0: i32, %arg1: i32) -> (i32, i32) {
    %c0_i32 = arith.constant 0 : i32
    %c0_i32_0 = arith.constant 0 : i32
    %c0_i32_1 = arith.constant 0 : i32
    return %c0_i32, %c0_i32_0 : i32, i32
  }
  func.func @transform_5(%arg0: i32, %arg1: i32) -> (i32, i32) {
    %c0_i32 = arith.constant 0 : i32
    %c0_i32_0 = arith.constant 0 : i32
    %c0_i32_1 = arith.constant 0 : i32
    return %c0_i32, %c0_i32_0 : i32, i32
  }
  func.func @transform_6(%arg0: i32, %arg1: i32) -> (i32, i32, i32) {
    %c0_i32 = arith.constant 0 : i32
    %c0_i32_0 = arith.constant 0 : i32
    return %arg1, %arg0, %c0_i32 : i32, i32, i32
  }
}

</mosaic_0001>

<bundles_post_ra>
// kernel: tpu_custom_call.1
= control target key start
LH: loop header
LB: loop body
LE: loop exit
PB: predicated region body
PF: predicated region fallthrough
CT: control target
= control target key end

     0   :  { %11 = vsyncpa [#allocation5], 0  ;;  %s6880_s0 = inlined_call_operand.vmem [shape: f32[10,8,128], index: 0, kind: input, shape index: {}]   ;;  %s6881_s1 = inlined_call_operand.vmem [shape: f32[10,8,1], index: 1, kind: input, shape index: {}]   ;;  %s6882_s2 = inlined_call_operand.vmem [shape: f32[8,128], index: 2, kind: input, shape index: {}]   ;;  %s6883_s3 = inlined_call_operand.hbm [shape: f32[128,384], index: 3, kind: input, shape index: {}]   ;;  %s6884_s4 = inlined_call_operand.hbm [shape: f32[128,384], index: 4, kind: input, shape index: {}]   ;;  %s6885_s5 = inlined_call_operand.vmem [shape: f32[1,128], index: 5, kind: input, shape index: {}]   ;;  %s6886_s6 = inlined_call_operand.hbm [shape: f32[10,8,128], index: 6, kind: output, shape index: {}]  }
   0x1   :  { %12 = vsyncpa [#allocation8], 0 }
   0x2   :  { %13 = vsyncpa [#allocation6], 0  ;;  %s5822_s21 = smov [#allocation4]   ;;  %s5750_s25 = scalar_lea.hbm %s6883_s3, 6144 }
   0x3   :  { %s25_s22 = sshll.u32 %s5822_s21, 4  ;;  %p5751_p0 = scmp.ne.s32.totalorder %s6883_s3, %s5750_s25  ;;  %s26_s22 = int_to_ptr.vmem [resolvable:$true] %s25_s22 }
   0x4   :  { %p5754_p1 = scmp.lt.u32.totalorder %s5750_s25, %s6883_s3 }
   0x6   :  { %p5756_p2 = pnand %p5754_p1, %p5751_p0 }
   0x8   :  { %5759 = shalt.err (!%p5756_p2)
}
   0x9   :  { %s5760_s30 = scalar_lea.vmem %s26_s22, 6144  ;;  %p5765_p4 = scmp.lt.s32.totalorder %s26_s22, %s26_s22 }
   0xa   :  { %p5761_p3 = scmp.ne.s32.totalorder %s26_s22, %s5760_s30  ;;  %p5766_p5 = scmp.lt.s32.totalorder %s5760_s30, %s5760_s30 }
   0xc   :  { %p5767_p6 = por %p5766_p5, %p5765_p4 }
   0xe   :  { %p5768_p7 = pnand %p5767_p6, %p5761_p3 }
  0x10   :  { %5771 = shalt.err (!%p5768_p7)
}
  0x11   :  { %s5823_s7 = smov 384   ;;  %s5824_s8 = smov 24  }
  0x12   :  { %31 = dma.hbm_to_vmem [thread:$0]  %s6883_s3, 6144, %s26_s22, [#allocation5], %s5823_s7, %s5823_s7, %s5824_s8  }
  0x13   :  { %s5825_s11 = smov [#allocation7]   ;;  %s5772_s15 = scalar_lea.hbm %s6884_s4, 6144 }
  0x14   :  { %s37_s12 = sshll.u32 %s5825_s11, 4  ;;  %p5773_p8 = scmp.ne.s32.totalorder %s6884_s4, %s5772_s15  ;;  %s38_s12 = int_to_ptr.vmem [resolvable:$true] %s37_s12 }
  0x15   :  { %p5776_p9 = scmp.lt.u32.totalorder %s5772_s15, %s6884_s4 }
  0x17   :  { %p5778_p10 = pnand %p5776_p9, %p5773_p8 }
  0x19   :  { %5781 = shalt.err (!%p5778_p10)
}
  0x1a   :  { %s5782_s20 = scalar_lea.vmem %s38_s12, 6144  ;;  %p5787_p12 = scmp.lt.s32.totalorder %s38_s12, %s38_s12 }
  0x1b   :  { %p5783_p11 = scmp.ne.s32.totalorder %s38_s12, %s5782_s20  ;;  %p5788_p13 = scmp.lt.s32.totalorder %s5782_s20, %s5782_s20 }
  0x1d   :  { %p5789_p0 = por %p5788_p13, %p5787_p12 }
  0x1f   :  { %p5790_p1 = pnand %p5789_p0, %p5783_p11 }
  0x21   :  { %5793 = shalt.err (!%p5790_p1)
}
  0x22   :  { %43 = dma.hbm_to_vmem [thread:$0]  %s6884_s4, 6144, %s38_s12, [#allocation8], %s5823_s7, %s5823_s7, %s5824_s8  }
  0x23   :  { %5816 = dma.done.wait [#allocation5], 6144  }
  0x24   :  { %5817 = vsyncadd [#allocation5], 4294961152 }
  0x25   :  { %5818 = dma.done.wait [#allocation8], 6144  }
  0x26   :  { %5819 = vsyncadd [#allocation8], 4294961152  ;;  %v5826_v0 = vmov 0.0|0.0   ;;  %v5827_v1 = vmov 0.0   ;;  %vm5828_vm0 = vmmov 0   ;;  %v59_v2 = vld [vmem:[#allocation4 + $0x8] sm:$0xff] }
  0x27   :  { %4528 = vmatprep.subr.bf16.mxu1 %v5826_v0  ;;  %220 = vmatprep.mubr.f32.mxu0 %v5827_v1  ;;  %v62_v3 = vld [vmem:[#allocation4 + $0x20] sm:$0xff]  ;;  %v61_v6 = vld [vmem:[#allocation4 + $0x18] sm:$0xff]  ;;  %v68_v8 = vld [vmem:[#allocation4 + $0x50] sm:$0xff] }
  0x28   :  { %3828 = vmatprep.mubr.msk.f32.mxu1 %vm5828_vm0, %v5827_v1  ;;  %v58_v4 = vld [vmem:[#allocation4] sm:$0xff]  ;;  %v5896_v5 = vpack.c.bf16 %v62_v3, %v59_v2  ;;  %v65_v7 = vld [vmem:[#allocation4 + $0x38] sm:$0xff]  ;;  %v64_v11 = vld [vmem:[#allocation4 + $0x30] sm:$0xff] }
  0x29   :  { %v5898_v9 = vpack.c.bf16 %v61_v6, %v58_v4  ;;  %v5900_v10 = vpack.c.bf16 %v68_v8, %v65_v7  ;;  %v67_v12 = vld [vmem:[#allocation4 + $0x48] sm:$0xff]  ;;  %v74_v14 = vld [vmem:[#allocation4 + $0x80] sm:$0xff]  ;;  %v73_v18 = vld [vmem:[#allocation4 + $0x78] sm:$0xff] }
  0x2a   :  { %v71_v13 = vld [vmem:[#allocation4 + $0x68] sm:$0xff]  ;;  %4497 = vmatprep.subr.bf16.mxu0 %v5896_v5  ;;  %v5904_v15 = vpack.c.bf16 %v67_v12, %v64_v11  ;;  %v70_v17 = vld [vmem:[#allocation4 + $0x60] sm:$0xff]  ;;  %v77_v19 = vld [vmem:[#allocation4 + $0x98] sm:$0xff] }
  0x2b   :  { %4499 = vmatpush1.bf16.msra.mxu0 %v5898_v9  ;;  %v5907_v16 = vpack.c.bf16 %v74_v14, %v71_v13  ;;  %v80_v20 = vld [vmem:[#allocation4 + $0xb0] sm:$0xff]  ;;  %v5910_v21 = vpack.c.bf16 %v73_v18, %v70_v17  ;;  %v79_v25 = vld [vmem:[#allocation4 + $0xa8] sm:$0xff]  ;;  %v86_v28 = vld [vmem:[#allocation4 + $0xe0] sm:$0xff] }
  0x2c   :  { %4501 = vmatprep.subr.bf16.mxu0 %v5900_v10  ;;  %v60_v22 = vld [vmem:[#allocation4 + $0x10] sm:$0xff]  ;;  %v5913_v23 = vpack.c.bf16 %v80_v20, %v77_v19  ;;  %v63_v26 = vld [vmem:[#allocation4 + $0x28] sm:$0xff]  ;;  %v66_v30 = vld [vmem:[#allocation4 + $0x40] sm:$0xff] }
  0x2d   :  { %v76_v24 = vld [vmem:[#allocation4 + $0x90] sm:$0xff]  ;;  %v83_v27 = vld [vmem:[#allocation4 + $0xc8] sm:$0xff]  ;;  %v5915_v29 = vpack.c.bf16 %v63_v26, %v60_v22  ;;  %v69_v31 = vld [vmem:[#allocation4 + $0x58] sm:$0xff] }
  0x2e   :  { %v5918_v32 = vpack.c.bf16 %v79_v25, %v76_v24  ;;  %v82_v33 = vld [vmem:[#allocation4 + $0xc0] sm:$0xff]  ;;  %v5921_v34 = vpack.c.bf16 %v69_v31, %v66_v30  ;;  %v5924_v35 = vpack.c.bf16 %v86_v28, %v83_v27  ;;  %v85_v36 = vld [vmem:[#allocation4 + $0xd8] sm:$0xff]  ;;  %v72_v37 = vld [vmem:[#allocation4 + $0x70] sm:$0xff] }
  0x2f   :  { %4503 = vmatpush1.bf16.msra.mxu0 %v5904_v15  ;;  %4530 = vmatpush3.bf16.msra.mxu1 %v5915_v29  ;;  %v75_v38 = vld [vmem:[#allocation4 + $0x88] sm:$0xff]  ;;  %v89_v39 = vld [vmem:[#allocation4 + $0xf8] sm:$0xff]  ;;  %v92_v40 = vld [vmem:[#allocation4 + $0x110] sm:$0xff]  ;;  %v5928_v41 = vpack.c.bf16 %v85_v36, %v82_v33 }
  0x30   :  { %4505 = vmatprep.subr.bf16.mxu0 %v5907_v16  ;;  %4531 = vmatprep.subr.bf16.mxu1 %v5826_v0  ;;  %v88_v42 = vld [vmem:[#allocation4 + $0xf0] sm:$0xff]  ;;  %v5931_v43 = vpack.c.bf16 %v75_v38, %v72_v37  ;;  %v5934_v44 = vpack.c.bf16 %v92_v40, %v89_v39  ;;  %v91_v45 = vld [vmem:[#allocation4 + $0x108] sm:$0xff]  ;;  %v78_v46 = vld [vmem:[#allocation4 + $0xa0] sm:$0xff] }
  0x31   :  { %v81_v47 = vld [vmem:[#allocation4 + $0xb8] sm:$0xff]  ;;  %v95_v48 = vld [vmem:[#allocation4 + $0x128] sm:$0xff]  ;;  %v98_v49 = vld [vmem:[#allocation4 + $0x140] sm:$0xff]  ;;  %v5938_v50 = vpack.c.bf16 %v91_v45, %v88_v42  ;;  %v5829_v42 = vmov 0  }
  0x32   :  { %v94_v51 = vld [vmem:[#allocation4 + $0x120] sm:$0xff]  ;;  %v5941_v52 = vpack.c.bf16 %v81_v47, %v78_v46  ;;  %v5944_v53 = vpack.c.bf16 %v98_v49, %v95_v48  ;;  %v97_v54 = vld [vmem:[#allocation4 + $0x138] sm:$0xff]  ;;  %v84_v55 = vld [vmem:[#allocation4 + $0xd0] sm:$0xff]  ;;  %5647 = vset.pattern.permute.xlu0 %v5829_v42  ;;  %5648 = vset.pattern.permute.xlu1 %v5829_v42 }
  0x33   :  { %4507 = vmatpush1.bf16.msra.mxu0 %v5910_v21  ;;  %4533 = vmatpush3.bf16.msra.mxu1 %v5921_v34  ;;  %v87_v56 = vld [vmem:[#allocation4 + $0xe8] sm:$0xff]  ;;  %v101_v57 = vld [vmem:[#allocation4 + $0x158] sm:$0xff]  ;;  %v104_v58 = vld [vmem:[#allocation4 + $0x170] sm:$0xff]  ;;  %v5948_v59 = vpack.c.bf16 %v97_v54, %v94_v51 }
  0x34   :  { %4509 = vmatprep.subr.bf16.mxu0 %v5913_v23  ;;  %4534 = vmatprep.subr.bf16.mxu1 %v5826_v0  ;;  %v100_v60 = vld [vmem:[#allocation4 + $0x150] sm:$0xff]  ;;  %v5951_v61 = vpack.c.bf16 %v87_v56, %v84_v55  ;;  %v5954_v62 = vpack.c.bf16 %v104_v58, %v101_v57  ;;  %v103_v63 = vld [vmem:[#allocation4 + $0x168] sm:$0xff]  ;;  %v90_v2 = vld [vmem:[#allocation4 + $0x100] sm:$0xff] }
  0x35   :  { %v93_v3 = vld [vmem:[#allocation4 + $0x118] sm:$0xff]  ;;  %v5958_v4 = vpack.c.bf16 %v103_v63, %v100_v60  ;;  %v96_v7 = vld [vmem:[#allocation4 + $0x130] sm:$0xff]  ;;  %v99_v8 = vld [vmem:[#allocation4 + $0x148] sm:$0xff] }
  0x36   :  { %v5961_v6 = vpack.c.bf16 %v93_v3, %v90_v2  ;;  %v155_v11 = vld [vmem:[%s6880_s0] sm:$0xff]  ;;  %v5970_v12 = vpack.c.bf16 %v99_v8, %v96_v7  ;;  %v105_v14 = vld [vmem:[#allocation4 + $0x178] sm:$0xff]  ;;  %v3417_v18 = vld [vmem:[%s6880_s0 + $0x8] sm:$0xff] }
  0x37   :  { %4511 = vmatpush1.bf16.msra.mxu0 %v5918_v32  ;;  %4536 = vmatpush3.bf16.msra.mxu1 %v5931_v43  ;;  %v102_v13 = vld [vmem:[#allocation4 + $0x160] sm:$0xff]  ;;  %v3418_v19 = vld [vmem:[%s6880_s0 + $0x10] sm:$0xff]  ;;  %v3419_v20 = vld [vmem:[%s6880_s0 + $0x18] sm:$0xff] }
  0x38   :  { %4513 = vmatprep.subr.bf16.mxu0 %v5924_v35  ;;  %4537 = vmatprep.subr.bf16.mxu1 %v5826_v0  ;;  %v5976_v17 = vpack.c.bf16 %v105_v14, %v102_v13  ;;  %v3420_v22 = vld [vmem:[%s6880_s0 + $0x20] sm:$0xff]  ;;  %v3421_v24 = vld [vmem:[%s6880_s0 + $0x28] sm:$0xff]  ;;  %v3422_v25 = vld [vmem:[%s6880_s0 + $0x30] sm:$0xff] }
  0x39   :  { %v3423_v28 = vld [vmem:[%s6880_s0 + $0x38] sm:$0xff]  ;;  %v3424_v33 = vld [vmem:[%s6880_s0 + $0x40] sm:$0xff]  ;;  %v112_v38 = vld [vmem:[#allocation7 + $0x30] sm:$0xff] }
  0x3a   :  { %v1627_v36 = vld [vmem:[%s6881_s1] sm:$0xff]  ;;  %v115_v39 = vld [vmem:[#allocation7 + $0x48] sm:$0xff]  ;;  %v121_v47 = vld [vmem:[#allocation7 + $0x78] sm:$0xff] }
  0x3b   :  { %4515 = vmatpush1.bf16.msra.mxu0 %v5928_v41  ;;  %4539 = vmatpush3.bf16.msra.mxu1 %v5941_v52  ;;  %v119_v40 = vld [vmem:[#allocation7 + $0x68] sm:$0xff]  ;;  %v108_v48 = vld [vmem:[#allocation7 + $0x10] sm:$0xff]  ;;  %v3438_v55 = vld [vmem:[%s6881_s1 + $0x20] sm:$0xff] }
  0x3c   :  { %4517 = vmatprep.subr.bf16.mxu0 %v5934_v44  ;;  %4540 = vmatprep.subr.bf16.mxu1 %v5826_v0  ;;  %v3429_v45 = vld [vmem:[%s6881_s1 + $0x8] sm:$0xff]  ;;  %v128_v51 = vld [vmem:[#allocation7 + $0xb0] sm:$0xff]  ;;  %v114_v58 = vld [vmem:[#allocation7 + $0x40] sm:$0xff] }
  0x3d   :  { %1799 = vperm.xlu0 %5647, %v1627_v36   ;;  %v111_v49 = vld [vmem:[#allocation7 + $0x28] sm:$0xff]  ;;  %v130_v63 = vld [vmem:[#allocation7 + $0xc0] sm:$0xff]  ;;  %v3444_v3 = vld [vmem:[%s6881_s1 + $0x30] sm:$0xff] }
  0x3e   :  { %v6349_v54 = vpack.c.bf16 %v111_v49, %v108_v48  ;;  %v127_v57 = vld [vmem:[#allocation7 + $0xa8] sm:$0xff]  ;;  %v120_v7 = vld [vmem:[#allocation7 + $0x70] sm:$0xff] }
  0x3f   :  { %4519 = vmatpush1.bf16.msra.mxu0 %v5938_v50  ;;  %4542 = vmatpush3.bf16.msra.mxu1 %v5951_v61  ;;  %v131_v60 = vld [vmem:[#allocation7 + $0xc8] sm:$0xff]  ;;  %v136_v14 = vld [vmem:[#allocation7 + $0xf0] sm:$0xff] }
  0x40   :  { %4521 = vmatprep.subr.bf16.mxu0 %v5944_v53  ;;  %4543 = vmatprep.subr.bf16.mxu1 %v5826_v0  ;;  %v123_v8 = vld [vmem:[#allocation7 + $0x88] sm:$0xff] }
  0x41   :  { %1975 = vperm.xlu0 %5647, %v3429_v45   ;;  %v144_v45 = vld [vmem:[#allocation7 + $0x130] sm:$0xff] }
  0x43   :  { %4523 = vmatpush1.bf16.msra.mxu0 %v5948_v59  ;;  %4545 = vmatpush3.bf16.msra.mxu1 %v5961_v6 }
  0x44   :  { %4525 = vmatprep.subr.bf16.mxu0 %v5954_v62  ;;  %4546 = vmatprep.subr.bf16.mxu1 %v5826_v0 }
  0x45   :  { %2506 = vperm.xlu0 %5647, %v3438_v55   ;;  %v153_v55 = vld [vmem:[#allocation7 + $0x178] sm:$0xff] }
  0x47   :  { %4527 = vmatpush1.bf16.msra.mxu0 %v5958_v4  ;;  %4548 = vmatpush3.bf16.msra.mxu1 %v5970_v12 }
  0x48   :  { %4553 = vmatprep.subr.bf16.mxu0 %v5896_v5  ;;  %4549 = vmatprep.subr.bf16.mxu1 %v5826_v0 }
  0x49   :  { %2860 = vperm.xlu0 %5647, %v3444_v3  }
  0x4a   :  { %221 = vmatmul.mubr.f32.vlgmr.msra.gmra.mrb[0].mxu0 %v155_v11 }
  0x4b   :  { %4555 = vmatpush1.bf16.msra.mxu0 %v5898_v9  ;;  %366 = vmatprep.mubr.f32.mxu0 %v5827_v1 }
  0x4c   :  { %4557 = vmatprep.subr.bf16.mxu0 %v5900_v10  ;;  %4551 = vmatpush3.bf16.msra.mxu1 %v5976_v17 }
  0x4d   :  { %4584 = vmatprep.subr.bf16.mxu1 %v5826_v0 }
  0x4f   :  { %4559 = vmatpush1.bf16.msra.mxu0 %v5904_v15  ;;  %3829 = vmatmul.mubr.f32.vlgmr.msra.gmra.mrb[0].mxu1 %v155_v11  ;;  %v137_v11 = vld [vmem:[#allocation7 + $0xf8] sm:$0xff] }
  0x50   :  { %4561 = vmatprep.subr.bf16.mxu0 %v5907_v16  ;;  %4586 = vmatpush3.bf16.msra.mxu1 %v5915_v29 }
  0x51   :  { %4587 = vmatprep.subr.bf16.mxu1 %v5826_v0  ;;  %3863 = vmatprep.mubr.msk.f32.mxu1 %vm5828_vm0, %v5827_v1 }
  0x53   :  { %4563 = vmatpush1.bf16.msra.mxu0 %v5910_v21 }
  0x54   :  { %4565 = vmatprep.subr.bf16.mxu0 %v5913_v23  ;;  %4589 = vmatpush3.bf16.msra.mxu1 %v5921_v34 }
  0x55   :  { %4590 = vmatprep.subr.bf16.mxu1 %v5826_v0 }
  0x57   :  { %4567 = vmatpush1.bf16.msra.mxu0 %v5918_v32 }
  0x58   :  { %4569 = vmatprep.subr.bf16.mxu0 %v5924_v35  ;;  %4592 = vmatpush3.bf16.msra.mxu1 %v5931_v43 }
  0x59   :  { %4593 = vmatprep.subr.bf16.mxu1 %v5826_v0 }
  0x5b   :  { %4571 = vmatpush1.bf16.msra.mxu0 %v5928_v41 }
  0x5c   :  { %4573 = vmatprep.subr.bf16.mxu0 %v5934_v44  ;;  %4595 = vmatpush3.bf16.msra.mxu1 %v5941_v52 }
  0x5d   :  { %4596 = vmatprep.subr.bf16.mxu1 %v5826_v0 }
  0x5f   :  { %4575 = vmatpush1.bf16.msra.mxu0 %v5938_v50 }
  0x60   :  { %4577 = vmatprep.subr.bf16.mxu0 %v5944_v53  ;;  %4598 = vmatpush3.bf16.msra.mxu1 %v5951_v61 }
  0x61   :  { %4599 = vmatprep.subr.bf16.mxu1 %v5826_v0 }
  0x63   :  { %4579 = vmatpush1.bf16.msra.mxu0 %v5948_v59 }
  0x64   :  { %4581 = vmatprep.subr.bf16.mxu0 %v5954_v62  ;;  %4601 = vmatpush3.bf16.msra.mxu1 %v5961_v6 }
  0x65   :  { %4602 = vmatprep.subr.bf16.mxu1 %v5826_v0 }
  0x67   :  { %4583 = vmatpush1.bf16.msra.mxu0 %v5958_v4 }
  0x68   :  { %4609 = vmatprep.subr.bf16.mxu0 %v5896_v5  ;;  %4604 = vmatpush3.bf16.msra.mxu1 %v5970_v12 }
  0x69   :  { %4605 = vmatprep.subr.bf16.mxu1 %v5826_v0 }
  0x6a   :  { %367 = vmatmul.mubr.f32.vlgmr.msra.gmra.mrb[2].mxu0 %v3417_v18 }
  0x6b   :  { %4611 = vmatpush1.bf16.msra.mxu0 %v5898_v9  ;;  %513 = vmatprep.mubr.f32.mxu0 %v5827_v1 }
  0x6c   :  { %4613 = vmatprep.subr.bf16.mxu0 %v5900_v10  ;;  %4607 = vmatpush3.bf16.msra.mxu1 %v5976_v17 }
  0x6d   :  { %4640 = vmatprep.subr.bf16.mxu1 %v5826_v0 }
  0x6f   :  { %4615 = vmatpush1.bf16.msra.mxu0 %v5904_v15  ;;  %3864 = vmatmul.mubr.f32.vlgmr.msra.gmra.mrb[2].mxu1 %v3417_v18  ;;  %v3450_v18 = vld [vmem:[%s6881_s1 + $0x40] sm:$0xff] }
  0x70   :  { %4617 = vmatprep.subr.bf16.mxu0 %v5907_v16  ;;  %4642 = vmatpush3.bf16.msra.mxu1 %v5915_v29 }
  0x71   :  { %4643 = vmatprep.subr.bf16.mxu1 %v5826_v0  ;;  %3898 = vmatprep.mubr.msk.f32.mxu1 %vm5828_vm0, %v5827_v1 }
  0x72   :  { %3214 = vperm.xlu0 %5647, %v3450_v18  }
  0x73   :  { %4619 = vmatpush1.bf16.msra.mxu0 %v5910_v21 }
  0x74   :  { %4621 = vmatprep.subr.bf16.mxu0 %v5913_v23  ;;  %4645 = vmatpush3.bf16.msra.mxu1 %v5921_v34 }
  0x75   :  { %4646 = vmatprep.subr.bf16.mxu1 %v5826_v0 }
  0x77   :  { %4623 = vmatpush1.bf16.msra.mxu0 %v5918_v32 }
  0x78   :  { %4625 = vmatprep.subr.bf16.mxu0 %v5924_v35  ;;  %4648 = vmatpush3.bf16.msra.mxu1 %v5931_v43 }
  0x79   :  { %4649 = vmatprep.subr.bf16.mxu1 %v5826_v0 }
  0x7b   :  { %4627 = vmatpush1.bf16.msra.mxu0 %v5928_v41 }
  0x7c   :  { %4629 = vmatprep.subr.bf16.mxu0 %v5934_v44  ;;  %4651 = vmatpush3.bf16.msra.mxu1 %v5941_v52 }
  0x7d   :  { %4652 = vmatprep.subr.bf16.mxu1 %v5826_v0 }
  0x7f   :  { %4631 = vmatpush1.bf16.msra.mxu0 %v5938_v50 }
  0x80   :  { %4633 = vmatprep.subr.bf16.mxu0 %v5944_v53  ;;  %4654 = vmatpush3.bf16.msra.mxu1 %v5951_v61 }
  0x81   :  { %4655 = vmatprep.subr.bf16.mxu1 %v5826_v0 }
  0x83   :  { %4635 = vmatpush1.bf16.msra.mxu0 %v5948_v59 }
  0x84   :  { %4637 = vmatprep.subr.bf16.mxu0 %v5954_v62  ;;  %4657 = vmatpush3.bf16.msra.mxu1 %v5961_v6 }
  0x85   :  { %4658 = vmatprep.subr.bf16.mxu1 %v5826_v0 }
  0x87   :  { %4639 = vmatpush1.bf16.msra.mxu0 %v5958_v4 }
  0x88   :  { %4665 = vmatprep.subr.bf16.mxu0 %v5896_v5  ;;  %4660 = vmatpush3.bf16.msra.mxu1 %v5970_v12 }
  0x89   :  { %4661 = vmatprep.subr.bf16.mxu1 %v5826_v0 }
  0x8a   :  { %514 = vmatmul.mubr.f32.vlgmr.msra.gmra.mrb[4].mxu0 %v3418_v19 }
  0x8b   :  { %4667 = vmatpush1.bf16.msra.mxu0 %v5898_v9  ;;  %660 = vmatprep.mubr.f32.mxu0 %v5827_v1 }
  0x8c   :  { %4669 = vmatprep.subr.bf16.mxu0 %v5900_v10  ;;  %4663 = vmatpush3.bf16.msra.mxu1 %v5976_v17 }
  0x8d   :  { %4696 = vmatprep.subr.bf16.mxu1 %v5826_v0 }
  0x8f   :  { %4671 = vmatpush1.bf16.msra.mxu0 %v5904_v15  ;;  %3899 = vmatmul.mubr.f32.vlgmr.msra.gmra.mrb[4].mxu1 %v3418_v19 }
  0x90   :  { %4673 = vmatprep.subr.bf16.mxu0 %v5907_v16  ;;  %4698 = vmatpush3.bf16.msra.mxu1 %v5915_v29 }
  0x91   :  { %4699 = vmatprep.subr.bf16.mxu1 %v5826_v0  ;;  %3933 = vmatprep.mubr.msk.f32.mxu1 %vm5828_vm0, %v5827_v1 }
  0x93   :  { %4675 = vmatpush1.bf16.msra.mxu0 %v5910_v21 }
  0x94   :  { %4677 = vmatprep.subr.bf16.mxu0 %v5913_v23  ;;  %4701 = vmatpush3.bf16.msra.mxu1 %v5921_v34 }
  0x95   :  { %4702 = vmatprep.subr.bf16.mxu1 %v5826_v0 }
  0x97   :  { %4679 = vmatpush1.bf16.msra.mxu0 %v5918_v32 }
  0x98   :  { %4681 = vmatprep.subr.bf16.mxu0 %v5924_v35  ;;  %4704 = vmatpush3.bf16.msra.mxu1 %v5931_v43 }
  0x99   :  { %4705 = vmatprep.subr.bf16.mxu1 %v5826_v0 }
  0x9b   :  { %4683 = vmatpush1.bf16.msra.mxu0 %v5928_v41 }
  0x9c   :  { %4685 = vmatprep.subr.bf16.mxu0 %v5934_v44  ;;  %4707 = vmatpush3.bf16.msra.mxu1 %v5941_v52 }
  0x9d   :  { %4708 = vmatprep.subr.bf16.mxu1 %v5826_v0 }
  0x9f   :  { %4687 = vmatpush1.bf16.msra.mxu0 %v5938_v50 }
  0xa0   :  { %4689 = vmatprep.subr.bf16.mxu0 %v5944_v53  ;;  %4710 = vmatpush3.bf16.msra.mxu1 %v5951_v61 }
  0xa1   :  { %4711 = vmatprep.subr.bf16.mxu1 %v5826_v0 }
  0xa3   :  { %4691 = vmatpush1.bf16.msra.mxu0 %v5948_v59 }
  0xa4   :  { %4693 = vmatprep.subr.bf16.mxu0 %v5954_v62  ;;  %4713 = vmatpush3.bf16.msra.mxu1 %v5961_v6 }
  0xa5   :  { %4714 = vmatprep.subr.bf16.mxu1 %v5826_v0 }
  0xa7   :  { %4695 = vmatpush1.bf16.msra.mxu0 %v5958_v4 }
  0xa8   :  { %4721 = vmatprep.subr.bf16.mxu0 %v5896_v5  ;;  %4716 = vmatpush3.bf16.msra.mxu1 %v5970_v12 }
  0xa9   :  { %4717 = vmatprep.subr.bf16.mxu1 %v5826_v0 }
  0xaa   :  { %661 = vmatmul.mubr.f32.vlgmr.msra.gmra.mrb[6].mxu0 %v3419_v20 }
  0xab   :  { %4723 = vmatpush1.bf16.msra.mxu0 %v5898_v9  ;;  %807 = vmatprep.mubr.f32.mxu0 %v5827_v1 }
  0xac   :  { %4725 = vmatprep.subr.bf16.mxu0 %v5900_v10  ;;  %4719 = vmatpush3.bf16.msra.mxu1 %v5976_v17 }
  0xad   :  { %4752 = vmatprep.subr.bf16.mxu1 %v5826_v0 }
  0xaf   :  { %4727 = vmatpush1.bf16.msra.mxu0 %v5904_v15  ;;  %3934 = vmatmul.mubr.f32.vlgmr.msra.gmra.mrb[6].mxu1 %v3419_v20  ;;  %v139_v20 = vld [vmem:[#allocation7 + $0x108] sm:$0xff] }
  0xb0   :  { %4729 = vmatprep.subr.bf16.mxu0 %v5907_v16  ;;  %4754 = vmatpush3.bf16.msra.mxu1 %v5915_v29 }
  0xb1   :  { %4755 = vmatprep.subr.bf16.mxu1 %v5826_v0  ;;  %3968 = vmatprep.mubr.msk.f32.mxu1 %vm5828_vm0, %v5827_v1 }
  0xb3   :  { %4731 = vmatpush1.bf16.msra.mxu0 %v5910_v21 }
  0xb4   :  { %4733 = vmatprep.subr.bf16.mxu0 %v5913_v23  ;;  %4757 = vmatpush3.bf16.msra.mxu1 %v5921_v34 }
  0xb5   :  { %4758 = vmatprep.subr.bf16.mxu1 %v5826_v0 }
  0xb7   :  { %4735 = vmatpush1.bf16.msra.mxu0 %v5918_v32 }
  0xb8   :  { %4737 = vmatprep.subr.bf16.mxu0 %v5924_v35  ;;  %4760 = vmatpush3.bf16.msra.mxu1 %v5931_v43 }
  0xb9   :  { %4761 = vmatprep.subr.bf16.mxu1 %v5826_v0 }
  0xbb   :  { %4739 = vmatpush1.bf16.msra.mxu0 %v5928_v41 }
  0xbc   :  { %4741 = vmatprep.subr.bf16.mxu0 %v5934_v44  ;;  %4763 = vmatpush3.bf16.msra.mxu1 %v5941_v52 }
  0xbd   :  { %4764 = vmatprep.subr.bf16.mxu1 %v5826_v0 }
  0xbf   :  { %4743 = vmatpush1.bf16.msra.mxu0 %v5938_v50 }
  0xc0   :  { %4745 = vmatprep.subr.bf16.mxu0 %v5944_v53  ;;  %4766 = vmatpush3.bf16.msra.mxu1 %v5951_v61 }
  0xc1   :  { %4767 = vmatprep.subr.bf16.mxu1 %v5826_v0 }
  0xc3   :  { %4747 = vmatpush1.bf16.msra.mxu0 %v5948_v59 }
  0xc4   :  { %4749 = vmatprep.subr.bf16.mxu0 %v5954_v62  ;;  %4769 = vmatpush3.bf16.msra.mxu1 %v5961_v6 }
  0xc5   :  { %4770 = vmatprep.subr.bf16.mxu1 %v5826_v0 }
  0xc7   :  { %4751 = vmatpush1.bf16.msra.mxu0 %v5958_v4 }
  0xc8   :  { %4777 = vmatprep.subr.bf16.mxu0 %v5896_v5  ;;  %4772 = vmatpush3.bf16.msra.mxu1 %v5970_v12 }
  0xc9   :  { %4773 = vmatprep.subr.bf16.mxu1 %v5826_v0 }
  0xca   :  { %808 = vmatmul.mubr.f32.vlgmr.msra.gmra.mrb[8].mxu0 %v3420_v22 }
  0xcb   :  { %4779 = vmatpush1.bf16.msra.mxu0 %v5898_v9  ;;  %954 = vmatprep.mubr.f32.mxu0 %v5827_v1 }
  0xcc   :  { %4781 = vmatprep.subr.bf16.mxu0 %v5900_v10  ;;  %4775 = vmatpush3.bf16.msra.mxu1 %v5976_v17 }
  0xcd   :  { %4808 = vmatprep.subr.bf16.mxu1 %v5826_v0 }
  0xcf   :  { %4783 = vmatpush1.bf16.msra.mxu0 %v5904_v15  ;;  %3969 = vmatmul.mubr.f32.vlgmr.msra.gmra.mrb[8].mxu1 %v3420_v22  ;;  %v126_v22 = vld [vmem:[#allocation7 + $0xa0] sm:$0xff] }
  0xd0   :  { %4785 = vmatprep.subr.bf16.mxu0 %v5907_v16  ;;  %4810 = vmatpush3.bf16.msra.mxu1 %v5915_v29 }
  0xd1   :  { %4811 = vmatprep.subr.bf16.mxu1 %v5826_v0  ;;  %4003 = vmatprep.mubr.msk.f32.mxu1 %vm5828_vm0, %v5827_v1 }
  0xd3   :  { %4787 = vmatpush1.bf16.msra.mxu0 %v5910_v21 }
  0xd4   :  { %4789 = vmatprep.subr.bf16.mxu0 %v5913_v23  ;;  %4813 = vmatpush3.bf16.msra.mxu1 %v5921_v34 }
  0xd5   :  { %4814 = vmatprep.subr.bf16.mxu1 %v5826_v0 }
  0xd7   :  { %4791 = vmatpush1.bf16.msra.mxu0 %v5918_v32 }
  0xd8   :  { %4793 = vmatprep.subr.bf16.mxu0 %v5924_v35  ;;  %4816 = vmatpush3.bf16.msra.mxu1 %v5931_v43 }
  0xd9   :  { %4817 = vmatprep.subr.bf16.mxu1 %v5826_v0 }
  0xdb   :  { %4795 = vmatpush1.bf16.msra.mxu0 %v5928_v41 }
  0xdc   :  { %4797 = vmatprep.subr.bf16.mxu0 %v5934_v44  ;;  %4819 = vmatpush3.bf16.msra.mxu1 %v5941_v52 }
  0xdd   :  { %4820 = vmatprep.subr.bf16.mxu1 %v5826_v0 }
  0xdf   :  { %4799 = vmatpush1.bf16.msra.mxu0 %v5938_v50 }
  0xe0   :  { %4801 = vmatprep.subr.bf16.mxu0 %v5944_v53  ;;  %4822 = vmatpush3.bf16.msra.mxu1 %v5951_v61 }
  0xe1   :  { %4823 = vmatprep.subr.bf16.mxu1 %v5826_v0 }
  0xe3   :  { %4803 = vmatpush1.bf16.msra.mxu0 %v5948_v59 }
  0xe4   :  { %4805 = vmatprep.subr.bf16.mxu0 %v5954_v62  ;;  %4825 = vmatpush3.bf16.msra.mxu1 %v5961_v6 }
  0xe5   :  { %4826 = vmatprep.subr.bf16.mxu1 %v5826_v0 }
  0xe7   :  { %4807 = vmatpush1.bf16.msra.mxu0 %v5958_v4 }
  0xe8   :  { %4833 = vmatprep.subr.bf16.mxu0 %v5896_v5  ;;  %4828 = vmatpush3.bf16.msra.mxu1 %v5970_v12 }
  0xe9   :  { %4829 = vmatprep.subr.bf16.mxu1 %v5826_v0 }
  0xea   :  { %955 = vmatmul.mubr.f32.vlgmr.msra.gmra.mrb[10].mxu0 %v3421_v24 }
  0xeb   :  { %4835 = vmatpush1.bf16.msra.mxu0 %v5898_v9  ;;  %1101 = vmatprep.mubr.f32.mxu0 %v5827_v1 }
  0xec   :  { %4837 = vmatprep.subr.bf16.mxu0 %v5900_v10  ;;  %4831 = vmatpush3.bf16.msra.mxu1 %v5976_v17 }
  0xed   :  { %4864 = vmatprep.subr.bf16.mxu1 %v5826_v0 }
  0xef   :  { %4839 = vmatpush1.bf16.msra.mxu0 %v5904_v15  ;;  %4004 = vmatmul.mubr.f32.vlgmr.msra.gmra.mrb[10].mxu1 %v3421_v24  ;;  %v129_v24 = vld [vmem:[#allocation7 + $0xb8] sm:$0xff] }
  0xf0   :  { %4841 = vmatprep.subr.bf16.mxu0 %v5907_v16  ;;  %4866 = vmatpush3.bf16.msra.mxu1 %v5915_v29 }
  0xf1   :  { %4867 = vmatprep.subr.bf16.mxu1 %v5826_v0  ;;  %4038 = vmatprep.mubr.msk.f32.mxu1 %vm5828_vm0, %v5827_v1 }
  0xf3   :  { %4843 = vmatpush1.bf16.msra.mxu0 %v5910_v21 }
  0xf4   :  { %4845 = vmatprep.subr.bf16.mxu0 %v5913_v23  ;;  %4869 = vmatpush3.bf16.msra.mxu1 %v5921_v34 }
  0xf5   :  { %4870 = vmatprep.subr.bf16.mxu1 %v5826_v0 }
  0xf7   :  { %4847 = vmatpush1.bf16.msra.mxu0 %v5918_v32 }
  0xf8   :  { %4849 = vmatprep.subr.bf16.mxu0 %v5924_v35  ;;  %4872 = vmatpush3.bf16.msra.mxu1 %v5931_v43 }
  0xf9   :  { %4873 = vmatprep.subr.bf16.mxu1 %v5826_v0 }
  0xfb   :  { %4851 = vmatpush1.bf16.msra.mxu0 %v5928_v41 }
  0xfc   :  { %4853 = vmatprep.subr.bf16.mxu0 %v5934_v44  ;;  %4875 = vmatpush3.bf16.msra.mxu1 %v5941_v52 }
  0xfd   :  { %4876 = vmatprep.subr.bf16.mxu1 %v5826_v0 }
  0xff   :  { %4855 = vmatpush1.bf16.msra.mxu0 %v5938_v50 }
 0x100   :  { %4857 = vmatprep.subr.bf16.mxu0 %v5944_v53  ;;  %4878 = vmatpush3.bf16.msra.mxu1 %v5951_v61 }
 0x101   :  { %4879 = vmatprep.subr.bf16.mxu1 %v5826_v0 }
 0x103   :  { %4859 = vmatpush1.bf16.msra.mxu0 %v5948_v59 }
 0x104   :  { %4861 = vmatprep.subr.bf16.mxu0 %v5954_v62  ;;  %4881 = vmatpush3.bf16.msra.mxu1 %v5961_v6 }
 0x105   :  { %4882 = vmatprep.subr.bf16.mxu1 %v5826_v0 }
 0x107   :  { %4863 = vmatpush1.bf16.msra.mxu0 %v5958_v4 }
 0x108   :  { %4889 = vmatprep.subr.bf16.mxu0 %v5896_v5  ;;  %4884 = vmatpush3.bf16.msra.mxu1 %v5970_v12 }
 0x109   :  { %4885 = vmatprep.subr.bf16.mxu1 %v5826_v0 }
 0x10a   :  { %1102 = vmatmul.mubr.f32.vlgmr.msra.gmra.mrb[12].mxu0 %v3422_v25 }
 0x10b   :  { %4891 = vmatpush1.bf16.msra.mxu0 %v5898_v9  ;;  %1248 = vmatprep.mubr.f32.mxu0 %v5827_v1 }
 0x10c   :  { %4893 = vmatprep.subr.bf16.mxu0 %v5900_v10  ;;  %4887 = vmatpush3.bf16.msra.mxu1 %v5976_v17 }
 0x10d   :  { %4920 = vmatprep.subr.bf16.mxu1 %v5826_v0 }
 0x10f   :  { %4895 = vmatpush1.bf16.msra.mxu0 %v5904_v15  ;;  %4039 = vmatmul.mubr.f32.vlgmr.msra.gmra.mrb[12].mxu1 %v3422_v25  ;;  %v143_v25 = vld [vmem:[#allocation7 + $0x128] sm:$0xff] }
 0x110   :  { %4897 = vmatprep.subr.bf16.mxu0 %v5907_v16  ;;  %4922 = vmatpush3.bf16.msra.mxu1 %v5915_v29 }
 0x111   :  { %4923 = vmatprep.subr.bf16.mxu1 %v5826_v0  ;;  %4073 = vmatprep.mubr.msk.f32.mxu1 %vm5828_vm0, %v5827_v1 }
 0x113   :  { %4899 = vmatpush1.bf16.msra.mxu0 %v5910_v21 }
 0x114   :  { %4901 = vmatprep.subr.bf16.mxu0 %v5913_v23  ;;  %4925 = vmatpush3.bf16.msra.mxu1 %v5921_v34 }
 0x115   :  { %4926 = vmatprep.subr.bf16.mxu1 %v5826_v0 }
 0x117   :  { %4903 = vmatpush1.bf16.msra.mxu0 %v5918_v32 }
 0x118   :  { %4905 = vmatprep.subr.bf16.mxu0 %v5924_v35  ;;  %4928 = vmatpush3.bf16.msra.mxu1 %v5931_v43 }
 0x119   :  { %4929 = vmatprep.subr.bf16.mxu1 %v5826_v0 }
 0x11b   :  { %4907 = vmatpush1.bf16.msra.mxu0 %v5928_v41 }
 0x11c   :  { %4909 = vmatprep.subr.bf16.mxu0 %v5934_v44  ;;  %4931 = vmatpush3.bf16.msra.mxu1 %v5941_v52 }
 0x11d   :  { %4932 = vmatprep.subr.bf16.mxu1 %v5826_v0 }
 0x11f   :  { %4911 = vmatpush1.bf16.msra.mxu0 %v5938_v50 }
 0x120   :  { %4913 = vmatprep.subr.bf16.mxu0 %v5944_v53  ;;  %4934 = vmatpush3.bf16.msra.mxu1 %v5951_v61 }
 0x121   :  { %4935 = vmatprep.subr.bf16.mxu1 %v5826_v0 }
 0x122   :  { %v6235_v26 = vpop.f32.mrb[0].mxu1 }
 0x123   :  { %4915 = vmatpush1.bf16.msra.mxu0 %v5948_v59  ;;  %v3830_v27 = vpop.f32.mrb[1].mxu1 }
 0x124   :  { %4917 = vmatprep.subr.bf16.mxu0 %v5954_v62  ;;  %4937 = vmatpush3.bf16.msra.mxu1 %v5961_v6  ;;  %v146_v27 = vld [vmem:[#allocation7 + $0x140] sm:$0xff] }
 0x125   :  { %4938 = vmatprep.subr.bf16.mxu1 %v5826_v0 }
 0x127   :  { %4919 = vmatpush1.bf16.msra.mxu0 %v5958_v4 }
 0x128   :  { %4945 = vmatprep.subr.bf16.mxu0 %v5896_v5  ;;  %4940 = vmatpush3.bf16.msra.mxu1 %v5970_v12 }
 0x129   :  { %4941 = vmatprep.subr.bf16.mxu1 %v5826_v0 }
 0x12a   :  { %1249 = vmatmul.mubr.f32.vlgmr.msra.gmra.mrb[14].mxu0 %v3423_v28 }
 0x12b   :  { %4947 = vmatpush1.bf16.msra.mxu0 %v5898_v9  ;;  %1395 = vmatprep.mubr.f32.mxu0 %v5827_v1 }
 0x12c   :  { %4949 = vmatprep.subr.bf16.mxu0 %v5900_v10  ;;  %4943 = vmatpush3.bf16.msra.mxu1 %v5976_v17 }
 0x12d   :  { %4976 = vmatprep.subr.bf16.mxu1 %v5826_v0 }
 0x12f   :  { %4951 = vmatpush1.bf16.msra.mxu0 %v5904_v15  ;;  %4074 = vmatmul.mubr.f32.vlgmr.msra.gmra.mrb[14].mxu1 %v3423_v28  ;;  %v6387_v28 = vpack.c.bf16 %v139_v20, %v136_v14 }
 0x130   :  { %4953 = vmatprep.subr.bf16.mxu0 %v5907_v16  ;;  %4978 = vmatpush3.bf16.msra.mxu1 %v5915_v29 }
 0x131   :  { %4979 = vmatprep.subr.bf16.mxu1 %v5826_v0  ;;  %4108 = vmatprep.mubr.msk.f32.mxu1 %vm5828_vm0, %v5827_v1 }
 0x133   :  { %4955 = vmatpush1.bf16.msra.mxu0 %v5910_v21 }
 0x134   :  { %4957 = vmatprep.subr.bf16.mxu0 %v5913_v23  ;;  %4981 = vmatpush3.bf16.msra.mxu1 %v5921_v34 }
 0x135   :  { %4982 = vmatprep.subr.bf16.mxu1 %v5826_v0 }
 0x137   :  { %4959 = vmatpush1.bf16.msra.mxu0 %v5918_v32 }
 0x138   :  { %4961 = vmatprep.subr.bf16.mxu0 %v5924_v35  ;;  %4984 = vmatpush3.bf16.msra.mxu1 %v5931_v43 }
 0x139   :  { %4985 = vmatprep.subr.bf16.mxu1 %v5826_v0 }
 0x13b   :  { %4963 = vmatpush1.bf16.msra.mxu0 %v5928_v41 }
 0x13c   :  { %4965 = vmatprep.subr.bf16.mxu0 %v5934_v44  ;;  %4987 = vmatpush3.bf16.msra.mxu1 %v5941_v52 }
 0x13d   :  { %4988 = vmatprep.subr.bf16.mxu1 %v5826_v0 }
 0x13f   :  { %4967 = vmatpush1.bf16.msra.mxu0 %v5938_v50 }
 0x140   :  { %4969 = vmatprep.subr.bf16.mxu0 %v5944_v53  ;;  %4990 = vmatpush3.bf16.msra.mxu1 %v5951_v61 }
 0x141   :  { %4991 = vmatprep.subr.bf16.mxu1 %v5826_v0 }
 0x142   :  { %v6275_v30 = vpop.f32.mrb[2].mxu1 }
 0x143   :  { %4971 = vmatpush1.bf16.msra.mxu0 %v5948_v59  ;;  %v3865_v31 = vpop.f32.mrb[3].mxu1 }
 0x144   :  { %4973 = vmatprep.subr.bf16.mxu0 %v5954_v62  ;;  %4993 = vmatpush3.bf16.msra.mxu1 %v5961_v6  ;;  %v142_v31 = vld [vmem:[#allocation7 + $0x120] sm:$0xff] }
 0x145   :  { %4994 = vmatprep.subr.bf16.mxu1 %v5826_v0 }
 0x147   :  { %4975 = vmatpush1.bf16.msra.mxu0 %v5958_v4 }
 0x148   :  { %5001 = vmatprep.subr.bf16.mxu0 %v5896_v5  ;;  %4996 = vmatpush3.bf16.msra.mxu1 %v5970_v12  ;;  %v107_v5 = vld [vmem:[#allocation7 + $0x8] sm:$0xff] }
 0x149   :  { %4997 = vmatprep.subr.bf16.mxu1 %v5826_v0 }
 0x14a   :  { %1396 = vmatmul.mubr.f32.vlgmr.msra.gmra.mrb[16].mxu0 %v3424_v33 }
 0x14b   :  { %5003 = vmatpush1.bf16.msra.mxu0 %v5898_v9  ;;  %1542 = vmatprep.mubr.f32.mxu0 %v5827_v1  ;;  %v110_v9 = vld [vmem:[#allocation7 + $0x20] sm:$0xff] }
 0x14c   :  { %5005 = vmatprep.subr.bf16.mxu0 %v5900_v10  ;;  %4999 = vmatpush3.bf16.msra.mxu1 %v5976_v17  ;;  %v6314_v10 = vpack.c.bf16 %v110_v9, %v107_v5  ;;  %v6393_v5 = vpack.c.bf16 %v146_v27, %v143_v25  ;;  %v145_v9 = vld [vmem:[#allocation7 + $0x138] sm:$0xff] }
 0x14d   :  { %5032 = vmatprep.subr.bf16.mxu1 %v5826_v0 }
 0x14f   :  { %5007 = vmatpush1.bf16.msra.mxu0 %v5904_v15  ;;  %4109 = vmatmul.mubr.f32.vlgmr.msra.gmra.mrb[16].mxu1 %v3424_v33  ;;  %v106_v15 = vld [vmem:[#allocation7] sm:$0xff]  ;;  %v6390_v33 = vpack.c.bf16 %v129_v24, %v126_v22 }
 0x150   :  { %5009 = vmatprep.subr.bf16.mxu0 %v5907_v16  ;;  %5034 = vmatpush3.bf16.msra.mxu1 %v5915_v29  ;;  %v109_v16 = vld [vmem:[#allocation7 + $0x18] sm:$0xff] }
 0x151   :  { %5035 = vmatprep.subr.bf16.mxu1 %v5826_v0  ;;  %4143 = vmatprep.mubr.msk.f32.mxu1 %vm5828_vm0, %v5827_v1 }
 0x153   :  { %5011 = vmatpush1.bf16.msra.mxu0 %v5910_v21  ;;  %v113_v21 = vld [vmem:[#allocation7 + $0x38] sm:$0xff] }
 0x154   :  { %5013 = vmatprep.subr.bf16.mxu0 %v5913_v23  ;;  %5037 = vmatpush3.bf16.msra.mxu1 %v5921_v34  ;;  %v116_v23 = vld [vmem:[#allocation7 + $0x50] sm:$0xff]  ;;  %v3425_v34 = vld [vmem:[%s6880_s0 + $0x48] sm:$0xff] }
 0x155   :  { %5038 = vmatprep.subr.bf16.mxu1 %v5826_v0  ;;  %v6330_v37 = vpack.c.bf16 %v116_v23, %v113_v21  ;;  %v149_v21 = vld [vmem:[#allocation7 + $0x158] sm:$0xff]  ;;  %v152_v23 = vld [vmem:[#allocation7 + $0x170] sm:$0xff] }
 0x157   :  { %5015 = vmatpush1.bf16.msra.mxu0 %v5918_v32 }
 0x158   :  { %5017 = vmatprep.subr.bf16.mxu0 %v5924_v35  ;;  %5040 = vmatpush3.bf16.msra.mxu1 %v5931_v43  ;;  %v6323_v35 = vpack.c.bf16 %v109_v16, %v106_v15  ;;  %v6334_v43 = vpack.c.bf16 %v115_v39, %v112_v38  ;;  %v132_v15 = vld [vmem:[#allocation7 + $0xd0] sm:$0xff]  ;;  %v135_v16 = vld [vmem:[#allocation7 + $0xe8] sm:$0xff]  ;;  %v6403_v38 = vpack.c.bf16 %v152_v23, %v149_v21 }
 0x159   :  { %5041 = vmatprep.subr.bf16.mxu1 %v5826_v0  ;;  %v6400_v36 = vpack.c.bf16 %v135_v16, %v132_v15  ;;  %v151_v39 = vld [vmem:[#allocation7 + $0x168] sm:$0xff]  ;;  %v6485_v15 = vld [vmem:[%s6885_s5] ss:$0 sm:$0xff] }
 0x15b   :  { %5019 = vmatpush1.bf16.msra.mxu0 %v5928_v41  ;;  %v122_v41 = vld [vmem:[#allocation7 + $0x80] sm:$0xff] }
 0x15c   :  { %5021 = vmatprep.subr.bf16.mxu0 %v5934_v44  ;;  %5043 = vmatpush3.bf16.msra.mxu1 %v5941_v52  ;;  %v118_v44 = vld [vmem:[#allocation7 + $0x60] sm:$0xff]  ;;  %v6341_v46 = vpack.c.bf16 %v122_v41, %v119_v40  ;;  %v141_v41 = vld [vmem:[#allocation7 + $0x118] sm:$0xff] }
 0x15d   :  { %5044 = vmatprep.subr.bf16.mxu1 %v5826_v0  ;;  %v6346_v52 = vpack.c.bf16 %v121_v47, %v118_v44  ;;  %v138_v40 = vld [vmem:[#allocation7 + $0x100] sm:$0xff]  ;;  %v147_v47 = vld [vmem:[#allocation7 + $0x148] sm:$0xff] }
 0x15e   :  { %v6410_v44 = vpack.c.bf16 %v141_v41, %v138_v40 }
 0x15f   :  { %5023 = vmatpush1.bf16.msra.mxu0 %v5938_v50  ;;  %v125_v50 = vld [vmem:[#allocation7 + $0x98] sm:$0xff] }
 0x160   :  { %5025 = vmatprep.subr.bf16.mxu0 %v5944_v53  ;;  %5046 = vmatpush3.bf16.msra.mxu1 %v5951_v61  ;;  %v124_v53 = vld [vmem:[#allocation7 + $0x90] sm:$0xff]  ;;  %v6355_v56 = vpack.c.bf16 %v128_v51, %v125_v50  ;;  %v134_v61 = vld [vmem:[#allocation7 + $0xe0] sm:$0xff]  ;;  %v6423_v51 = vpack.c.bf16 %v147_v47, %v144_v45 }
 0x161   :  { %5047 = vmatprep.subr.bf16.mxu1 %v5826_v0  ;;  %v6420_v50 = vld [vmem:[%s6882_s2] sm:$0xff] }
 0x162   :  { %v6317_v29 = vpop.f32.mrb[4].mxu1 }
 0x163   :  { %5027 = vmatpush1.bf16.msra.mxu0 %v5948_v59  ;;  %v3900_v32 = vpop.f32.mrb[5].mxu1  ;;  %v117_v59 = vld [vmem:[#allocation7 + $0x58] sm:$0xff] }
 0x164   :  { %5029 = vmatprep.subr.bf16.mxu0 %v5954_v62  ;;  %5049 = vmatpush3.bf16.msra.mxu1 %v5961_v6  ;;  %v6359_v62 = vpack.c.bf16 %v127_v57, %v124_v53  ;;  %v6362_v2 = vpack.c.bf16 %v117_v59, %v114_v58  ;;  %v133_v6 = vld [vmem:[#allocation7 + $0xd8] sm:$0xff]  ;;  %v6397_v32 = vpack.c.bf16 %v145_v9, %v142_v31  ;;  %v150_v53 = vld [vmem:[#allocation7 + $0x160] sm:$0xff] }
 0x165   :  { %5050 = vmatprep.subr.bf16.mxu1 %v5826_v0  ;;  %v6374_v13 = vpack.c.bf16 %v133_v6, %v130_v63  ;;  %v6429_v57 = vpack.c.bf16 %v153_v55, %v150_v53 }
 0x167   :  { %5031 = vmatpush1.bf16.msra.mxu0 %v5958_v4  ;;  %v6368_v4 = vpack.c.bf16 %v134_v61, %v131_v60 }
 0x168   :  { %5057 = vmatprep.subr.bf16.mxu0 %v6314_v10  ;;  %5052 = vmatpush3.bf16.msra.mxu1 %v5970_v12  ;;  %v140_v12 = vld [vmem:[#allocation7 + $0x110] sm:$0xff] }
 0x169   :  { %5053 = vmatprep.subr.bf16.mxu1 %v5826_v0  ;;  %v6383_v19 = vpack.c.bf16 %v140_v12, %v137_v11 }
 0x16a   :  { %1543 = vmatmul.mubr.f32.vlgmr.msra.gmra.mrb[18].mxu0 %v3425_v34 }
 0x16b   :  { %5059 = vmatpush1.bf16.msra.mxu0 %v6323_v35  ;;  %1692 = vmatprep.mubr.f32.mxu0 %v5827_v1 }
 0x16c   :  { %5061 = vmatprep.subr.bf16.mxu0 %v6330_v37  ;;  %5055 = vmatpush3.bf16.msra.mxu1 %v5976_v17  ;;  %v6377_v17 = vpack.c.bf16 %v123_v8, %v120_v7 }
 0x16d   :  { %5088 = vmatprep.subr.bf16.mxu1 %v5826_v0 }
 0x16f   :  { %5063 = vmatpush1.bf16.msra.mxu0 %v6334_v43  ;;  %4144 = vmatmul.mubr.f32.vlgmr.msra.gmra.mrb[18].mxu1 %v3425_v34  ;;  %v148_v34 = vld [vmem:[#allocation7 + $0x150] sm:$0xff] }
 0x170   :  { %5065 = vmatprep.subr.bf16.mxu0 %v6341_v46  ;;  %5090 = vmatpush3.bf16.msra.mxu1 %v6349_v54  ;;  %v6407_v42 = vpack.c.bf16 %v151_v39, %v148_v34 }
 0x171   :  { %5091 = vmatprep.subr.bf16.mxu1 %v5826_v0  ;;  %4178 = vmatprep.mubr.msk.f32.mxu1 %vm5828_vm0, %v5827_v1 }
 0x173   :  { %5067 = vmatpush1.bf16.msra.mxu0 %v6346_v52 }
 0x174   :  { %5069 = vmatprep.subr.bf16.mxu0 %v6355_v56  ;;  %5093 = vmatpush3.bf16.msra.mxu1 %v6362_v2 }
 0x175   :  { %5094 = vmatprep.subr.bf16.mxu1 %v5826_v0 }
 0x177   :  { %5071 = vmatpush1.bf16.msra.mxu0 %v6359_v62 }
 0x178   :  { %5073 = vmatprep.subr.bf16.mxu0 %v6368_v4  ;;  %5096 = vmatpush3.bf16.msra.mxu1 %v6377_v17 }
 0x179   :  { %5097 = vmatprep.subr.bf16.mxu1 %v5826_v0 }
 0x17b   :  { %5075 = vmatpush1.bf16.msra.mxu0 %v6374_v13 }
 0x17c   :  { %5077 = vmatprep.subr.bf16.mxu0 %v6383_v19  ;;  %5099 = vmatpush3.bf16.msra.mxu1 %v6390_v33 }
 0x17d   :  { %5100 = vmatprep.subr.bf16.mxu1 %v5826_v0 }
 0x17f   :  { %5079 = vmatpush1.bf16.msra.mxu0 %v6387_v28 }
 0x180   :  { %5081 = vmatprep.subr.bf16.mxu0 %v6393_v5  ;;  %5102 = vmatpush3.bf16.msra.mxu1 %v6400_v36 }
 0x181   :  { %5103 = vmatprep.subr.bf16.mxu1 %v5826_v0 }
 0x182   :  { %v6414_v48 = vpop.f32.mrb[6].mxu1 }
 0x183   :  { %5083 = vmatpush1.bf16.msra.mxu0 %v6397_v32  ;;  %v3935_v49 = vpop.f32.mrb[7].mxu1 }
 0x184   :  { %5085 = vmatprep.subr.bf16.mxu0 %v6403_v38  ;;  %5105 = vmatpush3.bf16.msra.mxu1 %v6410_v44 }
 0x185   :  { %5106 = vmatprep.subr.bf16.mxu1 %v5826_v0 }
 0x187   :  { %5087 = vmatpush1.bf16.msra.mxu0 %v6407_v42 }
 0x188   :  { %5113 = vmatprep.subr.bf16.mxu0 %v6314_v10  ;;  %5108 = vmatpush3.bf16.msra.mxu1 %v6423_v51 }
 0x189   :  { %5109 = vmatprep.subr.bf16.mxu1 %v5826_v0 }
 0x18a   :  { %1693 = vmatmul.mubr.f32.vlgmr.msra.gmra.mrb[0].mxu0 %v6420_v50 }
 0x18b   :  { %5115 = vmatpush1.bf16.msra.mxu0 %v6323_v35  ;;  %1874 = vmatprep.mubr.f32.mxu0 %v5827_v1 }
 0x18c   :  { %5117 = vmatprep.subr.bf16.mxu0 %v6330_v37  ;;  %5111 = vmatpush3.bf16.msra.mxu1 %v6429_v57 }
 0x18d   :  { %5144 = vmatprep.subr.bf16.mxu1 %v5826_v0 }
 0x18f   :  { %5119 = vmatpush1.bf16.msra.mxu0 %v6334_v43  ;;  %4179 = vmatmul.mubr.f32.vlgmr.msra.gmra.mrb[20].mxu1 %v6420_v50 }
 0x190   :  { %5121 = vmatprep.subr.bf16.mxu0 %v6341_v46  ;;  %5146 = vmatpush3.bf16.msra.mxu1 %v6349_v54 }
 0x191   :  { %5147 = vmatprep.subr.bf16.mxu1 %v5826_v0  ;;  %4213 = vmatprep.mubr.msk.f32.mxu1 %vm5828_vm0, %v5827_v1 }
 0x193   :  { %5123 = vmatpush1.bf16.msra.mxu0 %v6346_v52 }
 0x194   :  { %5125 = vmatprep.subr.bf16.mxu0 %v6355_v56  ;;  %5149 = vmatpush3.bf16.msra.mxu1 %v6362_v2 }
 0x195   :  { %5150 = vmatprep.subr.bf16.mxu1 %v5826_v0 }
 0x197   :  { %5127 = vmatpush1.bf16.msra.mxu0 %v6359_v62 }
 0x198   :  { %5129 = vmatprep.subr.bf16.mxu0 %v6368_v4  ;;  %5152 = vmatpush3.bf16.msra.mxu1 %v6377_v17 }
 0x199   :  { %5153 = vmatprep.subr.bf16.mxu1 %v5826_v0 }
 0x19b   :  { %5131 = vmatpush1.bf16.msra.mxu0 %v6374_v13 }
 0x19c   :  { %5133 = vmatprep.subr.bf16.mxu0 %v6383_v19  ;;  %5155 = vmatpush3.bf16.msra.mxu1 %v6390_v33 }
 0x19d   :  { %5156 = vmatprep.subr.bf16.mxu1 %v5826_v0 }
 0x19f   :  { %5135 = vmatpush1.bf16.msra.mxu0 %v6387_v28 }
 0x1a0   :  { %5137 = vmatprep.subr.bf16.mxu0 %v6393_v5  ;;  %5158 = vmatpush3.bf16.msra.mxu1 %v6400_v36 }
 0x1a1   :  { %5159 = vmatprep.subr.bf16.mxu1 %v5826_v0 }
 0x1a2   :  { %v6462_v58 = vpop.f32.mrb[8].mxu1 }
 0x1a3   :  { %5139 = vmatpush1.bf16.msra.mxu0 %v6397_v32  ;;  %v3970_v59 = vpop.f32.mrb[9].mxu1 }
 0x1a4   :  { %5141 = vmatprep.subr.bf16.mxu0 %v6403_v38  ;;  %5161 = vmatpush3.bf16.msra.mxu1 %v6410_v44  ;;  %v1800_v59 = vpop.permute.xlu0 %1799 }
 0x1a5   :  { %5162 = vmatprep.subr.bf16.mxu1 %v5826_v0 }
 0x1a7   :  { %5143 = vmatpush1.bf16.msra.mxu0 %v6407_v42 }
 0x1a8   :  { %5169 = vmatprep.subr.bf16.mxu0 %v6314_v10  ;;  %5164 = vmatpush3.bf16.msra.mxu1 %v6423_v51 }
 0x1a9   :  { %5165 = vmatprep.subr.bf16.mxu1 %v5826_v0 }
 0x1ac   :  { %5167 = vmatpush3.bf16.msra.mxu1 %v6429_v57 }
 0x1ad   :  { %5200 = vmatprep.subr.bf16.mxu1 %v5826_v0 }
 0x1c2   :  { %v6472_v60 = vpop.f32.mrb[10].mxu1 }
 0x1c3   :  { %v4005_v61 = vpop.f32.mrb[11].mxu1 }
 0x1e2   :  { %v6474_v63 = vpop.f32.mrb[12].mxu1 }
 0x1e3   :  { %v4040_v3 = vpop.f32.mrb[13].mxu1 }
 0x202   :  { %v6476_v6 = vpop.f32.mrb[14].mxu1 }
 0x203   :  { %v4075_v7 = vpop.f32.mrb[15].mxu1 }
 0x204   :  { %v3441_v7 = vld [vmem:[%s6881_s1 + $0x28] sm:$0xff] }
 0x222   :  { %v6478_v8 = vpop.f32.mrb[16].mxu1 }
 0x223   :  { %v4110_v11 = vpop.f32.mrb[17].mxu1 }
 0x224   :  { %v3447_v11 = vld [vmem:[%s6881_s1 + $0x38] sm:$0xff] }
 0x242   :  { %v6480_v12 = vpop.f32.mrb[18].mxu1 }
 0x243   :  { %v4145_v14 = vpop.f32.mrb[19].mxu1 }
 0x244   :  { %v3453_v14 = vld [vmem:[%s6881_s1 + $0x48] sm:$0xff] }
 0x25d   :  { %v1694_v18 = vpop.f32.mrb[0].mxu0 }
 0x25e   :  { %v3426_v20 = vmul.f32 -1.442695, %v1694_v18  ;;  %v1696_v22 = vpop.f32.mrb[1].mxu0 }
 0x25f   :  { %v3427_v27 = vmul.f32 -1.442695, %v1696_v22 }
 0x260   :  { %5649 = vpow2.f32 %v3426_v20 }
 0x261   :  { %5651 = vpow2.f32 %v3427_v27 }
 0x262   :  { %v1765_v24 = vpop.f32.mrb[20].mxu1 }
 0x263   :  { %v4180_v25 = vpop.f32.mrb[21].mxu1  ;;  %v1789_v16 = vadd.f32 %v6485_v15, %v1765_v24 }
 0x26a   :  { %v5650_v31 = vpop.eup %5649 }
 0x26b   :  { %v1773_v9 = vadd.f32 1.0, %v5650_v31  ;;  %v5652_v21 = vpop.eup %5651 }
 0x26c   :  { %v1780_v39 = vadd.f32 1.0, %v5652_v21 }
 0x26d   :  { %5653 = vrcp.f32 %v1773_v9 }
 0x277   :  { %v5654_v23 = vpop.eup %5653 }
 0x278   :  { %v1790_v34 = vmul.f32 %v5654_v23, %v1789_v16 }
 0x27a   :  { %v1791_v40 = vadd.f32 %v1790_v34, %v6235_v26  ;;  %v3432_v26 = vld [vmem:[%s6881_s1 + $0x10] sm:$0xff] }
 0x27b   :  { %2152 = vperm.xlu1 %5648, %v3432_v26  }
 0x27c   :  { %5655 = vtanh.f32 %v1791_v40 }
 0x27d   :  { %5657 = vrcp.f32 %v1780_v39 }
 0x286   :  { %v5656_v41 = vpop.eup %5655 }
 0x287   :  { %v1793_v45 = vsub.f32 %v6420_v50, %v5656_v41  ;;  %v5658_v47 = vpop.eup %5657 }
 0x289   :  { %v1794_v49 = vmul.f32 %v5658_v47, %v1793_v45 }
 0x28b   :  { %v1795_v53 = vadd.f32 %v5656_v41, %v1794_v49 }
 0x28d   :  { %v1796_v55 = vsub.f32 %v1795_v53, %v6420_v50 }
 0x28f   :  { %v1802_v61 = vmul.f32 %v1800_v59, %v1796_v55  ;;  %v1976_v59 = vpop.permute.xlu0 %1975 }
 0x291   :  { %v6492_v3 = vadd.f32 %v1802_v61, %v6420_v50  ;;  %v3435_v50 = vld [vmem:[%s6881_s1 + $0x18] sm:$0xff] }
 0x292   :  { %2329 = vperm.xlu1 %5648, %v3435_v50  }
 0x293   :  { %1804 = vst [vmem:[#allocation9] sm:$0xff] %v6492_v3  ;;  %1875 = vmatmul.mubr.f32.vlgmr.msra.gmra.mrb[2].mxu0 %v6492_v3  ;;  %4214 = vmatmul.mubr.f32.vlgmr.msra.gmra.mrb[22].mxu1 %v6492_v3 }
 0x294   :  { %5171 = vmatpush1.bf16.msra.mxu0 %v6323_v35  ;;  %5202 = vmatpush3.bf16.msra.mxu1 %v6349_v54 }
 0x295   :  { %5173 = vmatprep.subr.bf16.mxu0 %v6330_v37  ;;  %5203 = vmatprep.subr.bf16.mxu1 %v5826_v0 }
 0x296   :  { %2051 = vmatprep.mubr.f32.mxu0 %v5827_v1  ;;  %4248 = vmatprep.mubr.msk.f32.mxu1 %vm5828_vm0, %v5827_v1 }
 0x297   :  { %2683 = vperm.xlu1 %5648, %v3441_v7  }
 0x298   :  { %5175 = vmatpush1.bf16.msra.mxu0 %v6334_v43  ;;  %5205 = vmatpush3.bf16.msra.mxu1 %v6362_v2 }
 0x299   :  { %5177 = vmatprep.subr.bf16.mxu0 %v6341_v46  ;;  %5206 = vmatprep.subr.bf16.mxu1 %v5826_v0 }
 0x29b   :  { %3037 = vperm.xlu1 %5648, %v3447_v11  }
 0x29c   :  { %5179 = vmatpush1.bf16.msra.mxu0 %v6346_v52  ;;  %5208 = vmatpush3.bf16.msra.mxu1 %v6377_v17 }
 0x29d   :  { %5181 = vmatprep.subr.bf16.mxu0 %v6355_v56  ;;  %5209 = vmatprep.subr.bf16.mxu1 %v5826_v0 }
 0x29f   :  { %3391 = vperm.xlu1 %5648, %v3453_v14  }
 0x2a0   :  { %5183 = vmatpush1.bf16.msra.mxu0 %v6359_v62  ;;  %5211 = vmatpush3.bf16.msra.mxu1 %v6390_v33 }
 0x2a1   :  { %5185 = vmatprep.subr.bf16.mxu0 %v6368_v4  ;;  %5212 = vmatprep.subr.bf16.mxu1 %v5826_v0 }
 0x2a4   :  { %5187 = vmatpush1.bf16.msra.mxu0 %v6374_v13  ;;  %5214 = vmatpush3.bf16.msra.mxu1 %v6400_v36 }
 0x2a5   :  { %5189 = vmatprep.subr.bf16.mxu0 %v6383_v19  ;;  %5215 = vmatprep.subr.bf16.mxu1 %v5826_v0 }
 0x2a8   :  { %5191 = vmatpush1.bf16.msra.mxu0 %v6387_v28  ;;  %5217 = vmatpush3.bf16.msra.mxu1 %v6410_v44 }
 0x2a9   :  { %5193 = vmatprep.subr.bf16.mxu0 %v6393_v5  ;;  %5218 = vmatprep.subr.bf16.mxu1 %v5826_v0 }
 0x2ac   :  { %5195 = vmatpush1.bf16.msra.mxu0 %v6397_v32  ;;  %5220 = vmatpush3.bf16.msra.mxu1 %v6423_v51 }
 0x2ad   :  { %5197 = vmatprep.subr.bf16.mxu0 %v6403_v38  ;;  %5221 = vmatprep.subr.bf16.mxu1 %v5826_v0 }
 0x2b0   :  { %5199 = vmatpush1.bf16.msra.mxu0 %v6407_v42  ;;  %5223 = vmatpush3.bf16.msra.mxu1 %v6429_v57 }
 0x2b1   :  { %5225 = vmatprep.subr.bf16.mxu0 %v6314_v10  ;;  %5256 = vmatprep.subr.bf16.mxu1 %v5826_v0 }
 0x366   :  { %v1876_v18 = vpop.f32.mrb[2].mxu0  ;;  %v1947_v20 = vpop.f32.mrb[22].mxu1 }
 0x367   :  { %v3430_v22 = vmul.f32 -1.442695, %v1876_v18  ;;  %v1878_v24 = vpop.f32.mrb[3].mxu0  ;;  %v4215_v25 = vpop.f32.mrb[23].mxu1  ;;  %v1965_v21 = vadd.f32 %v6485_v15, %v1947_v20 }
 0x368   :  { %v3431_v27 = vmul.f32 -1.442695, %v1878_v24 }
 0x369   :  { %5659 = vpow2.f32 %v3430_v22 }
 0x36a   :  { %5661 = vpow2.f32 %v3431_v27 }
 0x373   :  { %v5660_v31 = vpop.eup %5659 }
 0x374   :  { %v1955_v9 = vadd.f32 1.0, %v5660_v31  ;;  %v5662_v16 = vpop.eup %5661 }
 0x375   :  { %v1962_v40 = vadd.f32 1.0, %v5662_v16 }
 0x376   :  { %5663 = vrcp.f32 %v1955_v9 }
 0x380   :  { %v5664_v23 = vpop.eup %5663 }
 0x381   :  { %v1966_v34 = vmul.f32 %v5664_v23, %v1965_v21 }
 0x383   :  { %v1967_v39 = vadd.f32 %v1966_v34, %v6275_v30 }
 0x385   :  { %5665 = vtanh.f32 %v1967_v39 }
 0x386   :  { %5667 = vrcp.f32 %v1962_v40 }
 0x38f   :  { %v5666_v41 = vpop.eup %5665 }
 0x390   :  { %v1969_v45 = vsub.f32 %v6492_v3, %v5666_v41  ;;  %v5668_v47 = vpop.eup %5667 }
 0x392   :  { %v1970_v49 = vmul.f32 %v5668_v47, %v1969_v45 }
 0x394   :  { %v1971_v53 = vadd.f32 %v5666_v41, %v1970_v49  ;;  %v2153_v41 = vpop.permute.xlu1 %2152 }
 0x396   :  { %v1972_v55 = vsub.f32 %v1971_v53, %v6492_v3 }
 0x398   :  { %v1978_v61 = vmul.f32 %v1976_v59, %v1972_v55 }
 0x39a   :  { %v6552_v26 = vadd.f32 %v1978_v61, %v6492_v3 }
 0x39c   :  { %1981 = vst [vmem:[#allocation9 + $0x8] sm:$0xff] %v6552_v26  ;;  %2052 = vmatmul.mubr.f32.vlgmr.msra.gmra.mrb[4].mxu0 %v6552_v26  ;;  %4249 = vmatmul.mubr.f32.vlgmr.msra.gmra.mrb[24].mxu1 %v6552_v26 }
 0x39d   :  { %5227 = vmatpush1.bf16.msra.mxu0 %v6323_v35  ;;  %5258 = vmatpush3.bf16.msra.mxu1 %v6349_v54 }
 0x39e   :  { %5229 = vmatprep.subr.bf16.mxu0 %v6330_v37  ;;  %5259 = vmatprep.subr.bf16.mxu1 %v5826_v0 }
 0x39f   :  { %2228 = vmatprep.mubr.f32.mxu0 %v5827_v1  ;;  %4283 = vmatprep.mubr.msk.f32.mxu1 %vm5828_vm0, %v5827_v1 }
 0x3a1   :  { %5231 = vmatpush1.bf16.msra.mxu0 %v6334_v43  ;;  %5261 = vmatpush3.bf16.msra.mxu1 %v6362_v2 }
 0x3a2   :  { %5233 = vmatprep.subr.bf16.mxu0 %v6341_v46  ;;  %5262 = vmatprep.subr.bf16.mxu1 %v5826_v0 }
 0x3a5   :  { %5235 = vmatpush1.bf16.msra.mxu0 %v6346_v52  ;;  %5264 = vmatpush3.bf16.msra.mxu1 %v6377_v17 }
 0x3a6   :  { %5237 = vmatprep.subr.bf16.mxu0 %v6355_v56  ;;  %5265 = vmatprep.subr.bf16.mxu1 %v5826_v0 }
 0x3a9   :  { %5239 = vmatpush1.bf16.msra.mxu0 %v6359_v62  ;;  %5267 = vmatpush3.bf16.msra.mxu1 %v6390_v33 }
 0x3aa   :  { %5241 = vmatprep.subr.bf16.mxu0 %v6368_v4  ;;  %5268 = vmatprep.subr.bf16.mxu1 %v5826_v0 }
 0x3ad   :  { %5243 = vmatpush1.bf16.msra.mxu0 %v6374_v13  ;;  %5270 = vmatpush3.bf16.msra.mxu1 %v6400_v36 }
 0x3ae   :  { %5245 = vmatprep.subr.bf16.mxu0 %v6383_v19  ;;  %5271 = vmatprep.subr.bf16.mxu1 %v5826_v0 }
 0x3b1   :  { %5247 = vmatpush1.bf16.msra.mxu0 %v6387_v28  ;;  %5273 = vmatpush3.bf16.msra.mxu1 %v6410_v44 }
 0x3b2   :  { %5249 = vmatprep.subr.bf16.mxu0 %v6393_v5  ;;  %5274 = vmatprep.subr.bf16.mxu1 %v5826_v0 }
 0x3b5   :  { %5251 = vmatpush1.bf16.msra.mxu0 %v6397_v32  ;;  %5276 = vmatpush3.bf16.msra.mxu1 %v6423_v51 }
 0x3b6   :  { %5253 = vmatprep.subr.bf16.mxu0 %v6403_v38  ;;  %5277 = vmatprep.subr.bf16.mxu1 %v5826_v0 }
 0x3b9   :  { %5255 = vmatpush1.bf16.msra.mxu0 %v6407_v42  ;;  %5279 = vmatpush3.bf16.msra.mxu1 %v6429_v57 }
 0x3ba   :  { %5281 = vmatprep.subr.bf16.mxu0 %v6314_v10  ;;  %5312 = vmatprep.subr.bf16.mxu1 %v5826_v0 }
 0x46f   :  { %v2053_v30 = vpop.f32.mrb[4].mxu0  ;;  %v2124_v3 = vpop.f32.mrb[24].mxu1 }
 0x470   :  { %v3433_v50 = vmul.f32 -1.442695, %v2053_v30  ;;  %v2055_v7 = vpop.f32.mrb[5].mxu0  ;;  %v4250_v11 = vpop.f32.mrb[25].mxu1  ;;  %v2142_v24 = vadd.f32 %v6485_v15, %v2124_v3 }
 0x471   :  { %v3434_v14 = vmul.f32 -1.442695, %v2055_v7 }
 0x472   :  { %5669 = vpow2.f32 %v3433_v50 }
 0x473   :  { %5671 = vpow2.f32 %v3434_v14 }
 0x47c   :  { %v5670_v18 = vpop.eup %5669 }
 0x47d   :  { %v2132_v20 = vadd.f32 1.0, %v5670_v18  ;;  %v5672_v22 = vpop.eup %5671 }
 0x47e   :  { %v2139_v9 = vadd.f32 1.0, %v5672_v22 }
 0x47f   :  { %5673 = vrcp.f32 %v2132_v20 }
 0x489   :  { %v5674_v25 = vpop.eup %5673 }
 0x48a   :  { %v2143_v27 = vmul.f32 %v5674_v25, %v2142_v24 }
 0x48c   :  { %v2144_v31 = vadd.f32 %v2143_v27, %v6317_v29 }
 0x48e   :  { %5675 = vtanh.f32 %v2144_v31 }
 0x48f   :  { %5677 = vrcp.f32 %v2139_v9  ;;  %v2330_v9 = vpop.permute.xlu1 %2329 }
 0x498   :  { %v5676_v16 = vpop.eup %5675 }
 0x499   :  { %v2146_v21 = vsub.f32 %v6552_v26, %v5676_v16  ;;  %v5678_v23 = vpop.eup %5677 }
 0x49b   :  { %v2147_v34 = vmul.f32 %v5678_v23, %v2146_v21 }
 0x49d   :  { %v2148_v39 = vadd.f32 %v5676_v16, %v2147_v34 }
 0x49f   :  { %v2149_v40 = vsub.f32 %v2148_v39, %v6552_v26 }
 0x4a1   :  { %v2155_v45 = vmul.f32 %v2153_v41, %v2149_v40 }
 0x4a3   :  { %v6597_v47 = vadd.f32 %v2155_v45, %v6552_v26 }
 0x4a5   :  { %2158 = vst [vmem:[#allocation9 + $0x10] sm:$0xff] %v6597_v47  ;;  %2229 = vmatmul.mubr.f32.vlgmr.msra.gmra.mrb[6].mxu0 %v6597_v47  ;;  %4284 = vmatmul.mubr.f32.vlgmr.msra.gmra.mrb[26].mxu1 %v6597_v47 }
 0x4a6   :  { %5283 = vmatpush1.bf16.msra.mxu0 %v6323_v35  ;;  %5314 = vmatpush3.bf16.msra.mxu1 %v6349_v54 }
 0x4a7   :  { %5285 = vmatprep.subr.bf16.mxu0 %v6330_v37  ;;  %5315 = vmatprep.subr.bf16.mxu1 %v5826_v0 }
 0x4a8   :  { %2405 = vmatprep.mubr.f32.mxu0 %v5827_v1  ;;  %4318 = vmatprep.mubr.msk.f32.mxu1 %vm5828_vm0, %v5827_v1 }
 0x4aa   :  { %5287 = vmatpush1.bf16.msra.mxu0 %v6334_v43  ;;  %5317 = vmatpush3.bf16.msra.mxu1 %v6362_v2 }
 0x4ab   :  { %5289 = vmatprep.subr.bf16.mxu0 %v6341_v46  ;;  %5318 = vmatprep.subr.bf16.mxu1 %v5826_v0 }
 0x4ae   :  { %5291 = vmatpush1.bf16.msra.mxu0 %v6346_v52  ;;  %5320 = vmatpush3.bf16.msra.mxu1 %v6377_v17 }
 0x4af   :  { %5293 = vmatprep.subr.bf16.mxu0 %v6355_v56  ;;  %5321 = vmatprep.subr.bf16.mxu1 %v5826_v0 }
 0x4b2   :  { %5295 = vmatpush1.bf16.msra.mxu0 %v6359_v62  ;;  %5323 = vmatpush3.bf16.msra.mxu1 %v6390_v33 }
 0x4b3   :  { %5297 = vmatprep.subr.bf16.mxu0 %v6368_v4  ;;  %5324 = vmatprep.subr.bf16.mxu1 %v5826_v0 }
 0x4b6   :  { %5299 = vmatpush1.bf16.msra.mxu0 %v6374_v13  ;;  %5326 = vmatpush3.bf16.msra.mxu1 %v6400_v36 }
 0x4b7   :  { %5301 = vmatprep.subr.bf16.mxu0 %v6383_v19  ;;  %5327 = vmatprep.subr.bf16.mxu1 %v5826_v0 }
 0x4ba   :  { %5303 = vmatpush1.bf16.msra.mxu0 %v6387_v28  ;;  %5329 = vmatpush3.bf16.msra.mxu1 %v6410_v44 }
 0x4bb   :  { %5305 = vmatprep.subr.bf16.mxu0 %v6393_v5  ;;  %5330 = vmatprep.subr.bf16.mxu1 %v5826_v0 }
 0x4be   :  { %5307 = vmatpush1.bf16.msra.mxu0 %v6397_v32  ;;  %5332 = vmatpush3.bf16.msra.mxu1 %v6423_v51 }
 0x4bf   :  { %5309 = vmatprep.subr.bf16.mxu0 %v6403_v38  ;;  %5333 = vmatprep.subr.bf16.mxu1 %v5826_v0 }
 0x4c2   :  { %5311 = vmatpush1.bf16.msra.mxu0 %v6407_v42  ;;  %5335 = vmatpush3.bf16.msra.mxu1 %v6429_v57 }
 0x4c3   :  { %5337 = vmatprep.subr.bf16.mxu0 %v6314_v10  ;;  %5368 = vmatprep.subr.bf16.mxu1 %v5826_v0 }
 0x578   :  { %v2230_v29 = vpop.f32.mrb[6].mxu0  ;;  %v2301_v49 = vpop.f32.mrb[26].mxu1 }
 0x579   :  { %v3436_v53 = vmul.f32 -1.442695, %v2230_v29  ;;  %v2232_v55 = vpop.f32.mrb[7].mxu0  ;;  %v4285_v59 = vpop.f32.mrb[27].mxu1  ;;  %v2319_v50 = vadd.f32 %v6485_v15, %v2301_v49 }
 0x57a   :  { %v3437_v61 = vmul.f32 -1.442695, %v2232_v55 }
 0x57b   :  { %5679 = vpow2.f32 %v3436_v53 }
 0x57c   :  { %5681 = vpow2.f32 %v3437_v61 }
 0x585   :  { %v5680_v26 = vpop.eup %5679 }
 0x586   :  { %v2309_v30 = vadd.f32 1.0, %v5680_v26  ;;  %v5682_v3 = vpop.eup %5681 }
 0x587   :  { %v2316_v18 = vadd.f32 1.0, %v5682_v3 }
 0x588   :  { %5683 = vrcp.f32 %v2309_v30 }
 0x592   :  { %v5684_v7 = vpop.eup %5683 }
 0x593   :  { %v2320_v11 = vmul.f32 %v5684_v7, %v2319_v50 }
 0x595   :  { %v2321_v14 = vadd.f32 %v2320_v11, %v6414_v48 }
 0x597   :  { %5685 = vtanh.f32 %v2321_v14  ;;  %v2507_v14 = vpop.permute.xlu0 %2506 }
 0x598   :  { %5687 = vrcp.f32 %v2316_v18 }
 0x5a1   :  { %v5686_v20 = vpop.eup %5685 }
 0x5a2   :  { %v2323_v22 = vsub.f32 %v6597_v47, %v5686_v20  ;;  %v5688_v24 = vpop.eup %5687 }
 0x5a4   :  { %v2324_v25 = vmul.f32 %v5688_v24, %v2323_v22 }
 0x5a6   :  { %v2325_v27 = vadd.f32 %v5686_v20, %v2324_v25 }
 0x5a8   :  { %v2326_v31 = vsub.f32 %v2325_v27, %v6597_v47 }
 0x5aa   :  { %v2332_v16 = vmul.f32 %v2330_v9, %v2326_v31 }
 0x5ac   :  { %v6642_v21 = vadd.f32 %v2332_v16, %v6597_v47 }
 0x5ae   :  { %2335 = vst [vmem:[#allocation9 + $0x18] sm:$0xff] %v6642_v21  ;;  %2406 = vmatmul.mubr.f32.vlgmr.msra.gmra.mrb[8].mxu0 %v6642_v21  ;;  %4319 = vmatmul.mubr.f32.vlgmr.msra.gmra.mrb[28].mxu1 %v6642_v21 }
 0x5af   :  { %5339 = vmatpush1.bf16.msra.mxu0 %v6323_v35  ;;  %5370 = vmatpush3.bf16.msra.mxu1 %v6349_v54 }
 0x5b0   :  { %5341 = vmatprep.subr.bf16.mxu0 %v6330_v37  ;;  %5371 = vmatprep.subr.bf16.mxu1 %v5826_v0 }
 0x5b1   :  { %2582 = vmatprep.mubr.f32.mxu0 %v5827_v1  ;;  %4353 = vmatprep.mubr.msk.f32.mxu1 %vm5828_vm0, %v5827_v1 }
 0x5b3   :  { %5343 = vmatpush1.bf16.msra.mxu0 %v6334_v43  ;;  %5373 = vmatpush3.bf16.msra.mxu1 %v6362_v2 }
 0x5b4   :  { %5345 = vmatprep.subr.bf16.mxu0 %v6341_v46  ;;  %5374 = vmatprep.subr.bf16.mxu1 %v5826_v0 }
 0x5b7   :  { %5347 = vmatpush1.bf16.msra.mxu0 %v6346_v52  ;;  %5376 = vmatpush3.bf16.msra.mxu1 %v6377_v17 }
 0x5b8   :  { %5349 = vmatprep.subr.bf16.mxu0 %v6355_v56  ;;  %5377 = vmatprep.subr.bf16.mxu1 %v5826_v0 }
 0x5bb   :  { %5351 = vmatpush1.bf16.msra.mxu0 %v6359_v62  ;;  %5379 = vmatpush3.bf16.msra.mxu1 %v6390_v33 }
 0x5bc   :  { %5353 = vmatprep.subr.bf16.mxu0 %v6368_v4  ;;  %5380 = vmatprep.subr.bf16.mxu1 %v5826_v0 }
 0x5bf   :  { %5355 = vmatpush1.bf16.msra.mxu0 %v6374_v13  ;;  %5382 = vmatpush3.bf16.msra.mxu1 %v6400_v36 }
 0x5c0   :  { %5357 = vmatprep.subr.bf16.mxu0 %v6383_v19  ;;  %5383 = vmatprep.subr.bf16.mxu1 %v5826_v0 }
 0x5c3   :  { %5359 = vmatpush1.bf16.msra.mxu0 %v6387_v28  ;;  %5385 = vmatpush3.bf16.msra.mxu1 %v6410_v44 }
 0x5c4   :  { %5361 = vmatprep.subr.bf16.mxu0 %v6393_v5  ;;  %5386 = vmatprep.subr.bf16.mxu1 %v5826_v0 }
 0x5c7   :  { %5363 = vmatpush1.bf16.msra.mxu0 %v6397_v32  ;;  %5388 = vmatpush3.bf16.msra.mxu1 %v6423_v51 }
 0x5c8   :  { %5365 = vmatprep.subr.bf16.mxu0 %v6403_v38  ;;  %5389 = vmatprep.subr.bf16.mxu1 %v5826_v0 }
 0x5cb   :  { %5367 = vmatpush1.bf16.msra.mxu0 %v6407_v42  ;;  %5391 = vmatpush3.bf16.msra.mxu1 %v6429_v57 }
 0x5cc   :  { %5393 = vmatprep.subr.bf16.mxu0 %v6314_v10  ;;  %5424 = vmatprep.subr.bf16.mxu1 %v5826_v0 }
 0x681   :  { %v2407_v48 = vpop.f32.mrb[8].mxu0  ;;  %v2478_v23 = vpop.f32.mrb[28].mxu1 }
 0x682   :  { %v3439_v34 = vmul.f32 -1.442695, %v2407_v48  ;;  %v2409_v39 = vpop.f32.mrb[9].mxu0  ;;  %v4320_v40 = vpop.f32.mrb[29].mxu1  ;;  %v2496_v49 = vadd.f32 %v6485_v15, %v2478_v23 }
 0x683   :  { %v3440_v41 = vmul.f32 -1.442695, %v2409_v39 }
 0x684   :  { %5689 = vpow2.f32 %v3439_v34 }
 0x685   :  { %5691 = vpow2.f32 %v3440_v41 }
 0x68e   :  { %v5690_v45 = vpop.eup %5689 }
 0x68f   :  { %v2486_v47 = vadd.f32 1.0, %v5690_v45  ;;  %v5692_v29 = vpop.eup %5691 }
 0x690   :  { %v2493_v61 = vadd.f32 1.0, %v5692_v29 }
 0x691   :  { %5693 = vrcp.f32 %v2486_v47 }
 0x69b   :  { %v5694_v53 = vpop.eup %5693 }
 0x69c   :  { %v2497_v55 = vmul.f32 %v5694_v53, %v2496_v49 }
 0x69e   :  { %v2498_v59 = vadd.f32 %v2497_v55, %v6462_v58  ;;  %v2684_v55 = vpop.permute.xlu1 %2683 }
 0x6a0   :  { %5695 = vtanh.f32 %v2498_v59 }
 0x6a1   :  { %5697 = vrcp.f32 %v2493_v61 }
 0x6aa   :  { %v5696_v26 = vpop.eup %5695 }
 0x6ab   :  { %v2500_v30 = vsub.f32 %v6642_v21, %v5696_v26  ;;  %v5698_v3 = vpop.eup %5697 }
 0x6ad   :  { %v2501_v50 = vmul.f32 %v5698_v3, %v2500_v30 }
 0x6af   :  { %v2502_v7 = vadd.f32 %v5696_v26, %v2501_v50 }
 0x6b1   :  { %v2503_v11 = vsub.f32 %v2502_v7, %v6642_v21 }
 0x6b3   :  { %v2509_v18 = vmul.f32 %v2507_v14, %v2503_v11 }
 0x6b5   :  { %v6687_v20 = vadd.f32 %v2509_v18, %v6642_v21 }
 0x6b7   :  { %2512 = vst [vmem:[#allocation9 + $0x20] sm:$0xff] %v6687_v20  ;;  %2583 = vmatmul.mubr.f32.vlgmr.msra.gmra.mrb[10].mxu0 %v6687_v20  ;;  %4354 = vmatmul.mubr.f32.vlgmr.msra.gmra.mrb[30].mxu1 %v6687_v20 }
 0x6b8   :  { %5395 = vmatpush1.bf16.msra.mxu0 %v6323_v35  ;;  %5426 = vmatpush3.bf16.msra.mxu1 %v6349_v54 }
 0x6b9   :  { %5397 = vmatprep.subr.bf16.mxu0 %v6330_v37  ;;  %5427 = vmatprep.subr.bf16.mxu1 %v5826_v0 }
 0x6ba   :  { %2759 = vmatprep.mubr.f32.mxu0 %v5827_v1  ;;  %4388 = vmatprep.mubr.msk.f32.mxu1 %vm5828_vm0, %v5827_v1 }
 0x6bc   :  { %5399 = vmatpush1.bf16.msra.mxu0 %v6334_v43  ;;  %5429 = vmatpush3.bf16.msra.mxu1 %v6362_v2 }
 0x6bd   :  { %5401 = vmatprep.subr.bf16.mxu0 %v6341_v46  ;;  %5430 = vmatprep.subr.bf16.mxu1 %v5826_v0 }
 0x6c0   :  { %5403 = vmatpush1.bf16.msra.mxu0 %v6346_v52  ;;  %5432 = vmatpush3.bf16.msra.mxu1 %v6377_v17 }
 0x6c1   :  { %5405 = vmatprep.subr.bf16.mxu0 %v6355_v56  ;;  %5433 = vmatprep.subr.bf16.mxu1 %v5826_v0 }
 0x6c4   :  { %5407 = vmatpush1.bf16.msra.mxu0 %v6359_v62  ;;  %5435 = vmatpush3.bf16.msra.mxu1 %v6390_v33 }
 0x6c5   :  { %5409 = vmatprep.subr.bf16.mxu0 %v6368_v4  ;;  %5436 = vmatprep.subr.bf16.mxu1 %v5826_v0 }
 0x6c8   :  { %5411 = vmatpush1.bf16.msra.mxu0 %v6374_v13  ;;  %5438 = vmatpush3.bf16.msra.mxu1 %v6400_v36 }
 0x6c9   :  { %5413 = vmatprep.subr.bf16.mxu0 %v6383_v19  ;;  %5439 = vmatprep.subr.bf16.mxu1 %v5826_v0 }
 0x6cc   :  { %5415 = vmatpush1.bf16.msra.mxu0 %v6387_v28  ;;  %5441 = vmatpush3.bf16.msra.mxu1 %v6410_v44 }
 0x6cd   :  { %5417 = vmatprep.subr.bf16.mxu0 %v6393_v5  ;;  %5442 = vmatprep.subr.bf16.mxu1 %v5826_v0 }
 0x6d0   :  { %5419 = vmatpush1.bf16.msra.mxu0 %v6397_v32  ;;  %5444 = vmatpush3.bf16.msra.mxu1 %v6423_v51 }
 0x6d1   :  { %5421 = vmatprep.subr.bf16.mxu0 %v6403_v38  ;;  %5445 = vmatprep.subr.bf16.mxu1 %v5826_v0 }
 0x6d4   :  { %5423 = vmatpush1.bf16.msra.mxu0 %v6407_v42  ;;  %5447 = vmatpush3.bf16.msra.mxu1 %v6429_v57 }
 0x6d5   :  { %5449 = vmatprep.subr.bf16.mxu0 %v6314_v10  ;;  %5480 = vmatprep.subr.bf16.mxu1 %v5826_v0 }
 0x78a   :  { %v2584_v58 = vpop.f32.mrb[10].mxu0  ;;  %v2655_v22 = vpop.f32.mrb[30].mxu1 }
 0x78b   :  { %v3442_v24 = vmul.f32 -1.442695, %v2584_v58  ;;  %v2586_v25 = vpop.f32.mrb[11].mxu0  ;;  %v4355_v27 = vpop.f32.mrb[31].mxu1  ;;  %v2673_v48 = vadd.f32 %v6485_v15, %v2655_v22 }
 0x78c   :  { %v3443_v31 = vmul.f32 -1.442695, %v2586_v25 }
 0x78d   :  { %5699 = vpow2.f32 %v3442_v24 }
 0x78e   :  { %5701 = vpow2.f32 %v3443_v31 }
 0x797   :  { %v5700_v9 = vpop.eup %5699 }
 0x798   :  { %v2663_v16 = vadd.f32 1.0, %v5700_v9  ;;  %v5702_v21 = vpop.eup %5701 }
 0x799   :  { %v2670_v40 = vadd.f32 1.0, %v5702_v21 }
 0x79a   :  { %5703 = vrcp.f32 %v2663_v16 }
 0x7a4   :  { %v5704_v23 = vpop.eup %5703 }
 0x7a5   :  { %v2674_v34 = vmul.f32 %v5704_v23, %v2673_v48  ;;  %v2861_v23 = vpop.permute.xlu0 %2860 }
 0x7a7   :  { %v2675_v39 = vadd.f32 %v2674_v34, %v6472_v60 }
 0x7a9   :  { %5705 = vtanh.f32 %v2675_v39 }
 0x7aa   :  { %5707 = vrcp.f32 %v2670_v40 }
 0x7b3   :  { %v5706_v41 = vpop.eup %5705 }
 0x7b4   :  { %v2677_v45 = vsub.f32 %v6687_v20, %v5706_v41  ;;  %v5708_v47 = vpop.eup %5707 }
 0x7b6   :  { %v2678_v29 = vmul.f32 %v5708_v47, %v2677_v45 }
 0x7b8   :  { %v2679_v49 = vadd.f32 %v5706_v41, %v2678_v29 }
 0x7ba   :  { %v2680_v53 = vsub.f32 %v2679_v49, %v6687_v20 }
 0x7bc   :  { %v2686_v59 = vmul.f32 %v2684_v55, %v2680_v53 }
 0x7be   :  { %v6732_v61 = vadd.f32 %v2686_v59, %v6687_v20 }
 0x7c0   :  { %2689 = vst [vmem:[#allocation9 + $0x28] sm:$0xff] %v6732_v61  ;;  %2760 = vmatmul.mubr.f32.vlgmr.msra.gmra.mrb[12].mxu0 %v6732_v61  ;;  %4389 = vmatmul.mubr.f32.vlgmr.msra.gmra.mrb[32].mxu1 %v6732_v61 }
 0x7c1   :  { %5451 = vmatpush1.bf16.msra.mxu0 %v6323_v35  ;;  %5482 = vmatpush3.bf16.msra.mxu1 %v6349_v54 }
 0x7c2   :  { %5453 = vmatprep.subr.bf16.mxu0 %v6330_v37  ;;  %5483 = vmatprep.subr.bf16.mxu1 %v5826_v0 }
 0x7c3   :  { %2936 = vmatprep.mubr.f32.mxu0 %v5827_v1  ;;  %4423 = vmatprep.mubr.msk.f32.mxu1 %vm5828_vm0, %v5827_v1 }
 0x7c5   :  { %5455 = vmatpush1.bf16.msra.mxu0 %v6334_v43  ;;  %5485 = vmatpush3.bf16.msra.mxu1 %v6362_v2 }
 0x7c6   :  { %5457 = vmatprep.subr.bf16.mxu0 %v6341_v46  ;;  %5486 = vmatprep.subr.bf16.mxu1 %v5826_v0 }
 0x7c9   :  { %5459 = vmatpush1.bf16.msra.mxu0 %v6346_v52  ;;  %5488 = vmatpush3.bf16.msra.mxu1 %v6377_v17 }
 0x7ca   :  { %5461 = vmatprep.subr.bf16.mxu0 %v6355_v56  ;;  %5489 = vmatprep.subr.bf16.mxu1 %v5826_v0 }
 0x7cd   :  { %5463 = vmatpush1.bf16.msra.mxu0 %v6359_v62  ;;  %5491 = vmatpush3.bf16.msra.mxu1 %v6390_v33 }
 0x7ce   :  { %5465 = vmatprep.subr.bf16.mxu0 %v6368_v4  ;;  %5492 = vmatprep.subr.bf16.mxu1 %v5826_v0 }
 0x7d1   :  { %5467 = vmatpush1.bf16.msra.mxu0 %v6374_v13  ;;  %5494 = vmatpush3.bf16.msra.mxu1 %v6400_v36 }
 0x7d2   :  { %5469 = vmatprep.subr.bf16.mxu0 %v6383_v19  ;;  %5495 = vmatprep.subr.bf16.mxu1 %v5826_v0 }
 0x7d5   :  { %5471 = vmatpush1.bf16.msra.mxu0 %v6387_v28  ;;  %5497 = vmatpush3.bf16.msra.mxu1 %v6410_v44 }
 0x7d6   :  { %5473 = vmatprep.subr.bf16.mxu0 %v6393_v5  ;;  %5498 = vmatprep.subr.bf16.mxu1 %v5826_v0 }
 0x7d9   :  { %5475 = vmatpush1.bf16.msra.mxu0 %v6397_v32  ;;  %5500 = vmatpush3.bf16.msra.mxu1 %v6423_v51 }
 0x7da   :  { %5477 = vmatprep.subr.bf16.mxu0 %v6403_v38  ;;  %5501 = vmatprep.subr.bf16.mxu1 %v5826_v0 }
 0x7dd   :  { %5479 = vmatpush1.bf16.msra.mxu0 %v6407_v42  ;;  %5503 = vmatpush3.bf16.msra.mxu1 %v6429_v57 }
 0x7de   :  { %5505 = vmatprep.subr.bf16.mxu0 %v6314_v10  ;;  %5536 = vmatprep.subr.bf16.mxu1 %v5826_v0 }
 0x893   :  { %v2761_v60 = vpop.f32.mrb[12].mxu0  ;;  %v2832_v26 = vpop.f32.mrb[32].mxu1 }
 0x894   :  { %v3445_v30 = vmul.f32 -1.442695, %v2761_v60  ;;  %v2763_v3 = vpop.f32.mrb[13].mxu0  ;;  %v4390_v50 = vpop.f32.mrb[33].mxu1  ;;  %v2850_v20 = vadd.f32 %v6485_v15, %v2832_v26 }
 0x895   :  { %v3446_v7 = vmul.f32 -1.442695, %v2763_v3 }
 0x896   :  { %5709 = vpow2.f32 %v3445_v30 }
 0x897   :  { %5711 = vpow2.f32 %v3446_v7 }
 0x8a0   :  { %v5710_v11 = vpop.eup %5709 }
 0x8a1   :  { %v2840_v14 = vadd.f32 1.0, %v5710_v11  ;;  %v5712_v18 = vpop.eup %5711 }
 0x8a2   :  { %v2847_v25 = vadd.f32 1.0, %v5712_v18  ;;  %v3038_v18 = vpop.permute.xlu1 %3037 }
 0x8a3   :  { %5713 = vrcp.f32 %v2840_v14 }
 0x8ad   :  { %v5714_v58 = vpop.eup %5713 }
 0x8ae   :  { %v2851_v22 = vmul.f32 %v5714_v58, %v2850_v20 }
 0x8b0   :  { %v2852_v24 = vadd.f32 %v2851_v22, %v6474_v63 }
 0x8b2   :  { %5715 = vtanh.f32 %v2852_v24 }
 0x8b3   :  { %5717 = vrcp.f32 %v2847_v25 }
 0x8bc   :  { %v5716_v27 = vpop.eup %5715 }
 0x8bd   :  { %v2854_v31 = vsub.f32 %v6732_v61, %v5716_v27  ;;  %v5718_v9 = vpop.eup %5717 }
 0x8bf   :  { %v2855_v16 = vmul.f32 %v5718_v9, %v2854_v31 }
 0x8c1   :  { %v2856_v21 = vadd.f32 %v5716_v27, %v2855_v16 }
 0x8c3   :  { %v2857_v48 = vsub.f32 %v2856_v21, %v6732_v61 }
 0x8c5   :  { %v2863_v34 = vmul.f32 %v2861_v23, %v2857_v48 }
 0x8c7   :  { %v6777_v39 = vadd.f32 %v2863_v34, %v6732_v61 }
 0x8c9   :  { %2866 = vst [vmem:[#allocation9 + $0x30] sm:$0xff] %v6777_v39  ;;  %2937 = vmatmul.mubr.f32.vlgmr.msra.gmra.mrb[14].mxu0 %v6777_v39  ;;  %4424 = vmatmul.mubr.f32.vlgmr.msra.gmra.mrb[34].mxu1 %v6777_v39 }
 0x8ca   :  { %5507 = vmatpush1.bf16.msra.mxu0 %v6323_v35  ;;  %5538 = vmatpush3.bf16.msra.mxu1 %v6349_v54 }
 0x8cb   :  { %5509 = vmatprep.subr.bf16.mxu0 %v6330_v37  ;;  %5539 = vmatprep.subr.bf16.mxu1 %v5826_v0 }
 0x8cc   :  { %3113 = vmatprep.mubr.f32.mxu0 %v5827_v1  ;;  %4458 = vmatprep.mubr.msk.f32.mxu1 %vm5828_vm0, %v5827_v1 }
 0x8ce   :  { %5511 = vmatpush1.bf16.msra.mxu0 %v6334_v43  ;;  %5541 = vmatpush3.bf16.msra.mxu1 %v6362_v2 }
 0x8cf   :  { %5513 = vmatprep.subr.bf16.mxu0 %v6341_v46  ;;  %5542 = vmatprep.subr.bf16.mxu1 %v5826_v0 }
 0x8d2   :  { %5515 = vmatpush1.bf16.msra.mxu0 %v6346_v52  ;;  %5544 = vmatpush3.bf16.msra.mxu1 %v6377_v17 }
 0x8d3   :  { %5517 = vmatprep.subr.bf16.mxu0 %v6355_v56  ;;  %5545 = vmatprep.subr.bf16.mxu1 %v5826_v0 }
 0x8d6   :  { %5519 = vmatpush1.bf16.msra.mxu0 %v6359_v62  ;;  %5547 = vmatpush3.bf16.msra.mxu1 %v6390_v33 }
 0x8d7   :  { %5521 = vmatprep.subr.bf16.mxu0 %v6368_v4  ;;  %5548 = vmatprep.subr.bf16.mxu1 %v5826_v0 }
 0x8da   :  { %5523 = vmatpush1.bf16.msra.mxu0 %v6374_v13  ;;  %5550 = vmatpush3.bf16.msra.mxu1 %v6400_v36 }
 0x8db   :  { %5525 = vmatprep.subr.bf16.mxu0 %v6383_v19  ;;  %5551 = vmatprep.subr.bf16.mxu1 %v5826_v0 }
 0x8de   :  { %5527 = vmatpush1.bf16.msra.mxu0 %v6387_v28  ;;  %5553 = vmatpush3.bf16.msra.mxu1 %v6410_v44 }
 0x8df   :  { %5529 = vmatprep.subr.bf16.mxu0 %v6393_v5  ;;  %5554 = vmatprep.subr.bf16.mxu1 %v5826_v0 }
 0x8e2   :  { %5531 = vmatpush1.bf16.msra.mxu0 %v6397_v32  ;;  %5556 = vmatpush3.bf16.msra.mxu1 %v6423_v51 }
 0x8e3   :  { %5533 = vmatprep.subr.bf16.mxu0 %v6403_v38  ;;  %5557 = vmatprep.subr.bf16.mxu1 %v5826_v0 }
 0x8e6   :  { %5535 = vmatpush1.bf16.msra.mxu0 %v6407_v42  ;;  %5559 = vmatpush3.bf16.msra.mxu1 %v6429_v57 }
 0x8e7   :  { %5561 = vmatprep.subr.bf16.mxu0 %v6314_v10  ;;  %5592 = vmatprep.subr.bf16.mxu1 %v5826_v0 }
 0x99c   :  { %v2938_v63 = vpop.f32.mrb[14].mxu0  ;;  %v3009_v40 = vpop.f32.mrb[34].mxu1 }
 0x99d   :  { %v3448_v41 = vmul.f32 -1.442695, %v2938_v63  ;;  %v2940_v45 = vpop.f32.mrb[15].mxu0  ;;  %v4425_v47 = vpop.f32.mrb[35].mxu1  ;;  %v3027_v59 = vadd.f32 %v6485_v15, %v3009_v40 }
 0x99e   :  { %v3449_v29 = vmul.f32 -1.442695, %v2940_v45  ;;  %v3392_v47 = vpop.permute.xlu1 %3391 }
 0x99f   :  { %5719 = vpow2.f32 %v3448_v41 }
 0x9a0   :  { %5721 = vpow2.f32 %v3449_v29 }
 0x9a9   :  { %v5720_v49 = vpop.eup %5719 }
 0x9aa   :  { %v3017_v53 = vadd.f32 1.0, %v5720_v49  ;;  %v5722_v55 = vpop.eup %5721 }
 0x9ab   :  { %v3024_v26 = vadd.f32 1.0, %v5722_v55 }
 0x9ac   :  { %5723 = vrcp.f32 %v3017_v53 }
 0x9b6   :  { %v5724_v61 = vpop.eup %5723 }
 0x9b7   :  { %v3028_v60 = vmul.f32 %v5724_v61, %v3027_v59 }
 0x9b9   :  { %v3029_v10 = vadd.f32 %v3028_v60, %v6476_v6 }
 0x9bb   :  { %5725 = vtanh.f32 %v3029_v10 }
 0x9bc   :  { %5727 = vrcp.f32 %v3024_v26 }
 0x9c5   :  { %v5726_v30 = vpop.eup %5725 }
 0x9c6   :  { %v3031_v3 = vsub.f32 %v6777_v39, %v5726_v30  ;;  %v5728_v50 = vpop.eup %5727 }
 0x9c8   :  { %v3032_v7 = vmul.f32 %v5728_v50, %v3031_v3 }
 0x9ca   :  { %v3033_v11 = vadd.f32 %v5726_v30, %v3032_v7 }
 0x9cc   :  { %v3034_v14 = vsub.f32 %v3033_v11, %v6777_v39 }
 0x9ce   :  { %v3040_v20 = vmul.f32 %v3038_v18, %v3034_v14 }
 0x9d0   :  { %v6822_v58 = vadd.f32 %v3040_v20, %v6777_v39 }
 0x9d2   :  { %3043 = vst [vmem:[#allocation9 + $0x38] sm:$0xff] %v6822_v58  ;;  %3114 = vmatmul.mubr.f32.vlgmr.msra.gmra.mrb[16].mxu0 %v6822_v58  ;;  %4459 = vmatmul.mubr.f32.vlgmr.msra.gmra.mrb[36].mxu1 %v6822_v58 }
 0x9d3   :  { %5563 = vmatpush1.bf16.msra.mxu0 %v6323_v35  ;;  %5594 = vmatpush3.bf16.msra.mxu1 %v6349_v54 }
 0x9d4   :  { %5565 = vmatprep.subr.bf16.mxu0 %v6330_v37  ;;  %5595 = vmatprep.subr.bf16.mxu1 %v5826_v0 }
 0x9d5   :  { %3290 = vmatprep.mubr.f32.mxu0 %v5827_v1  ;;  %4493 = vmatprep.mubr.msk.f32.mxu1 %vm5828_vm0, %v5827_v1 }
 0x9d7   :  { %5567 = vmatpush1.bf16.msra.mxu0 %v6334_v43  ;;  %5597 = vmatpush3.bf16.msra.mxu1 %v6362_v2 }
 0x9d8   :  { %5569 = vmatprep.subr.bf16.mxu0 %v6341_v46  ;;  %5598 = vmatprep.subr.bf16.mxu1 %v5826_v0 }
 0x9db   :  { %5571 = vmatpush1.bf16.msra.mxu0 %v6346_v52  ;;  %5600 = vmatpush3.bf16.msra.mxu1 %v6377_v17 }
 0x9dc   :  { %5573 = vmatprep.subr.bf16.mxu0 %v6355_v56  ;;  %5601 = vmatprep.subr.bf16.mxu1 %v5826_v0 }
 0x9df   :  { %5575 = vmatpush1.bf16.msra.mxu0 %v6359_v62  ;;  %5603 = vmatpush3.bf16.msra.mxu1 %v6390_v33 }
 0x9e0   :  { %5577 = vmatprep.subr.bf16.mxu0 %v6368_v4  ;;  %5604 = vmatprep.subr.bf16.mxu1 %v5826_v0 }
 0x9e3   :  { %5579 = vmatpush1.bf16.msra.mxu0 %v6374_v13  ;;  %5606 = vmatpush3.bf16.msra.mxu1 %v6400_v36 }
 0x9e4   :  { %5581 = vmatprep.subr.bf16.mxu0 %v6383_v19  ;;  %5607 = vmatprep.subr.bf16.mxu1 %v5826_v0 }
 0x9e7   :  { %5583 = vmatpush1.bf16.msra.mxu0 %v6387_v28  ;;  %5609 = vmatpush3.bf16.msra.mxu1 %v6410_v44 }
 0x9e8   :  { %5585 = vmatprep.subr.bf16.mxu0 %v6393_v5  ;;  %5610 = vmatprep.subr.bf16.mxu1 %v5826_v0 }
 0x9eb   :  { %5587 = vmatpush1.bf16.msra.mxu0 %v6397_v32  ;;  %5612 = vmatpush3.bf16.msra.mxu1 %v6423_v51 }
 0x9ec   :  { %5589 = vmatprep.subr.bf16.mxu0 %v6403_v38  ;;  %5613 = vmatprep.subr.bf16.mxu1 %v5826_v0  ;;  %v5749_v0 = vld [vmem:[%s6885_s5] ss:$0 sm:$0xff]  ;;  %s5830_s5 = smov [#allocation9]  }
 0x9ed   :  { %s3404_s14 = sshll.u32 %s5830_s5, 4  ;;  %s3405_s14 = int_to_ptr.vmem [resolvable:$true] %s3404_s14 }
 0x9ee   :  { %s5794_s15 = scalar_lea.vmem %s3405_s14, 1280  ;;  %p5799_p3 = scmp.lt.s32.totalorder %s3405_s14, %s3405_s14 }
 0x9ef   :  { %5591 = vmatpush1.bf16.msra.mxu0 %v6407_v42  ;;  %5615 = vmatpush3.bf16.msra.mxu1 %v6429_v57  ;;  %v3215_v42 = vpop.permute.xlu0 %3214  ;;  %p5795_p2 = scmp.ne.s32.totalorder %s3405_s14, %s5794_s15  ;;  %p5800_p4 = scmp.lt.s32.totalorder %s5794_s15, %s5794_s15 }
 0x9f1   :  { %p5801_p5 = por %p5800_p4, %p5799_p3 }
 0x9f3   :  { %p5802_p6 = pnand %p5801_p5, %p5795_p2 }
 0xaa5   :  { %v3115_v1 = vpop.f32.mrb[16].mxu0  ;;  %v3186_v35 = vpop.f32.mrb[36].mxu1 }
 0xaa6   :  { %v3451_v37 = vmul.f32 -1.442695, %v3115_v1  ;;  %v3117_v43 = vpop.f32.mrb[17].mxu0  ;;  %v4460_v46 = vpop.f32.mrb[37].mxu1  ;;  %v3204_v2 = vadd.f32 %v5749_v0, %v3186_v35 }
 0xaa7   :  { %v3452_v52 = vmul.f32 -1.442695, %v3117_v43 }
 0xaa8   :  { %5729 = vpow2.f32 %v3451_v37 }
 0xaa9   :  { %5731 = vpow2.f32 %v3452_v52 }
 0xab2   :  { %v5730_v54 = vpop.eup %5729 }
 0xab3   :  { %v3194_v56 = vadd.f32 1.0, %v5730_v54  ;;  %v5732_v62 = vpop.eup %5731 }
 0xab4   :  { %v3201_v19 = vadd.f32 1.0, %v5732_v62 }
 0xab5   :  { %5733 = vrcp.f32 %v3194_v56 }
 0xabf   :  { %v5734_v4 = vpop.eup %5733 }
 0xac0   :  { %v3205_v13 = vmul.f32 %v5734_v4, %v3204_v2 }
 0xac2   :  { %v3206_v17 = vadd.f32 %v3205_v13, %v6478_v8 }
 0xac4   :  { %5735 = vtanh.f32 %v3206_v17 }
 0xac5   :  { %5737 = vrcp.f32 %v3201_v19 }
 0xace   :  { %v5736_v28 = vpop.eup %5735 }
 0xacf   :  { %v3208_v33 = vsub.f32 %v6822_v58, %v5736_v28  ;;  %v5738_v5 = vpop.eup %5737 }
 0xad1   :  { %v3209_v32 = vmul.f32 %v5738_v5, %v3208_v33 }
 0xad3   :  { %v3210_v36 = vadd.f32 %v5736_v28, %v3209_v32 }
 0xad5   :  { %v3211_v38 = vsub.f32 %v3210_v36, %v6822_v58 }
 0xad7   :  { %v3217_v44 = vmul.f32 %v3215_v42, %v3211_v38 }
 0xad9   :  { %v3218_v51 = vadd.f32 %v3217_v44, %v6822_v58 }
 0xadb   :  { %3220 = vst [vmem:[#allocation9 + $0x40] sm:$0xff] %v3218_v51  ;;  %3291 = vmatmul.mubr.f32.vlgmr.msra.gmra.mrb[18].mxu0 %v3218_v51  ;;  %4494 = vmatmul.mubr.f32.vlgmr.msra.gmra.mrb[38].mxu1 %v3218_v51 }
 0xbae   :  { %v3292_v57 = vpop.f32.mrb[18].mxu0  ;;  %v3363_v6 = vpop.f32.mrb[38].mxu1 }
 0xbaf   :  { %v3454_v8 = vmul.f32 -1.442695, %v3292_v57  ;;  %v3294_v15 = vpop.f32.mrb[19].mxu0  ;;  %v4495_v22 = vpop.f32.mrb[39].mxu1  ;;  %v3381_v9 = vadd.f32 %v5749_v0, %v3363_v6 }
 0xbb0   :  { %v3455_v24 = vmul.f32 -1.442695, %v3294_v15 }
 0xbb1   :  { %5739 = vpow2.f32 %v3454_v8 }
 0xbb2   :  { %5741 = vpow2.f32 %v3455_v24 }
 0xbbb   :  { %v5740_v25 = vpop.eup %5739 }
 0xbbc   :  { %v3371_v27 = vadd.f32 1.0, %v5740_v25  ;;  %v5742_v31 = vpop.eup %5741 }
 0xbbd   :  { %v3378_v23 = vadd.f32 1.0, %v5742_v31 }
 0xbbe   :  { %5743 = vrcp.f32 %v3371_v27 }
 0xbc8   :  { %v5744_v16 = vpop.eup %5743 }
 0xbc9   :  { %v3382_v21 = vmul.f32 %v5744_v16, %v3381_v9 }
 0xbcb   :  { %v3383_v48 = vadd.f32 %v3382_v21, %v6480_v12 }
 0xbcd   :  { %5745 = vtanh.f32 %v3383_v48 }
 0xbce   :  { %5747 = vrcp.f32 %v3378_v23 }
 0xbd7   :  { %v5746_v34 = vpop.eup %5745 }
 0xbd8   :  { %v3385_v39 = vsub.f32 %v3218_v51, %v5746_v34  ;;  %v5748_v63 = vpop.eup %5747 }
 0xbda   :  { %v3386_v40 = vmul.f32 %v5748_v63, %v3385_v39 }
 0xbdc   :  { %v3387_v41 = vadd.f32 %v5746_v34, %v3386_v40 }
 0xbde   :  { %v3388_v45 = vsub.f32 %v3387_v41, %v3218_v51 }
 0xbe0   :  { %v3394_v29 = vmul.f32 %v3392_v47, %v3388_v45 }
 0xbe2   :  { %v3395_v49 = vadd.f32 %v3394_v29, %v3218_v51 }
 0xbe4   :  { %3397 = vst [vmem:[#allocation9 + $0x48] sm:$0xff] %v3395_v49 }
 0xbe5   :  { %5805 = shalt.err (!%p5802_p6)
}
 0xbe6   :  { %s5806_s18 = scalar_lea.hbm %s6886_s6, 1280 }
 0xbe7   :  { %p5807_p7 = scmp.ne.s32.totalorder %s6886_s6, %s5806_s18  ;;  %p5810_p8 = scmp.lt.u32.totalorder %s5806_s18, %s6886_s6 }
 0xbe9   :  { %p5812_p9 = pnand %p5810_p8, %p5807_p7 }
 0xbeb   :  { %5815 = shalt.err (!%p5812_p9)
}
 0xbec   :  { %s5831_s21 = smov 128   ;;  %s5832_s4 = smov 8  }
 0xbed   :  { %3410 = dma.vmem_to_hbm [thread:$0]  %s3405_s14, 1280, %s6886_s6, [#allocation6], %s5831_s21, %s5831_s21, %s5832_s4  }
 0xbee   :  { %5820 = dma.done.wait [#allocation6], 1280  }
 0xbef   :  { %5821 = vsyncadd [#allocation6], 4294966016 }
 0xbf0   :  { %3414 = vsyncpa [#allocation5], 1 }
 0xbf1   :  { %3415 = vsyncpa [#allocation8], 1 }
 0xbf2   :  { %3416 = vsyncpa [#allocation6], 1 }

</bundles_post_ra>
